<compile_context>
chip_gen: v7x
topology: tpu7x:2x2x1
jax: 0.10.0
libtpu: 0.0.40
codegen_flags: <defaults>
</compile_context>

<pallas_src>
import functools

import jax
import jax.numpy as jnp
import numpy as np
from jax.experimental import pallas as pl
from jax.experimental.pallas import tpu as pltpu

KSIZE = 7
PAD = 3


def _spatial_attention_kernel(w_ref, b_ref, x_ref, o_ref,
                              sum_ref, max_ref, sum_pad, max_pad,
                              *, c_total, has_tail):
    # w_ref: (2*7*7,) f32 SMEM. First 49 = avg-channel weights already scaled by 1/C
    #        (applied to the raw channel SUM), next 49 = max-channel weights.
    # b_ref: (1,)     f32 SMEM conv bias.
    # x_ref: (Bb, Ct, HW) unpadded, lane-dense input block in VMEM.
    # o_ref: (Bb, 1, H, W) output block in VMEM.
    # sum_ref / max_ref: (Bb, 8, HW) f32 wide running channel sum / max (persist over k).
    # sum_pad / max_pad: (Bb, H+6, W+6) f32 reflect-padded reduced maps.
    k = pl.program_id(1)
    nk = pl.num_programs(1)
    Bb, Ct, HW = x_ref.shape
    H, W = o_ref.shape[2], o_ref.shape[3]

    n_full = Ct // 8
    rem = Ct - n_full * 8  # > 0 only when Ct == C (single C tile)

    # --- channel reduction over this C tile: lane-dense groups of 8 channels ---
    s0 = jnp.zeros((Bb, 8, HW), jnp.float32)
    m0 = jnp.full((Bb, 8, HW), -jnp.inf, jnp.float32)

    def group(g, carry):
        s, m = carry
        off = pl.multiple_of(g * 8, 8)
        chunk = x_ref[:, pl.ds(off, 8), :].astype(jnp.float32)  # (Bb, 8, HW), dense
        if has_tail:
            cidx = (k * Ct + off
                    + jax.lax.broadcasted_iota(jnp.int32, (Bb, 8, HW), 1))
            valid = cidx < c_total
            s = s + jnp.where(valid, chunk, 0.0)
            m = jnp.maximum(m, jnp.where(valid, chunk, -jnp.inf))
        else:
            s = s + chunk
            m = jnp.maximum(m, chunk)
        return s, m

    if n_full > 0:
        s, m = jax.lax.fori_loop(0, n_full, group, (s0, m0),
                                 unroll=min(2, n_full))
    else:
        s, m = s0, m0

    @pl.when(k == 0)
    def _():
        sum_ref[...] = s
        max_ref[...] = m

    @pl.when(k > 0)
    def _():
        sum_ref[...] = sum_ref[...] + s
        max_ref[...] = jnp.maximum(max_ref[...], m)

    # Remainder channels (< 8). Only possible when Ct == C (single C tile), so the
    # scratch already holds this step's carries; fold with a static sublane slice.
    if rem > 0:
        tail = x_ref[:, n_full * 8:n_full * 8 + rem, :].astype(jnp.float32)
        sum_ref[:, :rem, :] = sum_ref[:, :rem, :] + tail
        max_ref[:, :rem, :] = jnp.maximum(max_ref[:, :rem, :], tail)

    # --- finalize: collapse partials, reflect-pad in VMEM, run the 7x7 conv (VPU) ---
    @pl.when(k == nk - 1)
    def _():
        # Collapse the 8 sublane partial rows into lane-dense (Bb, HW) maps.
        acc_s = sum_ref[:, 0, :]
        acc_m = max_ref[:, 0, :]
        for j in range(1, 8):
            acc_s = acc_s + sum_ref[:, j, :]
            acc_m = jnp.maximum(acc_m, max_ref[:, j, :])
        # Stash the collapsed maps back in sublane row 0 so rows can be re-sliced
        # from a ref (avoids an in-kernel (Bb,HW)->(Bb,H,W) value reshape).
        sum_ref[:, 0, :] = acc_s
        max_ref[:, 0, :] = acc_m

        # Interior rows + reflected rows (sublane direction), written row by row
        # from the lane-dense flat maps into the padded scratch.
        for h in range(H):
            sum_pad[:, PAD + h, PAD:PAD + W] = sum_ref[:, 0, h * W:(h + 1) * W]
            max_pad[:, PAD + h, PAD:PAD + W] = max_ref[:, 0, h * W:(h + 1) * W]
        for rr in range(1, PAD + 1):
            sum_pad[:, PAD - rr, PAD:PAD + W] = sum_ref[:, 0, rr * W:(rr + 1) * W]
            max_pad[:, PAD - rr, PAD:PAD + W] = max_ref[:, 0, rr * W:(rr + 1) * W]
            sum_pad[:, PAD + H - 1 + rr, PAD:PAD + W] = \
                sum_ref[:, 0, (H - 1 - rr) * W:(H - rr) * W]
            max_pad[:, PAD + H - 1 + rr, PAD:PAD + W] = \
                max_ref[:, 0, (H - 1 - rr) * W:(H - rr) * W]
        # Reflect columns (lane direction) using the already row-padded strip.
        # (Corners become reflect-of-reflect, matching ReflectionPad2d.)
        for cc in range(1, PAD + 1):
            sum_pad[:, :, PAD - cc:PAD - cc + 1] = sum_pad[:, :, PAD + cc:PAD + cc + 1]
            max_pad[:, :, PAD - cc:PAD - cc + 1] = max_pad[:, :, PAD + cc:PAD + cc + 1]
            sum_pad[:, :, PAD + W - 1 + cc:PAD + W + cc] = \
                sum_pad[:, :, PAD + W - 1 - cc:PAD + W - cc]
            max_pad[:, :, PAD + W - 1 + cc:PAD + W + cc] = \
                max_pad[:, :, PAD + W - 1 - cc:PAD + W - cc]

        # 7x7 conv over the 2-channel [sum (pre-scaled weights), max] stack.
        # Lane shift (kw) hoisted out of the kh loop; 2 partial accumulators keep
        # vreg pressure bounded (runs once per batch block).
        acc0 = jnp.full((Bb, H, W), b_ref[0], dtype=jnp.float32)  # bias-init
        acc1 = jnp.zeros((Bb, H, W), jnp.float32)
        t = 0
        for kw in range(KSIZE):
            sum_w = sum_pad[:, :, kw:kw + W]   # (Bb, Hp, W): one lane shift per kw
            max_w = max_pad[:, :, kw:kw + W]
            for kh in range(KSIZE):
                ws = w_ref[kh * KSIZE + kw]
                wm = w_ref[KSIZE * KSIZE + kh * KSIZE + kw]
                term = ws * sum_w[:, kh:kh + H, :] + wm * max_w[:, kh:kh + H, :]
                if t % 2 == 0:
                    acc0 = acc0 + term
                else:
                    acc1 = acc1 + term
                t += 1
        o_ref[:, 0, :, :] = (acc0 + acc1).astype(o_ref.dtype)


def _largest_divisor_leq(n, cap):
    cap = int(max(1, min(n, cap)))
    for d in range(cap, 0, -1):
        if n % d == 0:
            return d
    return 1


def spatial_attention(x, weight, bias):
    """x: (B, C, H, W); weight: (1, 2, 7, 7); bias: (1,). Returns (B, 1, H, W)."""
    B, C, H, W = x.shape
    assert H > PAD and W > PAD, "reflect padding requires H, W > 3"
    HW = H * W
    Hp, Wp = H + 2 * PAD, W + 2 * PAD
    itemsize = jnp.dtype(x.dtype).itemsize

    # Lane-dense layout for the channel reduction (contiguous reshape, free).
    x_flat = x.reshape(B, C, HW)

    # Bb: small batch block. Bounds the conv-epilogue accumulator vregs, keeps the
    # (Bb, 8, HW) reduction carries register-resident, and leaves >= 2 batch grid
    # steps so v7x's two TensorCores both get work.
    r = (-(-H // 8)) * (-(-W // 128))            # f32 vregs per (H, W) image map
    bb_cap = max(1, min(8 // max(1, r), 2048 // max(1, HW)))
    Bb = _largest_divisor_leq(B, min(bb_cap, max(1, B // 2)))

    # Ct: channel tile sized for ~8 MiB input blocks (amortizes per-step overhead
    # on v6e/v7x, still comfortable on v5e). Must be a multiple of 8 (sublane
    # constraint of the (Bb, Ct, HW) block) unless it covers all of C.
    target_block_bytes = 8 * 1024 * 1024
    ct_cap = max(1, target_block_bytes // (Bb * HW * itemsize))
    if C <= ct_cap:
        Ct, has_tail = C, False
    else:
        cap8 = max(8, (ct_cap // 8) * 8)
        best = 0
        for d in range(cap8, 7, -8):             # largest mult-of-8 divisor of C
            if C % d == 0:
                best = d
                break
        if best >= max(8, cap8 // 2):
            Ct, has_tail = best, False
        else:
            Ct, has_tail = cap8, True            # masked tail C-tile in-kernel
    assert Ct == C or Ct % 8 == 0
    nk = pl.cdiv(C, Ct)

    # 1/C is folded into the avg-channel weights so the kernel convolves raw sums.
    w_sum = (weight[0, 0].astype(jnp.float32) / jnp.float32(C)).reshape(-1)  # (49,)
    w_max = weight[0, 1].astype(jnp.float32).reshape(-1)                     # (49,)
    w_flat = jnp.concatenate([w_sum, w_max])                                 # (98,)
    b_flat = bias.reshape(-1).astype(jnp.float32)                            # (1,)

    in_block = Bb * Ct * HW * itemsize
    out_block = Bb * H * W * itemsize
    scratch = (2 * Bb * 8 * HW + 2 * Bb * Hp * Wp) * 4
    vmem_limit = int(min(max(2 * in_block + 2 * out_block + scratch + (4 << 20),
                             16 << 20), 48 << 20))

    kernel = functools.partial(_spatial_attention_kernel,
                               c_total=int(C), has_tail=has_tail)

    return pl.pallas_call(
        kernel,
        out_shape=jax.ShapeDtypeStruct((B, 1, H, W), x.dtype),
        grid=(B // Bb, nk),                                       # reduction axis last
        in_specs=[
            pl.BlockSpec(memory_space=pltpu.MemorySpace.SMEM),    # conv weights
            pl.BlockSpec(memory_space=pltpu.MemorySpace.SMEM),    # conv bias
            pl.BlockSpec((Bb, Ct, HW), lambda b, k: (b, k, 0)),
        ],
        out_specs=pl.BlockSpec((Bb, 1, H, W), lambda b, k: (b, 0, 0, 0)),
        scratch_shapes=[
            pltpu.VMEM((Bb, 8, HW), jnp.float32),   # wide running channel sum
            pltpu.VMEM((Bb, 8, HW), jnp.float32),   # wide running channel max
            pltpu.VMEM((Bb, Hp, Wp), jnp.float32),  # reflect-padded sum map
            pltpu.VMEM((Bb, Hp, Wp), jnp.float32),  # reflect-padded max map
        ],
        compiler_params=pltpu.CompilerParams(
            dimension_semantics=("parallel", "arbitrary"),
            vmem_limit_bytes=vmem_limit,
        ),
    )(w_flat, b_flat, x_flat)


def reference(x, weight, bias):
    x_avg = jnp.mean(x, axis=1, keepdims=True)
    x_max = jnp.max(x, axis=1, keepdims=True)
    x2 = jnp.concatenate([x_avg, x_max], axis=1)
    x2p = jnp.pad(x2, ((0, 0), (0, 0), (PAD, PAD), (PAD, PAD)), mode="reflect")
    out = jax.lax.conv_general_dilated(
        x2p, weight, window_strides=(1, 1), padding="VALID",
        dimension_numbers=("NCHW", "OIHW", "NCHW"))
    return out + bias.reshape(1, 1, 1, 1)


if __name__ == "__main__":
    key = jax.random.PRNGKey(0)
    kx, kw = jax.random.split(key)

    B, C, H, W = 2, 4, 16, 16
    x = jax.random.normal(kx, (B, C, H, W), dtype=jnp.float32)

    # Conv2d(2, 1, 7) weight: kaiming_normal_(fan_in, relu) -> std = sqrt(2/fan_in)
    fan_in = 2 * KSIZE * KSIZE
    weight = jax.random.normal(kw, (1, 2, KSIZE, KSIZE), dtype=jnp.float32) * np.sqrt(2.0 / fan_in)
    bias = jnp.full((1,), 0.1, dtype=jnp.float32)

    out = spatial_attention(x, weight, bias)
    out = jax.block_until_ready(out)

    ref = jax.block_until_ready(reference(x, weight, bias))
    assert out.shape == (B, 1, H, W), out.shape
    np.testing.assert_allclose(np.asarray(out), np.asarray(ref), rtol=1e-5, atol=1e-5)

    print("KERNEL_OK")
</pallas_src>

<mosaic_0001>
module attributes {stable_mosaic.version = 11 : i64} {
  func.func @_spatial_attention_kernel(%arg0: i32, %arg1: i32, %arg2: memref<98xf32, #tpu.memory_space<smem>>, %arg3: memref<1xf32, #tpu.memory_space<smem>>, %arg4: memref<1x4x256xf32, #tpu.memory_space<vmem>>, %arg5: memref<1x1x16x16xf32, #tpu.memory_space<vmem>>, %arg6: memref<1x8x256xf32, #tpu.memory_space<vmem>>, %arg7: memref<1x8x256xf32, #tpu.memory_space<vmem>>, %arg8: memref<1x22x22xf32, #tpu.memory_space<vmem>>, %arg9: memref<1x22x22xf32, #tpu.memory_space<vmem>>) attributes {dimension_semantics = [#tpu.dimension_semantics<parallel>, #tpu.dimension_semantics<arbitrary>], iteration_bounds = array<i64: 2, 1>, scalar_prefetch = 0 : i64, scratch_operands = 4 : i64, tpu.core_type = #tpu.core_type<tc>, window_params = [{transform_indices = @transform_0, window_bounds = array<i64: 98>}, {transform_indices = @transform_1, window_bounds = array<i64: 1>}, {transform_indices = @transform_2, window_bounds = array<i64: 1, 4, 256>}, {transform_indices = @transform_3, window_bounds = array<i64: 1, 1, 16, 16>}]} {
    %cst = arith.constant 0.000000e+00 : f32
    %0 = vector.broadcast %cst : f32 to vector<1x8x256xf32>
    %cst_0 = arith.constant 0xFF800000 : f32
    %1 = vector.broadcast %cst_0 : f32 to vector<1x8x256xf32>
    %c0_i32 = arith.constant 0 : i32
    %2 = arith.cmpi eq, %arg1, %c0_i32 : i32
    %3 = arith.extui %2 : i1 to i32
    %c0_i32_1 = arith.constant 0 : i32
    %4 = arith.cmpi ne, %3, %c0_i32_1 : i32
    scf.if %4 {
      %c0_20 = arith.constant 0 : index
      %c0_21 = arith.constant 0 : index
      %c0_22 = arith.constant 0 : index
      %18 = vector.load %arg6[%c0_20, %c0_21, %c0_22] : memref<1x8x256xf32, #tpu.memory_space<vmem>>, vector<1x8x256xf32>
      tpu.vector_store %arg6[%c0_20, %c0_21, %c0_22], %0 {strides = array<i32>} : memref<1x8x256xf32, #tpu.memory_space<vmem>>, vector<1x8x256xf32>,
      %c0_23 = arith.constant 0 : index
      %c0_24 = arith.constant 0 : index
      %c0_25 = arith.constant 0 : index
      %19 = vector.load %arg7[%c0_23, %c0_24, %c0_25] : memref<1x8x256xf32, #tpu.memory_space<vmem>>, vector<1x8x256xf32>
      tpu.vector_store %arg7[%c0_23, %c0_24, %c0_25], %1 {strides = array<i32>} : memref<1x8x256xf32, #tpu.memory_space<vmem>>, vector<1x8x256xf32>,
    } else {
    }
    %c0_i32_2 = arith.constant 0 : i32
    %5 = arith.cmpi sgt, %arg1, %c0_i32_2 : i32
    %6 = arith.extui %5 : i1 to i32
    %c0_i32_3 = arith.constant 0 : i32
    %7 = arith.cmpi ne, %6, %c0_i32_3 : i32
    scf.if %7 {
      %c0_20 = arith.constant 0 : index
      %c0_21 = arith.constant 0 : index
      %c0_22 = arith.constant 0 : index
      %18 = vector.load %arg6[%c0_20, %c0_21, %c0_22] : memref<1x8x256xf32, #tpu.memory_space<vmem>>, vector<1x8x256xf32>
      %19 = arith.addf %18, %0 : vector<1x8x256xf32>
      %c0_23 = arith.constant 0 : index
      %c0_24 = arith.constant 0 : index
      %c0_25 = arith.constant 0 : index
      %20 = vector.load %arg6[%c0_23, %c0_24, %c0_25] : memref<1x8x256xf32, #tpu.memory_space<vmem>>, vector<1x8x256xf32>
      tpu.vector_store %arg6[%c0_23, %c0_24, %c0_25], %19 {strides = array<i32>} : memref<1x8x256xf32, #tpu.memory_space<vmem>>, vector<1x8x256xf32>,
      %c0_26 = arith.constant 0 : index
      %c0_27 = arith.constant 0 : index
      %c0_28 = arith.constant 0 : index
      %21 = vector.load %arg7[%c0_26, %c0_27, %c0_28] : memref<1x8x256xf32, #tpu.memory_space<vmem>>, vector<1x8x256xf32>
      %22 = arith.maximumf %21, %1 : vector<1x8x256xf32>
      %c0_29 = arith.constant 0 : index
      %c0_30 = arith.constant 0 : index
      %c0_31 = arith.constant 0 : index
      %23 = vector.load %arg7[%c0_29, %c0_30, %c0_31] : memref<1x8x256xf32, #tpu.memory_space<vmem>>, vector<1x8x256xf32>
      tpu.vector_store %arg7[%c0_29, %c0_30, %c0_31], %22 {strides = array<i32>} : memref<1x8x256xf32, #tpu.memory_space<vmem>>, vector<1x8x256xf32>,
    } else {
    }
    %c0 = arith.constant 0 : index
    %c0_4 = arith.constant 0 : index
    %c0_5 = arith.constant 0 : index
    %8 = vector.load %arg4[%c0, %c0_4, %c0_5] : memref<1x4x256xf32, #tpu.memory_space<vmem>>, vector<1x4x256xf32>
    %c0_6 = arith.constant 0 : index
    %c0_7 = arith.constant 0 : index
    %c0_8 = arith.constant 0 : index
    %9 = vector.load %arg6[%c0_6, %c0_7, %c0_8] : memref<1x8x256xf32, #tpu.memory_space<vmem>>, vector<1x4x256xf32>
    %10 = arith.addf %9, %8 : vector<1x4x256xf32>
    %c0_9 = arith.constant 0 : index
    %c0_10 = arith.constant 0 : index
    %c0_11 = arith.constant 0 : index
    %11 = vector.load %arg6[%c0_9, %c0_10, %c0_11] : memref<1x8x256xf32, #tpu.memory_space<vmem>>, vector<1x4x256xf32>
    tpu.vector_store %arg6[%c0_9, %c0_10, %c0_11], %10 {strides = array<i32>} : memref<1x8x256xf32, #tpu.memory_space<vmem>>, vector<1x4x256xf32>,
    %c0_12 = arith.constant 0 : index
    %c0_13 = arith.constant 0 : index
    %c0_14 = arith.constant 0 : index
    %12 = vector.load %arg7[%c0_12, %c0_13, %c0_14] : memref<1x8x256xf32, #tpu.memory_space<vmem>>, vector<1x4x256xf32>
    %13 = arith.maximumf %12, %8 : vector<1x4x256xf32>
    %c0_15 = arith.constant 0 : index
    %c0_16 = arith.constant 0 : index
    %c0_17 = arith.constant 0 : index
    %14 = vector.load %arg7[%c0_15, %c0_16, %c0_17] : memref<1x8x256xf32, #tpu.memory_space<vmem>>, vector<1x4x256xf32>
    tpu.vector_store %arg7[%c0_15, %c0_16, %c0_17], %13 {strides = array<i32>} : memref<1x8x256xf32, #tpu.memory_space<vmem>>, vector<1x4x256xf32>,
    %c0_i32_18 = arith.constant 0 : i32
    %15 = arith.cmpi eq, %arg1, %c0_i32_18 : i32
    %16 = arith.extui %15 : i1 to i32
    %c0_i32_19 = arith.constant 0 : i32
    %17 = arith.cmpi ne, %16, %c0_i32_19 : i32
    scf.if %17 {
      %c0_20 = arith.constant 0 : index
      %c0_21 = arith.constant 0 : index
      %c0_22 = arith.constant 0 : index
      %18 = vector.load %arg6[%c0_20, %c0_21, %c0_22] : memref<1x8x256xf32, #tpu.memory_space<vmem>>, vector<1x1x256xf32>
      %19 = vector.shape_cast %18 : vector<1x1x256xf32> to vector<1x256xf32>
      %c0_23 = arith.constant 0 : index
      %c0_24 = arith.constant 0 : index
      %c0_25 = arith.constant 0 : index
      %20 = vector.load %arg7[%c0_23, %c0_24, %c0_25] : memref<1x8x256xf32, #tpu.memory_space<vmem>>, vector<1x1x256xf32>
      %21 = vector.shape_cast %20 : vector<1x1x256xf32> to vector<1x256xf32>
      %c0_26 = arith.constant 0 : index
      %c1 = arith.constant 1 : index
      %c0_27 = arith.constant 0 : index
      %22 = vector.load %arg6[%c0_26, %c1, %c0_27] : memref<1x8x256xf32, #tpu.memory_space<vmem>>, vector<1x1x256xf32>
      %23 = vector.shape_cast %22 : vector<1x1x256xf32> to vector<1x256xf32>
      %24 = arith.addf %19, %23 : vector<1x256xf32>
      %c0_28 = arith.constant 0 : index
      %c1_29 = arith.constant 1 : index
      %c0_30 = arith.constant 0 : index
      %25 = vector.load %arg7[%c0_28, %c1_29, %c0_30] : memref<1x8x256xf32, #tpu.memory_space<vmem>>, vector<1x1x256xf32>
      %26 = vector.shape_cast %25 : vector<1x1x256xf32> to vector<1x256xf32>
      %27 = arith.maximumf %21, %26 : vector<1x256xf32>
      %c0_31 = arith.constant 0 : index
      %c2 = arith.constant 2 : index
      %c0_32 = arith.constant 0 : index
      %28 = vector.load %arg6[%c0_31, %c2, %c0_32] : memref<1x8x256xf32, #tpu.memory_space<vmem>>, vector<1x1x256xf32>
      %29 = vector.shape_cast %28 : vector<1x1x256xf32> to vector<1x256xf32>
      %30 = arith.addf %24, %29 : vector<1x256xf32>
      %c0_33 = arith.constant 0 : index
      %c2_34 = arith.constant 2 : index
      %c0_35 = arith.constant 0 : index
      %31 = vector.load %arg7[%c0_33, %c2_34, %c0_35] : memref<1x8x256xf32, #tpu.memory_space<vmem>>, vector<1x1x256xf32>
      %32 = vector.shape_cast %31 : vector<1x1x256xf32> to vector<1x256xf32>
      %33 = arith.maximumf %27, %32 : vector<1x256xf32>
      %c0_36 = arith.constant 0 : index
      %c3 = arith.constant 3 : index
      %c0_37 = arith.constant 0 : index
      %34 = vector.load %arg6[%c0_36, %c3, %c0_37] : memref<1x8x256xf32, #tpu.memory_space<vmem>>, vector<1x1x256xf32>
      %35 = vector.shape_cast %34 : vector<1x1x256xf32> to vector<1x256xf32>
      %36 = arith.addf %30, %35 : vector<1x256xf32>
      %c0_38 = arith.constant 0 : index
      %c3_39 = arith.constant 3 : index
      %c0_40 = arith.constant 0 : index
      %37 = vector.load %arg7[%c0_38, %c3_39, %c0_40] : memref<1x8x256xf32, #tpu.memory_space<vmem>>, vector<1x1x256xf32>
      %38 = vector.shape_cast %37 : vector<1x1x256xf32> to vector<1x256xf32>
      %39 = arith.maximumf %33, %38 : vector<1x256xf32>
      %c0_41 = arith.constant 0 : index
      %c4 = arith.constant 4 : index
      %c0_42 = arith.constant 0 : index
      %40 = vector.load %arg6[%c0_41, %c4, %c0_42] : memref<1x8x256xf32, #tpu.memory_space<vmem>>, vector<1x1x256xf32>
      %41 = vector.shape_cast %40 : vector<1x1x256xf32> to vector<1x256xf32>
      %42 = arith.addf %36, %41 : vector<1x256xf32>
      %c0_43 = arith.constant 0 : index
      %c4_44 = arith.constant 4 : index
      %c0_45 = arith.constant 0 : index
      %43 = vector.load %arg7[%c0_43, %c4_44, %c0_45] : memref<1x8x256xf32, #tpu.memory_space<vmem>>, vector<1x1x256xf32>
      %44 = vector.shape_cast %43 : vector<1x1x256xf32> to vector<1x256xf32>
      %45 = arith.maximumf %39, %44 : vector<1x256xf32>
      %c0_46 = arith.constant 0 : index
      %c5 = arith.constant 5 : index
      %c0_47 = arith.constant 0 : index
      %46 = vector.load %arg6[%c0_46, %c5, %c0_47] : memref<1x8x256xf32, #tpu.memory_space<vmem>>, vector<1x1x256xf32>
      %47 = vector.shape_cast %46 : vector<1x1x256xf32> to vector<1x256xf32>
      %48 = arith.addf %42, %47 : vector<1x256xf32>
      %c0_48 = arith.constant 0 : index
      %c5_49 = arith.constant 5 : index
      %c0_50 = arith.constant 0 : index
      %49 = vector.load %arg7[%c0_48, %c5_49, %c0_50] : memref<1x8x256xf32, #tpu.memory_space<vmem>>, vector<1x1x256xf32>
      %50 = vector.shape_cast %49 : vector<1x1x256xf32> to vector<1x256xf32>
      %51 = arith.maximumf %45, %50 : vector<1x256xf32>
      %c0_51 = arith.constant 0 : index
      %c6 = arith.constant 6 : index
      %c0_52 = arith.constant 0 : index
      %52 = vector.load %arg6[%c0_51, %c6, %c0_52] : memref<1x8x256xf32, #tpu.memory_space<vmem>>, vector<1x1x256xf32>
      %53 = vector.shape_cast %52 : vector<1x1x256xf32> to vector<1x256xf32>
      %54 = arith.addf %48, %53 : vector<1x256xf32>
      %c0_53 = arith.constant 0 : index
      %c6_54 = arith.constant 6 : index
      %c0_55 = arith.constant 0 : index
      %55 = vector.load %arg7[%c0_53, %c6_54, %c0_55] : memref<1x8x256xf32, #tpu.memory_space<vmem>>, vector<1x1x256xf32>
      %56 = vector.shape_cast %55 : vector<1x1x256xf32> to vector<1x256xf32>
      %57 = arith.maximumf %51, %56 : vector<1x256xf32>
      %c0_56 = arith.constant 0 : index
      %c7 = arith.constant 7 : index
      %c0_57 = arith.constant 0 : index
      %58 = vector.load %arg6[%c0_56, %c7, %c0_57] : memref<1x8x256xf32, #tpu.memory_space<vmem>>, vector<1x1x256xf32>
      %59 = vector.shape_cast %58 : vector<1x1x256xf32> to vector<1x256xf32>
      %60 = arith.addf %54, %59 : vector<1x256xf32>
      %c0_58 = arith.constant 0 : index
      %c7_59 = arith.constant 7 : index
      %c0_60 = arith.constant 0 : index
      %61 = vector.load %arg7[%c0_58, %c7_59, %c0_60] : memref<1x8x256xf32, #tpu.memory_space<vmem>>, vector<1x1x256xf32>
      %62 = vector.shape_cast %61 : vector<1x1x256xf32> to vector<1x256xf32>
      %63 = arith.maximumf %57, %62 : vector<1x256xf32>
      %c0_61 = arith.constant 0 : index
      %c0_62 = arith.constant 0 : index
      %c0_63 = arith.constant 0 : index
      %64 = vector.load %arg6[%c0_61, %c0_62, %c0_63] : memref<1x8x256xf32, #tpu.memory_space<vmem>>, vector<1x1x256xf32>
      %65 = vector.shape_cast %64 : vector<1x1x256xf32> to vector<1x256xf32>
      %66 = vector.shape_cast %60 : vector<1x256xf32> to vector<1x1x256xf32>
      tpu.vector_store %arg6[%c0_61, %c0_62, %c0_63], %66 {strides = array<i32>} : memref<1x8x256xf32, #tpu.memory_space<vmem>>, vector<1x1x256xf32>,
      %c0_64 = arith.constant 0 : index
      %c0_65 = arith.constant 0 : index
      %c0_66 = arith.constant 0 : index
      %67 = vector.load %arg7[%c0_64, %c0_65, %c0_66] : memref<1x8x256xf32, #tpu.memory_space<vmem>>, vector<1x1x256xf32>
      %68 = vector.shape_cast %67 : vector<1x1x256xf32> to vector<1x256xf32>
      %69 = vector.shape_cast %63 : vector<1x256xf32> to vector<1x1x256xf32>
      tpu.vector_store %arg7[%c0_64, %c0_65, %c0_66], %69 {strides = array<i32>} : memref<1x8x256xf32, #tpu.memory_space<vmem>>, vector<1x1x256xf32>,
      %c0_67 = arith.constant 0 : index
      %c0_68 = arith.constant 0 : index
      %c0_69 = arith.constant 0 : index
      %70 = vector.load %arg6[%c0_67, %c0_68, %c0_69] : memref<1x8x256xf32, #tpu.memory_space<vmem>>, vector<1x1x16xf32>
      %71 = vector.shape_cast %70 : vector<1x1x16xf32> to vector<1x16xf32>
      %c0_70 = arith.constant 0 : index
      %c3_71 = arith.constant 3 : index
      %c3_72 = arith.constant 3 : index
      %72 = vector.load %arg8[%c0_70, %c3_71, %c3_72] : memref<1x22x22xf32, #tpu.memory_space<vmem>>, vector<1x1x16xf32>
      %73 = vector.shape_cast %72 : vector<1x1x16xf32> to vector<1x16xf32>
      %74 = vector.shape_cast %71 : vector<1x16xf32> to vector<1x1x16xf32>
      tpu.vector_store %arg8[%c0_70, %c3_71, %c3_72], %74 {strides = array<i32>} : memref<1x22x22xf32, #tpu.memory_space<vmem>>, vector<1x1x16xf32>,
      %c0_73 = arith.constant 0 : index
      %c0_74 = arith.constant 0 : index
      %c0_75 = arith.constant 0 : index
      %75 = vector.load %arg7[%c0_73, %c0_74, %c0_75] : memref<1x8x256xf32, #tpu.memory_space<vmem>>, vector<1x1x16xf32>
      %76 = vector.shape_cast %75 : vector<1x1x16xf32> to vector<1x16xf32>
      %c0_76 = arith.constant 0 : index
      %c3_77 = arith.constant 3 : index
      %c3_78 = arith.constant 3 : index
      %77 = vector.load %arg9[%c0_76, %c3_77, %c3_78] : memref<1x22x22xf32, #tpu.memory_space<vmem>>, vector<1x1x16xf32>
      %78 = vector.shape_cast %77 : vector<1x1x16xf32> to vector<1x16xf32>
      %79 = vector.shape_cast %76 : vector<1x16xf32> to vector<1x1x16xf32>
      tpu.vector_store %arg9[%c0_76, %c3_77, %c3_78], %79 {strides = array<i32>} : memref<1x22x22xf32, #tpu.memory_space<vmem>>, vector<1x1x16xf32>,
      %c0_79 = arith.constant 0 : index
      %c0_80 = arith.constant 0 : index
      %c16 = arith.constant 16 : index
      %80 = vector.load %arg6[%c0_79, %c0_80, %c16] : memref<1x8x256xf32, #tpu.memory_space<vmem>>, vector<1x1x16xf32>
      %81 = vector.shape_cast %80 : vector<1x1x16xf32> to vector<1x16xf32>
      %c0_81 = arith.constant 0 : index
      %c4_82 = arith.constant 4 : index
      %c3_83 = arith.constant 3 : index
      %82 = vector.load %arg8[%c0_81, %c4_82, %c3_83] : memref<1x22x22xf32, #tpu.memory_space<vmem>>, vector<1x1x16xf32>
      %83 = vector.shape_cast %82 : vector<1x1x16xf32> to vector<1x16xf32>
      %84 = vector.shape_cast %81 : vector<1x16xf32> to vector<1x1x16xf32>
      tpu.vector_store %arg8[%c0_81, %c4_82, %c3_83], %84 {strides = array<i32>} : memref<1x22x22xf32, #tpu.memory_space<vmem>>, vector<1x1x16xf32>,
      %c0_84 = arith.constant 0 : index
      %c0_85 = arith.constant 0 : index
      %c16_86 = arith.constant 16 : index
      %85 = vector.load %arg7[%c0_84, %c0_85, %c16_86] : memref<1x8x256xf32, #tpu.memory_space<vmem>>, vector<1x1x16xf32>
      %86 = vector.shape_cast %85 : vector<1x1x16xf32> to vector<1x16xf32>
      %c0_87 = arith.constant 0 : index
      %c4_88 = arith.constant 4 : index
      %c3_89 = arith.constant 3 : index
      %87 = vector.load %arg9[%c0_87, %c4_88, %c3_89] : memref<1x22x22xf32, #tpu.memory_space<vmem>>, vector<1x1x16xf32>
      %88 = vector.shape_cast %87 : vector<1x1x16xf32> to vector<1x16xf32>
      %89 = vector.shape_cast %86 : vector<1x16xf32> to vector<1x1x16xf32>
      tpu.vector_store %arg9[%c0_87, %c4_88, %c3_89], %89 {strides = array<i32>} : memref<1x22x22xf32, #tpu.memory_space<vmem>>, vector<1x1x16xf32>,
      %c0_90 = arith.constant 0 : index
      %c0_91 = arith.constant 0 : index
      %c32 = arith.constant 32 : index
      %90 = vector.load %arg6[%c0_90, %c0_91, %c32] : memref<1x8x256xf32, #tpu.memory_space<vmem>>, vector<1x1x16xf32>
      %91 = vector.shape_cast %90 : vector<1x1x16xf32> to vector<1x16xf32>
      %c0_92 = arith.constant 0 : index
      %c5_93 = arith.constant 5 : index
      %c3_94 = arith.constant 3 : index
      %92 = vector.load %arg8[%c0_92, %c5_93, %c3_94] : memref<1x22x22xf32, #tpu.memory_space<vmem>>, vector<1x1x16xf32>
      %93 = vector.shape_cast %92 : vector<1x1x16xf32> to vector<1x16xf32>
      %94 = vector.shape_cast %91 : vector<1x16xf32> to vector<1x1x16xf32>
      tpu.vector_store %arg8[%c0_92, %c5_93, %c3_94], %94 {strides = array<i32>} : memref<1x22x22xf32, #tpu.memory_space<vmem>>, vector<1x1x16xf32>,
      %c0_95 = arith.constant 0 : index
      %c0_96 = arith.constant 0 : index
      %c32_97 = arith.constant 32 : index
      %95 = vector.load %arg7[%c0_95, %c0_96, %c32_97] : memref<1x8x256xf32, #tpu.memory_space<vmem>>, vector<1x1x16xf32>
      %96 = vector.shape_cast %95 : vector<1x1x16xf32> to vector<1x16xf32>
      %c0_98 = arith.constant 0 : index
      %c5_99 = arith.constant 5 : index
      %c3_100 = arith.constant 3 : index
      %97 = vector.load %arg9[%c0_98, %c5_99, %c3_100] : memref<1x22x22xf32, #tpu.memory_space<vmem>>, vector<1x1x16xf32>
      %98 = vector.shape_cast %97 : vector<1x1x16xf32> to vector<1x16xf32>
      %99 = vector.shape_cast %96 : vector<1x16xf32> to vector<1x1x16xf32>
      tpu.vector_store %arg9[%c0_98, %c5_99, %c3_100], %99 {strides = array<i32>} : memref<1x22x22xf32, #tpu.memory_space<vmem>>, vector<1x1x16xf32>,
      %c0_101 = arith.constant 0 : index
      %c0_102 = arith.constant 0 : index
      %c48 = arith.constant 48 : index
      %100 = vector.load %arg6[%c0_101, %c0_102, %c48] : memref<1x8x256xf32, #tpu.memory_space<vmem>>, vector<1x1x16xf32>
      %101 = vector.shape_cast %100 : vector<1x1x16xf32> to vector<1x16xf32>
      %c0_103 = arith.constant 0 : index
      %c6_104 = arith.constant 6 : index
      %c3_105 = arith.constant 3 : index
      %102 = vector.load %arg8[%c0_103, %c6_104, %c3_105] : memref<1x22x22xf32, #tpu.memory_space<vmem>>, vector<1x1x16xf32>
      %103 = vector.shape_cast %102 : vector<1x1x16xf32> to vector<1x16xf32>
      %104 = vector.shape_cast %101 : vector<1x16xf32> to vector<1x1x16xf32>
      tpu.vector_store %arg8[%c0_103, %c6_104, %c3_105], %104 {strides = array<i32>} : memref<1x22x22xf32, #tpu.memory_space<vmem>>, vector<1x1x16xf32>,
      %c0_106 = arith.constant 0 : index
      %c0_107 = arith.constant 0 : index
      %c48_108 = arith.constant 48 : index
      %105 = vector.load %arg7[%c0_106, %c0_107, %c48_108] : memref<1x8x256xf32, #tpu.memory_space<vmem>>, vector<1x1x16xf32>
      %106 = vector.shape_cast %105 : vector<1x1x16xf32> to vector<1x16xf32>
      %c0_109 = arith.constant 0 : index
      %c6_110 = arith.constant 6 : index
      %c3_111 = arith.constant 3 : index
      %107 = vector.load %arg9[%c0_109, %c6_110, %c3_111] : memref<1x22x22xf32, #tpu.memory_space<vmem>>, vector<1x1x16xf32>
      %108 = vector.shape_cast %107 : vector<1x1x16xf32> to vector<1x16xf32>
      %109 = vector.shape_cast %106 : vector<1x16xf32> to vector<1x1x16xf32>
      tpu.vector_store %arg9[%c0_109, %c6_110, %c3_111], %109 {strides = array<i32>} : memref<1x22x22xf32, #tpu.memory_space<vmem>>, vector<1x1x16xf32>,
      %c0_112 = arith.constant 0 : index
      %c0_113 = arith.constant 0 : index
      %c64 = arith.constant 64 : index
      %110 = vector.load %arg6[%c0_112, %c0_113, %c64] : memref<1x8x256xf32, #tpu.memory_space<vmem>>, vector<1x1x16xf32>
      %111 = vector.shape_cast %110 : vector<1x1x16xf32> to vector<1x16xf32>
      %c0_114 = arith.constant 0 : index
      %c7_115 = arith.constant 7 : index
      %c3_116 = arith.constant 3 : index
      %112 = vector.load %arg8[%c0_114, %c7_115, %c3_116] : memref<1x22x22xf32, #tpu.memory_space<vmem>>, vector<1x1x16xf32>
      %113 = vector.shape_cast %112 : vector<1x1x16xf32> to vector<1x16xf32>
      %114 = vector.shape_cast %111 : vector<1x16xf32> to vector<1x1x16xf32>
      tpu.vector_store %arg8[%c0_114, %c7_115, %c3_116], %114 {strides = array<i32>} : memref<1x22x22xf32, #tpu.memory_space<vmem>>, vector<1x1x16xf32>,
      %c0_117 = arith.constant 0 : index
      %c0_118 = arith.constant 0 : index
      %c64_119 = arith.constant 64 : index
      %115 = vector.load %arg7[%c0_117, %c0_118, %c64_119] : memref<1x8x256xf32, #tpu.memory_space<vmem>>, vector<1x1x16xf32>
      %116 = vector.shape_cast %115 : vector<1x1x16xf32> to vector<1x16xf32>
      %c0_120 = arith.constant 0 : index
      %c7_121 = arith.constant 7 : index
      %c3_122 = arith.constant 3 : index
      %117 = vector.load %arg9[%c0_120, %c7_121, %c3_122] : memref<1x22x22xf32, #tpu.memory_space<vmem>>, vector<1x1x16xf32>
      %118 = vector.shape_cast %117 : vector<1x1x16xf32> to vector<1x16xf32>
      %119 = vector.shape_cast %116 : vector<1x16xf32> to vector<1x1x16xf32>
      tpu.vector_store %arg9[%c0_120, %c7_121, %c3_122], %119 {strides = array<i32>} : memref<1x22x22xf32, #tpu.memory_space<vmem>>, vector<1x1x16xf32>,
      %c0_123 = arith.constant 0 : index
      %c0_124 = arith.constant 0 : index
      %c80 = arith.constant 80 : index
      %120 = vector.load %arg6[%c0_123, %c0_124, %c80] : memref<1x8x256xf32, #tpu.memory_space<vmem>>, vector<1x1x16xf32>
      %121 = vector.shape_cast %120 : vector<1x1x16xf32> to vector<1x16xf32>
      %c0_125 = arith.constant 0 : index
      %c8 = arith.constant 8 : index
      %c3_126 = arith.constant 3 : index
      %122 = vector.load %arg8[%c0_125, %c8, %c3_126] : memref<1x22x22xf32, #tpu.memory_space<vmem>>, vector<1x1x16xf32>
      %123 = vector.shape_cast %122 : vector<1x1x16xf32> to vector<1x16xf32>
      %124 = vector.shape_cast %121 : vector<1x16xf32> to vector<1x1x16xf32>
      tpu.vector_store %arg8[%c0_125, %c8, %c3_126], %124 {strides = array<i32>} : memref<1x22x22xf32, #tpu.memory_space<vmem>>, vector<1x1x16xf32>,
      %c0_127 = arith.constant 0 : index
      %c0_128 = arith.constant 0 : index
      %c80_129 = arith.constant 80 : index
      %125 = vector.load %arg7[%c0_127, %c0_128, %c80_129] : memref<1x8x256xf32, #tpu.memory_space<vmem>>, vector<1x1x16xf32>
      %126 = vector.shape_cast %125 : vector<1x1x16xf32> to vector<1x16xf32>
      %c0_130 = arith.constant 0 : index
      %c8_131 = arith.constant 8 : index
      %c3_132 = arith.constant 3 : index
      %127 = vector.load %arg9[%c0_130, %c8_131, %c3_132] : memref<1x22x22xf32, #tpu.memory_space<vmem>>, vector<1x1x16xf32>
      %128 = vector.shape_cast %127 : vector<1x1x16xf32> to vector<1x16xf32>
      %129 = vector.shape_cast %126 : vector<1x16xf32> to vector<1x1x16xf32>
      tpu.vector_store %arg9[%c0_130, %c8_131, %c3_132], %129 {strides = array<i32>} : memref<1x22x22xf32, #tpu.memory_space<vmem>>, vector<1x1x16xf32>,
      %c0_133 = arith.constant 0 : index
      %c0_134 = arith.constant 0 : index
      %c96 = arith.constant 96 : index
      %130 = vector.load %arg6[%c0_133, %c0_134, %c96] : memref<1x8x256xf32, #tpu.memory_space<vmem>>, vector<1x1x16xf32>
      %131 = vector.shape_cast %130 : vector<1x1x16xf32> to vector<1x16xf32>
      %c0_135 = arith.constant 0 : index
      %c9 = arith.constant 9 : index
      %c3_136 = arith.constant 3 : index
      %132 = vector.load %arg8[%c0_135, %c9, %c3_136] : memref<1x22x22xf32, #tpu.memory_space<vmem>>, vector<1x1x16xf32>
      %133 = vector.shape_cast %132 : vector<1x1x16xf32> to vector<1x16xf32>
      %134 = vector.shape_cast %131 : vector<1x16xf32> to vector<1x1x16xf32>
      tpu.vector_store %arg8[%c0_135, %c9, %c3_136], %134 {strides = array<i32>} : memref<1x22x22xf32, #tpu.memory_space<vmem>>, vector<1x1x16xf32>,
      %c0_137 = arith.constant 0 : index
      %c0_138 = arith.constant 0 : index
      %c96_139 = arith.constant 96 : index
      %135 = vector.load %arg7[%c0_137, %c0_138, %c96_139] : memref<1x8x256xf32, #tpu.memory_space<vmem>>, vector<1x1x16xf32>
      %136 = vector.shape_cast %135 : vector<1x1x16xf32> to vector<1x16xf32>
      %c0_140 = arith.constant 0 : index
      %c9_141 = arith.constant 9 : index
      %c3_142 = arith.constant 3 : index
      %137 = vector.load %arg9[%c0_140, %c9_141, %c3_142] : memref<1x22x22xf32, #tpu.memory_space<vmem>>, vector<1x1x16xf32>
      %138 = vector.shape_cast %137 : vector<1x1x16xf32> to vector<1x16xf32>
      %139 = vector.shape_cast %136 : vector<1x16xf32> to vector<1x1x16xf32>
      tpu.vector_store %arg9[%c0_140, %c9_141, %c3_142], %139 {strides = array<i32>} : memref<1x22x22xf32, #tpu.memory_space<vmem>>, vector<1x1x16xf32>,
      %c0_143 = arith.constant 0 : index
      %c0_144 = arith.constant 0 : index
      %c112 = arith.constant 112 : index
      %140 = vector.load %arg6[%c0_143, %c0_144, %c112] : memref<1x8x256xf32, #tpu.memory_space<vmem>>, vector<1x1x16xf32>
      %141 = vector.shape_cast %140 : vector<1x1x16xf32> to vector<1x16xf32>
      %c0_145 = arith.constant 0 : index
      %c10 = arith.constant 10 : index
      %c3_146 = arith.constant 3 : index
      %142 = vector.load %arg8[%c0_145, %c10, %c3_146] : memref<1x22x22xf32, #tpu.memory_space<vmem>>, vector<1x1x16xf32>
      %143 = vector.shape_cast %142 : vector<1x1x16xf32> to vector<1x16xf32>
      %144 = vector.shape_cast %141 : vector<1x16xf32> to vector<1x1x16xf32>
      tpu.vector_store %arg8[%c0_145, %c10, %c3_146], %144 {strides = array<i32>} : memref<1x22x22xf32, #tpu.memory_space<vmem>>, vector<1x1x16xf32>,
      %c0_147 = arith.constant 0 : index
      %c0_148 = arith.constant 0 : index
      %c112_149 = arith.constant 112 : index
      %145 = vector.load %arg7[%c0_147, %c0_148, %c112_149] : memref<1x8x256xf32, #tpu.memory_space<vmem>>, vector<1x1x16xf32>
      %146 = vector.shape_cast %145 : vector<1x1x16xf32> to vector<1x16xf32>
      %c0_150 = arith.constant 0 : index
      %c10_151 = arith.constant 10 : index
      %c3_152 = arith.constant 3 : index
      %147 = vector.load %arg9[%c0_150, %c10_151, %c3_152] : memref<1x22x22xf32, #tpu.memory_space<vmem>>, vector<1x1x16xf32>
      %148 = vector.shape_cast %147 : vector<1x1x16xf32> to vector<1x16xf32>
      %149 = vector.shape_cast %146 : vector<1x16xf32> to vector<1x1x16xf32>
      tpu.vector_store %arg9[%c0_150, %c10_151, %c3_152], %149 {strides = array<i32>} : memref<1x22x22xf32, #tpu.memory_space<vmem>>, vector<1x1x16xf32>,
      %c0_153 = arith.constant 0 : index
      %c0_154 = arith.constant 0 : index
      %c128 = arith.constant 128 : index
      %150 = vector.load %arg6[%c0_153, %c0_154, %c128] : memref<1x8x256xf32, #tpu.memory_space<vmem>>, vector<1x1x16xf32>
      %151 = vector.shape_cast %150 : vector<1x1x16xf32> to vector<1x16xf32>
      %c0_155 = arith.constant 0 : index
      %c11 = arith.constant 11 : index
      %c3_156 = arith.constant 3 : index
      %152 = vector.load %arg8[%c0_155, %c11, %c3_156] : memref<1x22x22xf32, #tpu.memory_space<vmem>>, vector<1x1x16xf32>
      %153 = vector.shape_cast %152 : vector<1x1x16xf32> to vector<1x16xf32>
      %154 = vector.shape_cast %151 : vector<1x16xf32> to vector<1x1x16xf32>
      tpu.vector_store %arg8[%c0_155, %c11, %c3_156], %154 {strides = array<i32>} : memref<1x22x22xf32, #tpu.memory_space<vmem>>, vector<1x1x16xf32>,
      %c0_157 = arith.constant 0 : index
      %c0_158 = arith.constant 0 : index
      %c128_159 = arith.constant 128 : index
      %155 = vector.load %arg7[%c0_157, %c0_158, %c128_159] : memref<1x8x256xf32, #tpu.memory_space<vmem>>, vector<1x1x16xf32>
      %156 = vector.shape_cast %155 : vector<1x1x16xf32> to vector<1x16xf32>
      %c0_160 = arith.constant 0 : index
      %c11_161 = arith.constant 11 : index
      %c3_162 = arith.constant 3 : index
      %157 = vector.load %arg9[%c0_160, %c11_161, %c3_162] : memref<1x22x22xf32, #tpu.memory_space<vmem>>, vector<1x1x16xf32>
      %158 = vector.shape_cast %157 : vector<1x1x16xf32> to vector<1x16xf32>
      %159 = vector.shape_cast %156 : vector<1x16xf32> to vector<1x1x16xf32>
      tpu.vector_store %arg9[%c0_160, %c11_161, %c3_162], %159 {strides = array<i32>} : memref<1x22x22xf32, #tpu.memory_space<vmem>>, vector<1x1x16xf32>,
      %c0_163 = arith.constant 0 : index
      %c0_164 = arith.constant 0 : index
      %c144 = arith.constant 144 : index
      %160 = vector.load %arg6[%c0_163, %c0_164, %c144] : memref<1x8x256xf32, #tpu.memory_space<vmem>>, vector<1x1x16xf32>
      %161 = vector.shape_cast %160 : vector<1x1x16xf32> to vector<1x16xf32>
      %c0_165 = arith.constant 0 : index
      %c12 = arith.constant 12 : index
      %c3_166 = arith.constant 3 : index
      %162 = vector.load %arg8[%c0_165, %c12, %c3_166] : memref<1x22x22xf32, #tpu.memory_space<vmem>>, vector<1x1x16xf32>
      %163 = vector.shape_cast %162 : vector<1x1x16xf32> to vector<1x16xf32>
      %164 = vector.shape_cast %161 : vector<1x16xf32> to vector<1x1x16xf32>
      tpu.vector_store %arg8[%c0_165, %c12, %c3_166], %164 {strides = array<i32>} : memref<1x22x22xf32, #tpu.memory_space<vmem>>, vector<1x1x16xf32>,
      %c0_167 = arith.constant 0 : index
      %c0_168 = arith.constant 0 : index
      %c144_169 = arith.constant 144 : index
      %165 = vector.load %arg7[%c0_167, %c0_168, %c144_169] : memref<1x8x256xf32, #tpu.memory_space<vmem>>, vector<1x1x16xf32>
      %166 = vector.shape_cast %165 : vector<1x1x16xf32> to vector<1x16xf32>
      %c0_170 = arith.constant 0 : index
      %c12_171 = arith.constant 12 : index
      %c3_172 = arith.constant 3 : index
      %167 = vector.load %arg9[%c0_170, %c12_171, %c3_172] : memref<1x22x22xf32, #tpu.memory_space<vmem>>, vector<1x1x16xf32>
      %168 = vector.shape_cast %167 : vector<1x1x16xf32> to vector<1x16xf32>
      %169 = vector.shape_cast %166 : vector<1x16xf32> to vector<1x1x16xf32>
      tpu.vector_store %arg9[%c0_170, %c12_171, %c3_172], %169 {strides = array<i32>} : memref<1x22x22xf32, #tpu.memory_space<vmem>>, vector<1x1x16xf32>,
      %c0_173 = arith.constant 0 : index
      %c0_174 = arith.constant 0 : index
      %c160 = arith.constant 160 : index
      %170 = vector.load %arg6[%c0_173, %c0_174, %c160] : memref<1x8x256xf32, #tpu.memory_space<vmem>>, vector<1x1x16xf32>
      %171 = vector.shape_cast %170 : vector<1x1x16xf32> to vector<1x16xf32>
      %c0_175 = arith.constant 0 : index
      %c13 = arith.constant 13 : index
      %c3_176 = arith.constant 3 : index
      %172 = vector.load %arg8[%c0_175, %c13, %c3_176] : memref<1x22x22xf32, #tpu.memory_space<vmem>>, vector<1x1x16xf32>
      %173 = vector.shape_cast %172 : vector<1x1x16xf32> to vector<1x16xf32>
      %174 = vector.shape_cast %171 : vector<1x16xf32> to vector<1x1x16xf32>
      tpu.vector_store %arg8[%c0_175, %c13, %c3_176], %174 {strides = array<i32>} : memref<1x22x22xf32, #tpu.memory_space<vmem>>, vector<1x1x16xf32>,
      %c0_177 = arith.constant 0 : index
      %c0_178 = arith.constant 0 : index
      %c160_179 = arith.constant 160 : index
      %175 = vector.load %arg7[%c0_177, %c0_178, %c160_179] : memref<1x8x256xf32, #tpu.memory_space<vmem>>, vector<1x1x16xf32>
      %176 = vector.shape_cast %175 : vector<1x1x16xf32> to vector<1x16xf32>
      %c0_180 = arith.constant 0 : index
      %c13_181 = arith.constant 13 : index
      %c3_182 = arith.constant 3 : index
      %177 = vector.load %arg9[%c0_180, %c13_181, %c3_182] : memref<1x22x22xf32, #tpu.memory_space<vmem>>, vector<1x1x16xf32>
      %178 = vector.shape_cast %177 : vector<1x1x16xf32> to vector<1x16xf32>
      %179 = vector.shape_cast %176 : vector<1x16xf32> to vector<1x1x16xf32>
      tpu.vector_store %arg9[%c0_180, %c13_181, %c3_182], %179 {strides = array<i32>} : memref<1x22x22xf32, #tpu.memory_space<vmem>>, vector<1x1x16xf32>,
      %c0_183 = arith.constant 0 : index
      %c0_184 = arith.constant 0 : index
      %c176 = arith.constant 176 : index
      %180 = vector.load %arg6[%c0_183, %c0_184, %c176] : memref<1x8x256xf32, #tpu.memory_space<vmem>>, vector<1x1x16xf32>
      %181 = vector.shape_cast %180 : vector<1x1x16xf32> to vector<1x16xf32>
      %c0_185 = arith.constant 0 : index
      %c14 = arith.constant 14 : index
      %c3_186 = arith.constant 3 : index
      %182 = vector.load %arg8[%c0_185, %c14, %c3_186] : memref<1x22x22xf32, #tpu.memory_space<vmem>>, vector<1x1x16xf32>
      %183 = vector.shape_cast %182 : vector<1x1x16xf32> to vector<1x16xf32>
      %184 = vector.shape_cast %181 : vector<1x16xf32> to vector<1x1x16xf32>
      tpu.vector_store %arg8[%c0_185, %c14, %c3_186], %184 {strides = array<i32>} : memref<1x22x22xf32, #tpu.memory_space<vmem>>, vector<1x1x16xf32>,
      %c0_187 = arith.constant 0 : index
      %c0_188 = arith.constant 0 : index
      %c176_189 = arith.constant 176 : index
      %185 = vector.load %arg7[%c0_187, %c0_188, %c176_189] : memref<1x8x256xf32, #tpu.memory_space<vmem>>, vector<1x1x16xf32>
      %186 = vector.shape_cast %185 : vector<1x1x16xf32> to vector<1x16xf32>
      %c0_190 = arith.constant 0 : index
      %c14_191 = arith.constant 14 : index
      %c3_192 = arith.constant 3 : index
      %187 = vector.load %arg9[%c0_190, %c14_191, %c3_192] : memref<1x22x22xf32, #tpu.memory_space<vmem>>, vector<1x1x16xf32>
      %188 = vector.shape_cast %187 : vector<1x1x16xf32> to vector<1x16xf32>
      %189 = vector.shape_cast %186 : vector<1x16xf32> to vector<1x1x16xf32>
      tpu.vector_store %arg9[%c0_190, %c14_191, %c3_192], %189 {strides = array<i32>} : memref<1x22x22xf32, #tpu.memory_space<vmem>>, vector<1x1x16xf32>,
      %c0_193 = arith.constant 0 : index
      %c0_194 = arith.constant 0 : index
      %c192 = arith.constant 192 : index
      %190 = vector.load %arg6[%c0_193, %c0_194, %c192] : memref<1x8x256xf32, #tpu.memory_space<vmem>>, vector<1x1x16xf32>
      %191 = vector.shape_cast %190 : vector<1x1x16xf32> to vector<1x16xf32>
      %c0_195 = arith.constant 0 : index
      %c15 = arith.constant 15 : index
      %c3_196 = arith.constant 3 : index
      %192 = vector.load %arg8[%c0_195, %c15, %c3_196] : memref<1x22x22xf32, #tpu.memory_space<vmem>>, vector<1x1x16xf32>
      %193 = vector.shape_cast %192 : vector<1x1x16xf32> to vector<1x16xf32>
      %194 = vector.shape_cast %191 : vector<1x16xf32> to vector<1x1x16xf32>
      tpu.vector_store %arg8[%c0_195, %c15, %c3_196], %194 {strides = array<i32>} : memref<1x22x22xf32, #tpu.memory_space<vmem>>, vector<1x1x16xf32>,
      %c0_197 = arith.constant 0 : index
      %c0_198 = arith.constant 0 : index
      %c192_199 = arith.constant 192 : index
      %195 = vector.load %arg7[%c0_197, %c0_198, %c192_199] : memref<1x8x256xf32, #tpu.memory_space<vmem>>, vector<1x1x16xf32>
      %196 = vector.shape_cast %195 : vector<1x1x16xf32> to vector<1x16xf32>
      %c0_200 = arith.constant 0 : index
      %c15_201 = arith.constant 15 : index
      %c3_202 = arith.constant 3 : index
      %197 = vector.load %arg9[%c0_200, %c15_201, %c3_202] : memref<1x22x22xf32, #tpu.memory_space<vmem>>, vector<1x1x16xf32>
      %198 = vector.shape_cast %197 : vector<1x1x16xf32> to vector<1x16xf32>
      %199 = vector.shape_cast %196 : vector<1x16xf32> to vector<1x1x16xf32>
      tpu.vector_store %arg9[%c0_200, %c15_201, %c3_202], %199 {strides = array<i32>} : memref<1x22x22xf32, #tpu.memory_space<vmem>>, vector<1x1x16xf32>,
      %c0_203 = arith.constant 0 : index
      %c0_204 = arith.constant 0 : index
      %c208 = arith.constant 208 : index
      %200 = vector.load %arg6[%c0_203, %c0_204, %c208] : memref<1x8x256xf32, #tpu.memory_space<vmem>>, vector<1x1x16xf32>
      %201 = vector.shape_cast %200 : vector<1x1x16xf32> to vector<1x16xf32>
      %c0_205 = arith.constant 0 : index
      %c16_206 = arith.constant 16 : index
      %c3_207 = arith.constant 3 : index
      %202 = vector.load %arg8[%c0_205, %c16_206, %c3_207] : memref<1x22x22xf32, #tpu.memory_space<vmem>>, vector<1x1x16xf32>
      %203 = vector.shape_cast %202 : vector<1x1x16xf32> to vector<1x16xf32>
      %204 = vector.shape_cast %201 : vector<1x16xf32> to vector<1x1x16xf32>
      tpu.vector_store %arg8[%c0_205, %c16_206, %c3_207], %204 {strides = array<i32>} : memref<1x22x22xf32, #tpu.memory_space<vmem>>, vector<1x1x16xf32>,
      %c0_208 = arith.constant 0 : index
      %c0_209 = arith.constant 0 : index
      %c208_210 = arith.constant 208 : index
      %205 = vector.load %arg7[%c0_208, %c0_209, %c208_210] : memref<1x8x256xf32, #tpu.memory_space<vmem>>, vector<1x1x16xf32>
      %206 = vector.shape_cast %205 : vector<1x1x16xf32> to vector<1x16xf32>
      %c0_211 = arith.constant 0 : index
      %c16_212 = arith.constant 16 : index
      %c3_213 = arith.constant 3 : index
      %207 = vector.load %arg9[%c0_211, %c16_212, %c3_213] : memref<1x22x22xf32, #tpu.memory_space<vmem>>, vector<1x1x16xf32>
      %208 = vector.shape_cast %207 : vector<1x1x16xf32> to vector<1x16xf32>
      %209 = vector.shape_cast %206 : vector<1x16xf32> to vector<1x1x16xf32>
      tpu.vector_store %arg9[%c0_211, %c16_212, %c3_213], %209 {strides = array<i32>} : memref<1x22x22xf32, #tpu.memory_space<vmem>>, vector<1x1x16xf32>,
      %c0_214 = arith.constant 0 : index
      %c0_215 = arith.constant 0 : index
      %c224 = arith.constant 224 : index
      %210 = vector.load %arg6[%c0_214, %c0_215, %c224] : memref<1x8x256xf32, #tpu.memory_space<vmem>>, vector<1x1x16xf32>
      %211 = vector.shape_cast %210 : vector<1x1x16xf32> to vector<1x16xf32>
      %c0_216 = arith.constant 0 : index
      %c17 = arith.constant 17 : index
      %c3_217 = arith.constant 3 : index
      %212 = vector.load %arg8[%c0_216, %c17, %c3_217] : memref<1x22x22xf32, #tpu.memory_space<vmem>>, vector<1x1x16xf32>
      %213 = vector.shape_cast %212 : vector<1x1x16xf32> to vector<1x16xf32>
      %214 = vector.shape_cast %211 : vector<1x16xf32> to vector<1x1x16xf32>
      tpu.vector_store %arg8[%c0_216, %c17, %c3_217], %214 {strides = array<i32>} : memref<1x22x22xf32, #tpu.memory_space<vmem>>, vector<1x1x16xf32>,
      %c0_218 = arith.constant 0 : index
      %c0_219 = arith.constant 0 : index
      %c224_220 = arith.constant 224 : index
      %215 = vector.load %arg7[%c0_218, %c0_219, %c224_220] : memref<1x8x256xf32, #tpu.memory_space<vmem>>, vector<1x1x16xf32>
      %216 = vector.shape_cast %215 : vector<1x1x16xf32> to vector<1x16xf32>
      %c0_221 = arith.constant 0 : index
      %c17_222 = arith.constant 17 : index
      %c3_223 = arith.constant 3 : index
      %217 = vector.load %arg9[%c0_221, %c17_222, %c3_223] : memref<1x22x22xf32, #tpu.memory_space<vmem>>, vector<1x1x16xf32>
      %218 = vector.shape_cast %217 : vector<1x1x16xf32> to vector<1x16xf32>
      %219 = vector.shape_cast %216 : vector<1x16xf32> to vector<1x1x16xf32>
      tpu.vector_store %arg9[%c0_221, %c17_222, %c3_223], %219 {strides = array<i32>} : memref<1x22x22xf32, #tpu.memory_space<vmem>>, vector<1x1x16xf32>,
      %c0_224 = arith.constant 0 : index
      %c0_225 = arith.constant 0 : index
      %c240 = arith.constant 240 : index
      %220 = vector.load %arg6[%c0_224, %c0_225, %c240] : memref<1x8x256xf32, #tpu.memory_space<vmem>>, vector<1x1x16xf32>
      %221 = vector.shape_cast %220 : vector<1x1x16xf32> to vector<1x16xf32>
      %c0_226 = arith.constant 0 : index
      %c18 = arith.constant 18 : index
      %c3_227 = arith.constant 3 : index
      %222 = vector.load %arg8[%c0_226, %c18, %c3_227] : memref<1x22x22xf32, #tpu.memory_space<vmem>>, vector<1x1x16xf32>
      %223 = vector.shape_cast %222 : vector<1x1x16xf32> to vector<1x16xf32>
      %224 = vector.shape_cast %221 : vector<1x16xf32> to vector<1x1x16xf32>
      tpu.vector_store %arg8[%c0_226, %c18, %c3_227], %224 {strides = array<i32>} : memref<1x22x22xf32, #tpu.memory_space<vmem>>, vector<1x1x16xf32>,
      %c0_228 = arith.constant 0 : index
      %c0_229 = arith.constant 0 : index
      %c240_230 = arith.constant 240 : index
      %225 = vector.load %arg7[%c0_228, %c0_229, %c240_230] : memref<1x8x256xf32, #tpu.memory_space<vmem>>, vector<1x1x16xf32>
      %226 = vector.shape_cast %225 : vector<1x1x16xf32> to vector<1x16xf32>
      %c0_231 = arith.constant 0 : index
      %c18_232 = arith.constant 18 : index
      %c3_233 = arith.constant 3 : index
      %227 = vector.load %arg9[%c0_231, %c18_232, %c3_233] : memref<1x22x22xf32, #tpu.memory_space<vmem>>, vector<1x1x16xf32>
      %228 = vector.shape_cast %227 : vector<1x1x16xf32> to vector<1x16xf32>
      %229 = vector.shape_cast %226 : vector<1x16xf32> to vector<1x1x16xf32>
      tpu.vector_store %arg9[%c0_231, %c18_232, %c3_233], %229 {strides = array<i32>} : memref<1x22x22xf32, #tpu.memory_space<vmem>>, vector<1x1x16xf32>,
      %c0_234 = arith.constant 0 : index
      %c0_235 = arith.constant 0 : index
      %c16_236 = arith.constant 16 : index
      %230 = vector.load %arg6[%c0_234, %c0_235, %c16_236] : memref<1x8x256xf32, #tpu.memory_space<vmem>>, vector<1x1x16xf32>
      %231 = vector.shape_cast %230 : vector<1x1x16xf32> to vector<1x16xf32>
      %c0_237 = arith.constant 0 : index
      %c2_238 = arith.constant 2 : index
      %c3_239 = arith.constant 3 : index
      %232 = vector.load %arg8[%c0_237, %c2_238, %c3_239] : memref<1x22x22xf32, #tpu.memory_space<vmem>>, vector<1x1x16xf32>
      %233 = vector.shape_cast %232 : vector<1x1x16xf32> to vector<1x16xf32>
      %234 = vector.shape_cast %231 : vector<1x16xf32> to vector<1x1x16xf32>
      tpu.vector_store %arg8[%c0_237, %c2_238, %c3_239], %234 {strides = array<i32>} : memref<1x22x22xf32, #tpu.memory_space<vmem>>, vector<1x1x16xf32>,
      %c0_240 = arith.constant 0 : index
      %c0_241 = arith.constant 0 : index
      %c16_242 = arith.constant 16 : index
      %235 = vector.load %arg7[%c0_240, %c0_241, %c16_242] : memref<1x8x256xf32, #tpu.memory_space<vmem>>, vector<1x1x16xf32>
      %236 = vector.shape_cast %235 : vector<1x1x16xf32> to vector<1x16xf32>
      %c0_243 = arith.constant 0 : index
      %c2_244 = arith.constant 2 : index
      %c3_245 = arith.constant 3 : index
      %237 = vector.load %arg9[%c0_243, %c2_244, %c3_245] : memref<1x22x22xf32, #tpu.memory_space<vmem>>, vector<1x1x16xf32>
      %238 = vector.shape_cast %237 : vector<1x1x16xf32> to vector<1x16xf32>
      %239 = vector.shape_cast %236 : vector<1x16xf32> to vector<1x1x16xf32>
      tpu.vector_store %arg9[%c0_243, %c2_244, %c3_245], %239 {strides = array<i32>} : memref<1x22x22xf32, #tpu.memory_space<vmem>>, vector<1x1x16xf32>,
      %c0_246 = arith.constant 0 : index
      %c0_247 = arith.constant 0 : index
      %c224_248 = arith.constant 224 : index
      %240 = vector.load %arg6[%c0_246, %c0_247, %c224_248] : memref<1x8x256xf32, #tpu.memory_space<vmem>>, vector<1x1x16xf32>
      %241 = vector.shape_cast %240 : vector<1x1x16xf32> to vector<1x16xf32>
      %c0_249 = arith.constant 0 : index
      %c19 = arith.constant 19 : index
      %c3_250 = arith.constant 3 : index
      %242 = vector.load %arg8[%c0_249, %c19, %c3_250] : memref<1x22x22xf32, #tpu.memory_space<vmem>>, vector<1x1x16xf32>
      %243 = vector.shape_cast %242 : vector<1x1x16xf32> to vector<1x16xf32>
      %244 = vector.shape_cast %241 : vector<1x16xf32> to vector<1x1x16xf32>
      tpu.vector_store %arg8[%c0_249, %c19, %c3_250], %244 {strides = array<i32>} : memref<1x22x22xf32, #tpu.memory_space<vmem>>, vector<1x1x16xf32>,
      %c0_251 = arith.constant 0 : index
      %c0_252 = arith.constant 0 : index
      %c224_253 = arith.constant 224 : index
      %245 = vector.load %arg7[%c0_251, %c0_252, %c224_253] : memref<1x8x256xf32, #tpu.memory_space<vmem>>, vector<1x1x16xf32>
      %246 = vector.shape_cast %245 : vector<1x1x16xf32> to vector<1x16xf32>
      %c0_254 = arith.constant 0 : index
      %c19_255 = arith.constant 19 : index
      %c3_256 = arith.constant 3 : index
      %247 = vector.load %arg9[%c0_254, %c19_255, %c3_256] : memref<1x22x22xf32, #tpu.memory_space<vmem>>, vector<1x1x16xf32>
      %248 = vector.shape_cast %247 : vector<1x1x16xf32> to vector<1x16xf32>
      %249 = vector.shape_cast %246 : vector<1x16xf32> to vector<1x1x16xf32>
      tpu.vector_store %arg9[%c0_254, %c19_255, %c3_256], %249 {strides = array<i32>} : memref<1x22x22xf32, #tpu.memory_space<vmem>>, vector<1x1x16xf32>,
      %c0_257 = arith.constant 0 : index
      %c0_258 = arith.constant 0 : index
      %c32_259 = arith.constant 32 : index
      %250 = vector.load %arg6[%c0_257, %c0_258, %c32_259] : memref<1x8x256xf32, #tpu.memory_space<vmem>>, vector<1x1x16xf32>
      %251 = vector.shape_cast %250 : vector<1x1x16xf32> to vector<1x16xf32>
      %c0_260 = arith.constant 0 : index
      %c1_261 = arith.constant 1 : index
      %c3_262 = arith.constant 3 : index
      %252 = vector.load %arg8[%c0_260, %c1_261, %c3_262] : memref<1x22x22xf32, #tpu.memory_space<vmem>>, vector<1x1x16xf32>
      %253 = vector.shape_cast %252 : vector<1x1x16xf32> to vector<1x16xf32>
      %254 = vector.shape_cast %251 : vector<1x16xf32> to vector<1x1x16xf32>
      tpu.vector_store %arg8[%c0_260, %c1_261, %c3_262], %254 {strides = array<i32>} : memref<1x22x22xf32, #tpu.memory_space<vmem>>, vector<1x1x16xf32>,
      %c0_263 = arith.constant 0 : index
      %c0_264 = arith.constant 0 : index
      %c32_265 = arith.constant 32 : index
      %255 = vector.load %arg7[%c0_263, %c0_264, %c32_265] : memref<1x8x256xf32, #tpu.memory_space<vmem>>, vector<1x1x16xf32>
      %256 = vector.shape_cast %255 : vector<1x1x16xf32> to vector<1x16xf32>
      %c0_266 = arith.constant 0 : index
      %c1_267 = arith.constant 1 : index
      %c3_268 = arith.constant 3 : index
      %257 = vector.load %arg9[%c0_266, %c1_267, %c3_268] : memref<1x22x22xf32, #tpu.memory_space<vmem>>, vector<1x1x16xf32>
      %258 = vector.shape_cast %257 : vector<1x1x16xf32> to vector<1x16xf32>
      %259 = vector.shape_cast %256 : vector<1x16xf32> to vector<1x1x16xf32>
      tpu.vector_store %arg9[%c0_266, %c1_267, %c3_268], %259 {strides = array<i32>} : memref<1x22x22xf32, #tpu.memory_space<vmem>>, vector<1x1x16xf32>,
      %c0_269 = arith.constant 0 : index
      %c0_270 = arith.constant 0 : index
      %c208_271 = arith.constant 208 : index
      %260 = vector.load %arg6[%c0_269, %c0_270, %c208_271] : memref<1x8x256xf32, #tpu.memory_space<vmem>>, vector<1x1x16xf32>
      %261 = vector.shape_cast %260 : vector<1x1x16xf32> to vector<1x16xf32>
      %c0_272 = arith.constant 0 : index
      %c20 = arith.constant 20 : index
      %c3_273 = arith.constant 3 : index
      %262 = vector.load %arg8[%c0_272, %c20, %c3_273] : memref<1x22x22xf32, #tpu.memory_space<vmem>>, vector<1x1x16xf32>
      %263 = vector.shape_cast %262 : vector<1x1x16xf32> to vector<1x16xf32>
      %264 = vector.shape_cast %261 : vector<1x16xf32> to vector<1x1x16xf32>
      tpu.vector_store %arg8[%c0_272, %c20, %c3_273], %264 {strides = array<i32>} : memref<1x22x22xf32, #tpu.memory_space<vmem>>, vector<1x1x16xf32>,
      %c0_274 = arith.constant 0 : index
      %c0_275 = arith.constant 0 : index
      %c208_276 = arith.constant 208 : index
      %265 = vector.load %arg7[%c0_274, %c0_275, %c208_276] : memref<1x8x256xf32, #tpu.memory_space<vmem>>, vector<1x1x16xf32>
      %266 = vector.shape_cast %265 : vector<1x1x16xf32> to vector<1x16xf32>
      %c0_277 = arith.constant 0 : index
      %c20_278 = arith.constant 20 : index
      %c3_279 = arith.constant 3 : index
      %267 = vector.load %arg9[%c0_277, %c20_278, %c3_279] : memref<1x22x22xf32, #tpu.memory_space<vmem>>, vector<1x1x16xf32>
      %268 = vector.shape_cast %267 : vector<1x1x16xf32> to vector<1x16xf32>
      %269 = vector.shape_cast %266 : vector<1x16xf32> to vector<1x1x16xf32>
      tpu.vector_store %arg9[%c0_277, %c20_278, %c3_279], %269 {strides = array<i32>} : memref<1x22x22xf32, #tpu.memory_space<vmem>>, vector<1x1x16xf32>,
      %c0_280 = arith.constant 0 : index
      %c0_281 = arith.constant 0 : index
      %c48_282 = arith.constant 48 : index
      %270 = vector.load %arg6[%c0_280, %c0_281, %c48_282] : memref<1x8x256xf32, #tpu.memory_space<vmem>>, vector<1x1x16xf32>
      %271 = vector.shape_cast %270 : vector<1x1x16xf32> to vector<1x16xf32>
      %c0_283 = arith.constant 0 : index
      %c0_284 = arith.constant 0 : index
      %c3_285 = arith.constant 3 : index
      %272 = vector.load %arg8[%c0_283, %c0_284, %c3_285] : memref<1x22x22xf32, #tpu.memory_space<vmem>>, vector<1x1x16xf32>
      %273 = vector.shape_cast %272 : vector<1x1x16xf32> to vector<1x16xf32>
      %274 = vector.shape_cast %271 : vector<1x16xf32> to vector<1x1x16xf32>
      tpu.vector_store %arg8[%c0_283, %c0_284, %c3_285], %274 {strides = array<i32>} : memref<1x22x22xf32, #tpu.memory_space<vmem>>, vector<1x1x16xf32>,
      %c0_286 = arith.constant 0 : index
      %c0_287 = arith.constant 0 : index
      %c48_288 = arith.constant 48 : index
      %275 = vector.load %arg7[%c0_286, %c0_287, %c48_288] : memref<1x8x256xf32, #tpu.memory_space<vmem>>, vector<1x1x16xf32>
      %276 = vector.shape_cast %275 : vector<1x1x16xf32> to vector<1x16xf32>
      %c0_289 = arith.constant 0 : index
      %c0_290 = arith.constant 0 : index
      %c3_291 = arith.constant 3 : index
      %277 = vector.load %arg9[%c0_289, %c0_290, %c3_291] : memref<1x22x22xf32, #tpu.memory_space<vmem>>, vector<1x1x16xf32>
      %278 = vector.shape_cast %277 : vector<1x1x16xf32> to vector<1x16xf32>
      %279 = vector.shape_cast %276 : vector<1x16xf32> to vector<1x1x16xf32>
      tpu.vector_store %arg9[%c0_289, %c0_290, %c3_291], %279 {strides = array<i32>} : memref<1x22x22xf32, #tpu.memory_space<vmem>>, vector<1x1x16xf32>,
      %c0_292 = arith.constant 0 : index
      %c0_293 = arith.constant 0 : index
      %c192_294 = arith.constant 192 : index
      %280 = vector.load %arg6[%c0_292, %c0_293, %c192_294] : memref<1x8x256xf32, #tpu.memory_space<vmem>>, vector<1x1x16xf32>
      %281 = vector.shape_cast %280 : vector<1x1x16xf32> to vector<1x16xf32>
      %c0_295 = arith.constant 0 : index
      %c21 = arith.constant 21 : index
      %c3_296 = arith.constant 3 : index
      %282 = vector.load %arg8[%c0_295, %c21, %c3_296] : memref<1x22x22xf32, #tpu.memory_space<vmem>>, vector<1x1x16xf32>
      %283 = vector.shape_cast %282 : vector<1x1x16xf32> to vector<1x16xf32>
      %284 = vector.shape_cast %281 : vector<1x16xf32> to vector<1x1x16xf32>
      tpu.vector_store %arg8[%c0_295, %c21, %c3_296], %284 {strides = array<i32>} : memref<1x22x22xf32, #tpu.memory_space<vmem>>, vector<1x1x16xf32>,
      %c0_297 = arith.constant 0 : index
      %c0_298 = arith.constant 0 : index
      %c192_299 = arith.constant 192 : index
      %285 = vector.load %arg7[%c0_297, %c0_298, %c192_299] : memref<1x8x256xf32, #tpu.memory_space<vmem>>, vector<1x1x16xf32>
      %286 = vector.shape_cast %285 : vector<1x1x16xf32> to vector<1x16xf32>
      %c0_300 = arith.constant 0 : index
      %c21_301 = arith.constant 21 : index
      %c3_302 = arith.constant 3 : index
      %287 = vector.load %arg9[%c0_300, %c21_301, %c3_302] : memref<1x22x22xf32, #tpu.memory_space<vmem>>, vector<1x1x16xf32>
      %288 = vector.shape_cast %287 : vector<1x1x16xf32> to vector<1x16xf32>
      %289 = vector.shape_cast %286 : vector<1x16xf32> to vector<1x1x16xf32>
      tpu.vector_store %arg9[%c0_300, %c21_301, %c3_302], %289 {strides = array<i32>} : memref<1x22x22xf32, #tpu.memory_space<vmem>>, vector<1x1x16xf32>,
      %c0_303 = arith.constant 0 : index
      %c0_304 = arith.constant 0 : index
      %c4_305 = arith.constant 4 : index
      %290 = vector.load %arg8[%c0_303, %c0_304, %c4_305] : memref<1x22x22xf32, #tpu.memory_space<vmem>>, vector<1x22x1xf32>
      %c0_306 = arith.constant 0 : index
      %c0_307 = arith.constant 0 : index
      %c2_308 = arith.constant 2 : index
      %291 = vector.load %arg8[%c0_306, %c0_307, %c2_308] : memref<1x22x22xf32, #tpu.memory_space<vmem>>, vector<1x22x1xf32>
      tpu.vector_store %arg8[%c0_306, %c0_307, %c2_308], %290 {strides = array<i32>} : memref<1x22x22xf32, #tpu.memory_space<vmem>>, vector<1x22x1xf32>,
      %c0_309 = arith.constant 0 : index
      %c0_310 = arith.constant 0 : index
      %c4_311 = arith.constant 4 : index
      %292 = vector.load %arg9[%c0_309, %c0_310, %c4_311] : memref<1x22x22xf32, #tpu.memory_space<vmem>>, vector<1x22x1xf32>
      %c0_312 = arith.constant 0 : index
      %c0_313 = arith.constant 0 : index
      %c2_314 = arith.constant 2 : index
      %293 = vector.load %arg9[%c0_312, %c0_313, %c2_314] : memref<1x22x22xf32, #tpu.memory_space<vmem>>, vector<1x22x1xf32>
      tpu.vector_store %arg9[%c0_312, %c0_313, %c2_314], %292 {strides = array<i32>} : memref<1x22x22xf32, #tpu.memory_space<vmem>>, vector<1x22x1xf32>,
      %c0_315 = arith.constant 0 : index
      %c0_316 = arith.constant 0 : index
      %c17_317 = arith.constant 17 : index
      %294 = vector.load %arg8[%c0_315, %c0_316, %c17_317] : memref<1x22x22xf32, #tpu.memory_space<vmem>>, vector<1x22x1xf32>
      %c0_318 = arith.constant 0 : index
      %c0_319 = arith.constant 0 : index
      %c19_320 = arith.constant 19 : index
      %295 = vector.load %arg8[%c0_318, %c0_319, %c19_320] : memref<1x22x22xf32, #tpu.memory_space<vmem>>, vector<1x22x1xf32>
      tpu.vector_store %arg8[%c0_318, %c0_319, %c19_320], %294 {strides = array<i32>} : memref<1x22x22xf32, #tpu.memory_space<vmem>>, vector<1x22x1xf32>,
      %c0_321 = arith.constant 0 : index
      %c0_322 = arith.constant 0 : index
      %c17_323 = arith.constant 17 : index
      %296 = vector.load %arg9[%c0_321, %c0_322, %c17_323] : memref<1x22x22xf32, #tpu.memory_space<vmem>>, vector<1x22x1xf32>
      %c0_324 = arith.constant 0 : index
      %c0_325 = arith.constant 0 : index
      %c19_326 = arith.constant 19 : index
      %297 = vector.load %arg9[%c0_324, %c0_325, %c19_326] : memref<1x22x22xf32, #tpu.memory_space<vmem>>, vector<1x22x1xf32>
      tpu.vector_store %arg9[%c0_324, %c0_325, %c19_326], %296 {strides = array<i32>} : memref<1x22x22xf32, #tpu.memory_space<vmem>>, vector<1x22x1xf32>,
      %c0_327 = arith.constant 0 : index
      %c0_328 = arith.constant 0 : index
      %c5_329 = arith.constant 5 : index
      %298 = vector.load %arg8[%c0_327, %c0_328, %c5_329] : memref<1x22x22xf32, #tpu.memory_space<vmem>>, vector<1x22x1xf32>
      %c0_330 = arith.constant 0 : index
      %c0_331 = arith.constant 0 : index
      %c1_332 = arith.constant 1 : index
      %299 = vector.load %arg8[%c0_330, %c0_331, %c1_332] : memref<1x22x22xf32, #tpu.memory_space<vmem>>, vector<1x22x1xf32>
      tpu.vector_store %arg8[%c0_330, %c0_331, %c1_332], %298 {strides = array<i32>} : memref<1x22x22xf32, #tpu.memory_space<vmem>>, vector<1x22x1xf32>,
      %c0_333 = arith.constant 0 : index
      %c0_334 = arith.constant 0 : index
      %c5_335 = arith.constant 5 : index
      %300 = vector.load %arg9[%c0_333, %c0_334, %c5_335] : memref<1x22x22xf32, #tpu.memory_space<vmem>>, vector<1x22x1xf32>
      %c0_336 = arith.constant 0 : index
      %c0_337 = arith.constant 0 : index
      %c1_338 = arith.constant 1 : index
      %301 = vector.load %arg9[%c0_336, %c0_337, %c1_338] : memref<1x22x22xf32, #tpu.memory_space<vmem>>, vector<1x22x1xf32>
      tpu.vector_store %arg9[%c0_336, %c0_337, %c1_338], %300 {strides = array<i32>} : memref<1x22x22xf32, #tpu.memory_space<vmem>>, vector<1x22x1xf32>,
      %c0_339 = arith.constant 0 : index
      %c0_340 = arith.constant 0 : index
      %c16_341 = arith.constant 16 : index
      %302 = vector.load %arg8[%c0_339, %c0_340, %c16_341] : memref<1x22x22xf32, #tpu.memory_space<vmem>>, vector<1x22x1xf32>
      %c0_342 = arith.constant 0 : index
      %c0_343 = arith.constant 0 : index
      %c20_344 = arith.constant 20 : index
      %303 = vector.load %arg8[%c0_342, %c0_343, %c20_344] : memref<1x22x22xf32, #tpu.memory_space<vmem>>, vector<1x22x1xf32>
      tpu.vector_store %arg8[%c0_342, %c0_343, %c20_344], %302 {strides = array<i32>} : memref<1x22x22xf32, #tpu.memory_space<vmem>>, vector<1x22x1xf32>,
      %c0_345 = arith.constant 0 : index
      %c0_346 = arith.constant 0 : index
      %c16_347 = arith.constant 16 : index
      %304 = vector.load %arg9[%c0_345, %c0_346, %c16_347] : memref<1x22x22xf32, #tpu.memory_space<vmem>>, vector<1x22x1xf32>
      %c0_348 = arith.constant 0 : index
      %c0_349 = arith.constant 0 : index
      %c20_350 = arith.constant 20 : index
      %305 = vector.load %arg9[%c0_348, %c0_349, %c20_350] : memref<1x22x22xf32, #tpu.memory_space<vmem>>, vector<1x22x1xf32>
      tpu.vector_store %arg9[%c0_348, %c0_349, %c20_350], %304 {strides = array<i32>} : memref<1x22x22xf32, #tpu.memory_space<vmem>>, vector<1x22x1xf32>,
      %c0_351 = arith.constant 0 : index
      %c0_352 = arith.constant 0 : index
      %c6_353 = arith.constant 6 : index
      %306 = vector.load %arg8[%c0_351, %c0_352, %c6_353] : memref<1x22x22xf32, #tpu.memory_space<vmem>>, vector<1x22x1xf32>
      %c0_354 = arith.constant 0 : index
      %c0_355 = arith.constant 0 : index
      %c0_356 = arith.constant 0 : index
      %307 = vector.load %arg8[%c0_354, %c0_355, %c0_356] : memref<1x22x22xf32, #tpu.memory_space<vmem>>, vector<1x22x1xf32>
      tpu.vector_store %arg8[%c0_354, %c0_355, %c0_356], %306 {strides = array<i32>} : memref<1x22x22xf32, #tpu.memory_space<vmem>>, vector<1x22x1xf32>,
      %c0_357 = arith.constant 0 : index
      %c0_358 = arith.constant 0 : index
      %c6_359 = arith.constant 6 : index
      %308 = vector.load %arg9[%c0_357, %c0_358, %c6_359] : memref<1x22x22xf32, #tpu.memory_space<vmem>>, vector<1x22x1xf32>
      %c0_360 = arith.constant 0 : index
      %c0_361 = arith.constant 0 : index
      %c0_362 = arith.constant 0 : index
      %309 = vector.load %arg9[%c0_360, %c0_361, %c0_362] : memref<1x22x22xf32, #tpu.memory_space<vmem>>, vector<1x22x1xf32>
      tpu.vector_store %arg9[%c0_360, %c0_361, %c0_362], %308 {strides = array<i32>} : memref<1x22x22xf32, #tpu.memory_space<vmem>>, vector<1x22x1xf32>,
      %c0_363 = arith.constant 0 : index
      %c0_364 = arith.constant 0 : index
      %c15_365 = arith.constant 15 : index
      %310 = vector.load %arg8[%c0_363, %c0_364, %c15_365] : memref<1x22x22xf32, #tpu.memory_space<vmem>>, vector<1x22x1xf32>
      %c0_366 = arith.constant 0 : index
      %c0_367 = arith.constant 0 : index
      %c21_368 = arith.constant 21 : index
      %311 = vector.load %arg8[%c0_366, %c0_367, %c21_368] : memref<1x22x22xf32, #tpu.memory_space<vmem>>, vector<1x22x1xf32>
      tpu.vector_store %arg8[%c0_366, %c0_367, %c21_368], %310 {strides = array<i32>} : memref<1x22x22xf32, #tpu.memory_space<vmem>>, vector<1x22x1xf32>,
      %c0_369 = arith.constant 0 : index
      %c0_370 = arith.constant 0 : index
      %c15_371 = arith.constant 15 : index
      %312 = vector.load %arg9[%c0_369, %c0_370, %c15_371] : memref<1x22x22xf32, #tpu.memory_space<vmem>>, vector<1x22x1xf32>
      %c0_372 = arith.constant 0 : index
      %c0_373 = arith.constant 0 : index
      %c21_374 = arith.constant 21 : index
      %313 = vector.load %arg9[%c0_372, %c0_373, %c21_374] : memref<1x22x22xf32, #tpu.memory_space<vmem>>, vector<1x22x1xf32>
      tpu.vector_store %arg9[%c0_372, %c0_373, %c21_374], %312 {strides = array<i32>} : memref<1x22x22xf32, #tpu.memory_space<vmem>>, vector<1x22x1xf32>,
      %c0_375 = arith.constant 0 : index
      %314 = memref.load %arg3[%c0_375] : memref<1xf32, #tpu.memory_space<smem>>
      %315 = vector.broadcast %314 : f32 to vector<1x16x16xf32>
      %cst_376 = arith.constant 0.000000e+00 : f32
      %316 = vector.broadcast %cst_376 : f32 to vector<1x16x16xf32>
      %c0_377 = arith.constant 0 : index
      %c0_378 = arith.constant 0 : index
      %c0_379 = arith.constant 0 : index
      %317 = vector.load %arg8[%c0_377, %c0_378, %c0_379] : memref<1x22x22xf32, #tpu.memory_space<vmem>>, vector<1x22x16xf32>
      %c0_380 = arith.constant 0 : index
      %c0_381 = arith.constant 0 : index
      %c0_382 = arith.constant 0 : index
      %318 = vector.load %arg9[%c0_380, %c0_381, %c0_382] : memref<1x22x22xf32, #tpu.memory_space<vmem>>, vector<1x22x16xf32>
      %c0_383 = arith.constant 0 : index
      %319 = memref.load %arg2[%c0_383] : memref<98xf32, #tpu.memory_space<smem>>
      %c49 = arith.constant 49 : index
      %320 = memref.load %arg2[%c49] : memref<98xf32, #tpu.memory_space<smem>>
      %321 = vector.extract_strided_slice %317 {offsets = [0, 0, 0], sizes = [1, 16, 16], strides = [1, 1, 1]} : vector<1x22x16xf32> to vector<1x16x16xf32>
      %322 = vector.broadcast %319 : f32 to vector<1x16x16xf32>
      %323 = arith.mulf %322, %321 : vector<1x16x16xf32>
      %324 = vector.extract_strided_slice %318 {offsets = [0, 0, 0], sizes = [1, 16, 16], strides = [1, 1, 1]} : vector<1x22x16xf32> to vector<1x16x16xf32>
      %325 = vector.broadcast %320 : f32 to vector<1x16x16xf32>
      %326 = arith.mulf %325, %324 : vector<1x16x16xf32>
      %327 = arith.addf %323, %326 : vector<1x16x16xf32>
      %328 = arith.addf %315, %327 : vector<1x16x16xf32>
      %c7_384 = arith.constant 7 : index
      %329 = memref.load %arg2[%c7_384] : memref<98xf32, #tpu.memory_space<smem>>
      %c56 = arith.constant 56 : index
      %330 = memref.load %arg2[%c56] : memref<98xf32, #tpu.memory_space<smem>>
      %331 = vector.extract_strided_slice %317 {offsets = [0, 1, 0], sizes = [1, 16, 16], strides = [1, 1, 1]} : vector<1x22x16xf32> to vector<1x16x16xf32>
      %332 = vector.broadcast %329 : f32 to vector<1x16x16xf32>
      %333 = arith.mulf %332, %331 : vector<1x16x16xf32>
      %334 = vector.extract_strided_slice %318 {offsets = [0, 1, 0], sizes = [1, 16, 16], strides = [1, 1, 1]} : vector<1x22x16xf32> to vector<1x16x16xf32>
      %335 = vector.broadcast %330 : f32 to vector<1x16x16xf32>
      %336 = arith.mulf %335, %334 : vector<1x16x16xf32>
      %337 = arith.addf %333, %336 : vector<1x16x16xf32>
      %338 = arith.addf %316, %337 : vector<1x16x16xf32>
      %c14_385 = arith.constant 14 : index
      %339 = memref.load %arg2[%c14_385] : memref<98xf32, #tpu.memory_space<smem>>
      %c63 = arith.constant 63 : index
      %340 = memref.load %arg2[%c63] : memref<98xf32, #tpu.memory_space<smem>>
      %341 = vector.extract_strided_slice %317 {offsets = [0, 2, 0], sizes = [1, 16, 16], strides = [1, 1, 1]} : vector<1x22x16xf32> to vector<1x16x16xf32>
      %342 = vector.broadcast %339 : f32 to vector<1x16x16xf32>
      %343 = arith.mulf %342, %341 : vector<1x16x16xf32>
      %344 = vector.extract_strided_slice %318 {offsets = [0, 2, 0], sizes = [1, 16, 16], strides = [1, 1, 1]} : vector<1x22x16xf32> to vector<1x16x16xf32>
      %345 = vector.broadcast %340 : f32 to vector<1x16x16xf32>
      %346 = arith.mulf %345, %344 : vector<1x16x16xf32>
      %347 = arith.addf %343, %346 : vector<1x16x16xf32>
      %348 = arith.addf %328, %347 : vector<1x16x16xf32>
      %c21_386 = arith.constant 21 : index
      %349 = memref.load %arg2[%c21_386] : memref<98xf32, #tpu.memory_space<smem>>
      %c70 = arith.constant 70 : index
      %350 = memref.load %arg2[%c70] : memref<98xf32, #tpu.memory_space<smem>>
      %351 = vector.extract_strided_slice %317 {offsets = [0, 3, 0], sizes = [1, 16, 16], strides = [1, 1, 1]} : vector<1x22x16xf32> to vector<1x16x16xf32>
      %352 = vector.broadcast %349 : f32 to vector<1x16x16xf32>
      %353 = arith.mulf %352, %351 : vector<1x16x16xf32>
      %354 = vector.extract_strided_slice %318 {offsets = [0, 3, 0], sizes = [1, 16, 16], strides = [1, 1, 1]} : vector<1x22x16xf32> to vector<1x16x16xf32>
      %355 = vector.broadcast %350 : f32 to vector<1x16x16xf32>
      %356 = arith.mulf %355, %354 : vector<1x16x16xf32>
      %357 = arith.addf %353, %356 : vector<1x16x16xf32>
      %358 = arith.addf %338, %357 : vector<1x16x16xf32>
      %c28 = arith.constant 28 : index
      %359 = memref.load %arg2[%c28] : memref<98xf32, #tpu.memory_space<smem>>
      %c77 = arith.constant 77 : index
      %360 = memref.load %arg2[%c77] : memref<98xf32, #tpu.memory_space<smem>>
      %361 = vector.extract_strided_slice %317 {offsets = [0, 4, 0], sizes = [1, 16, 16], strides = [1, 1, 1]} : vector<1x22x16xf32> to vector<1x16x16xf32>
      %362 = vector.broadcast %359 : f32 to vector<1x16x16xf32>
      %363 = arith.mulf %362, %361 : vector<1x16x16xf32>
      %364 = vector.extract_strided_slice %318 {offsets = [0, 4, 0], sizes = [1, 16, 16], strides = [1, 1, 1]} : vector<1x22x16xf32> to vector<1x16x16xf32>
      %365 = vector.broadcast %360 : f32 to vector<1x16x16xf32>
      %366 = arith.mulf %365, %364 : vector<1x16x16xf32>
      %367 = arith.addf %363, %366 : vector<1x16x16xf32>
      %368 = arith.addf %348, %367 : vector<1x16x16xf32>
      %c35 = arith.constant 35 : index
      %369 = memref.load %arg2[%c35] : memref<98xf32, #tpu.memory_space<smem>>
      %c84 = arith.constant 84 : index
      %370 = memref.load %arg2[%c84] : memref<98xf32, #tpu.memory_space<smem>>
      %371 = vector.extract_strided_slice %317 {offsets = [0, 5, 0], sizes = [1, 16, 16], strides = [1, 1, 1]} : vector<1x22x16xf32> to vector<1x16x16xf32>
      %372 = vector.broadcast %369 : f32 to vector<1x16x16xf32>
      %373 = arith.mulf %372, %371 : vector<1x16x16xf32>
      %374 = vector.extract_strided_slice %318 {offsets = [0, 5, 0], sizes = [1, 16, 16], strides = [1, 1, 1]} : vector<1x22x16xf32> to vector<1x16x16xf32>
      %375 = vector.broadcast %370 : f32 to vector<1x16x16xf32>
      %376 = arith.mulf %375, %374 : vector<1x16x16xf32>
      %377 = arith.addf %373, %376 : vector<1x16x16xf32>
      %378 = arith.addf %358, %377 : vector<1x16x16xf32>
      %c42 = arith.constant 42 : index
      %379 = memref.load %arg2[%c42] : memref<98xf32, #tpu.memory_space<smem>>
      %c91 = arith.constant 91 : index
      %380 = memref.load %arg2[%c91] : memref<98xf32, #tpu.memory_space<smem>>
      %381 = vector.extract_strided_slice %317 {offsets = [0, 6, 0], sizes = [1, 16, 16], strides = [1, 1, 1]} : vector<1x22x16xf32> to vector<1x16x16xf32>
      %382 = vector.broadcast %379 : f32 to vector<1x16x16xf32>
      %383 = arith.mulf %382, %381 : vector<1x16x16xf32>
      %384 = vector.extract_strided_slice %318 {offsets = [0, 6, 0], sizes = [1, 16, 16], strides = [1, 1, 1]} : vector<1x22x16xf32> to vector<1x16x16xf32>
      %385 = vector.broadcast %380 : f32 to vector<1x16x16xf32>
      %386 = arith.mulf %385, %384 : vector<1x16x16xf32>
      %387 = arith.addf %383, %386 : vector<1x16x16xf32>
      %388 = arith.addf %368, %387 : vector<1x16x16xf32>
      %c0_387 = arith.constant 0 : index
      %c0_388 = arith.constant 0 : index
      %c1_389 = arith.constant 1 : index
      %389 = vector.load %arg8[%c0_387, %c0_388, %c1_389] : memref<1x22x22xf32, #tpu.memory_space<vmem>>, vector<1x22x16xf32>
      %c0_390 = arith.constant 0 : index
      %c0_391 = arith.constant 0 : index
      %c1_392 = arith.constant 1 : index
      %390 = vector.load %arg9[%c0_390, %c0_391, %c1_392] : memref<1x22x22xf32, #tpu.memory_space<vmem>>, vector<1x22x16xf32>
      %c1_393 = arith.constant 1 : index
      %391 = memref.load %arg2[%c1_393] : memref<98xf32, #tpu.memory_space<smem>>
      %c50 = arith.constant 50 : index
      %392 = memref.load %arg2[%c50] : memref<98xf32, #tpu.memory_space<smem>>
      %393 = vector.extract_strided_slice %389 {offsets = [0, 0, 0], sizes = [1, 16, 16], strides = [1, 1, 1]} : vector<1x22x16xf32> to vector<1x16x16xf32>
      %394 = vector.broadcast %391 : f32 to vector<1x16x16xf32>
      %395 = arith.mulf %394, %393 : vector<1x16x16xf32>
      %396 = vector.extract_strided_slice %390 {offsets = [0, 0, 0], sizes = [1, 16, 16], strides = [1, 1, 1]} : vector<1x22x16xf32> to vector<1x16x16xf32>
      %397 = vector.broadcast %392 : f32 to vector<1x16x16xf32>
      %398 = arith.mulf %397, %396 : vector<1x16x16xf32>
      %399 = arith.addf %395, %398 : vector<1x16x16xf32>
      %400 = arith.addf %378, %399 : vector<1x16x16xf32>
      %c8_394 = arith.constant 8 : index
      %401 = memref.load %arg2[%c8_394] : memref<98xf32, #tpu.memory_space<smem>>
      %c57 = arith.constant 57 : index
      %402 = memref.load %arg2[%c57] : memref<98xf32, #tpu.memory_space<smem>>
      %403 = vector.extract_strided_slice %389 {offsets = [0, 1, 0], sizes = [1, 16, 16], strides = [1, 1, 1]} : vector<1x22x16xf32> to vector<1x16x16xf32>
      %404 = vector.broadcast %401 : f32 to vector<1x16x16xf32>
      %405 = arith.mulf %404, %403 : vector<1x16x16xf32>
      %406 = vector.extract_strided_slice %390 {offsets = [0, 1, 0], sizes = [1, 16, 16], strides = [1, 1, 1]} : vector<1x22x16xf32> to vector<1x16x16xf32>
      %407 = vector.broadcast %402 : f32 to vector<1x16x16xf32>
      %408 = arith.mulf %407, %406 : vector<1x16x16xf32>
      %409 = arith.addf %405, %408 : vector<1x16x16xf32>
      %410 = arith.addf %388, %409 : vector<1x16x16xf32>
      %c15_395 = arith.constant 15 : index
      %411 = memref.load %arg2[%c15_395] : memref<98xf32, #tpu.memory_space<smem>>
      %c64_396 = arith.constant 64 : index
      %412 = memref.load %arg2[%c64_396] : memref<98xf32, #tpu.memory_space<smem>>
      %413 = vector.extract_strided_slice %389 {offsets = [0, 2, 0], sizes = [1, 16, 16], strides = [1, 1, 1]} : vector<1x22x16xf32> to vector<1x16x16xf32>
      %414 = vector.broadcast %411 : f32 to vector<1x16x16xf32>
      %415 = arith.mulf %414, %413 : vector<1x16x16xf32>
      %416 = vector.extract_strided_slice %390 {offsets = [0, 2, 0], sizes = [1, 16, 16], strides = [1, 1, 1]} : vector<1x22x16xf32> to vector<1x16x16xf32>
      %417 = vector.broadcast %412 : f32 to vector<1x16x16xf32>
      %418 = arith.mulf %417, %416 : vector<1x16x16xf32>
      %419 = arith.addf %415, %418 : vector<1x16x16xf32>
      %420 = arith.addf %400, %419 : vector<1x16x16xf32>
      %c22 = arith.constant 22 : index
      %421 = memref.load %arg2[%c22] : memref<98xf32, #tpu.memory_space<smem>>
      %c71 = arith.constant 71 : index
      %422 = memref.load %arg2[%c71] : memref<98xf32, #tpu.memory_space<smem>>
      %423 = vector.extract_strided_slice %389 {offsets = [0, 3, 0], sizes = [1, 16, 16], strides = [1, 1, 1]} : vector<1x22x16xf32> to vector<1x16x16xf32>
      %424 = vector.broadcast %421 : f32 to vector<1x16x16xf32>
      %425 = arith.mulf %424, %423 : vector<1x16x16xf32>
      %426 = vector.extract_strided_slice %390 {offsets = [0, 3, 0], sizes = [1, 16, 16], strides = [1, 1, 1]} : vector<1x22x16xf32> to vector<1x16x16xf32>
      %427 = vector.broadcast %422 : f32 to vector<1x16x16xf32>
      %428 = arith.mulf %427, %426 : vector<1x16x16xf32>
      %429 = arith.addf %425, %428 : vector<1x16x16xf32>
      %430 = arith.addf %410, %429 : vector<1x16x16xf32>
      %c29 = arith.constant 29 : index
      %431 = memref.load %arg2[%c29] : memref<98xf32, #tpu.memory_space<smem>>
      %c78 = arith.constant 78 : index
      %432 = memref.load %arg2[%c78] : memref<98xf32, #tpu.memory_space<smem>>
      %433 = vector.extract_strided_slice %389 {offsets = [0, 4, 0], sizes = [1, 16, 16], strides = [1, 1, 1]} : vector<1x22x16xf32> to vector<1x16x16xf32>
      %434 = vector.broadcast %431 : f32 to vector<1x16x16xf32>
      %435 = arith.mulf %434, %433 : vector<1x16x16xf32>
      %436 = vector.extract_strided_slice %390 {offsets = [0, 4, 0], sizes = [1, 16, 16], strides = [1, 1, 1]} : vector<1x22x16xf32> to vector<1x16x16xf32>
      %437 = vector.broadcast %432 : f32 to vector<1x16x16xf32>
      %438 = arith.mulf %437, %436 : vector<1x16x16xf32>
      %439 = arith.addf %435, %438 : vector<1x16x16xf32>
      %440 = arith.addf %420, %439 : vector<1x16x16xf32>
      %c36 = arith.constant 36 : index
      %441 = memref.load %arg2[%c36] : memref<98xf32, #tpu.memory_space<smem>>
      %c85 = arith.constant 85 : index
      %442 = memref.load %arg2[%c85] : memref<98xf32, #tpu.memory_space<smem>>
      %443 = vector.extract_strided_slice %389 {offsets = [0, 5, 0], sizes = [1, 16, 16], strides = [1, 1, 1]} : vector<1x22x16xf32> to vector<1x16x16xf32>
      %444 = vector.broadcast %441 : f32 to vector<1x16x16xf32>
      %445 = arith.mulf %444, %443 : vector<1x16x16xf32>
      %446 = vector.extract_strided_slice %390 {offsets = [0, 5, 0], sizes = [1, 16, 16], strides = [1, 1, 1]} : vector<1x22x16xf32> to vector<1x16x16xf32>
      %447 = vector.broadcast %442 : f32 to vector<1x16x16xf32>
      %448 = arith.mulf %447, %446 : vector<1x16x16xf32>
      %449 = arith.addf %445, %448 : vector<1x16x16xf32>
      %450 = arith.addf %430, %449 : vector<1x16x16xf32>
      %c43 = arith.constant 43 : index
      %451 = memref.load %arg2[%c43] : memref<98xf32, #tpu.memory_space<smem>>
      %c92 = arith.constant 92 : index
      %452 = memref.load %arg2[%c92] : memref<98xf32, #tpu.memory_space<smem>>
      %453 = vector.extract_strided_slice %389 {offsets = [0, 6, 0], sizes = [1, 16, 16], strides = [1, 1, 1]} : vector<1x22x16xf32> to vector<1x16x16xf32>
      %454 = vector.broadcast %451 : f32 to vector<1x16x16xf32>
      %455 = arith.mulf %454, %453 : vector<1x16x16xf32>
      %456 = vector.extract_strided_slice %390 {offsets = [0, 6, 0], sizes = [1, 16, 16], strides = [1, 1, 1]} : vector<1x22x16xf32> to vector<1x16x16xf32>
      %457 = vector.broadcast %452 : f32 to vector<1x16x16xf32>
      %458 = arith.mulf %457, %456 : vector<1x16x16xf32>
      %459 = arith.addf %455, %458 : vector<1x16x16xf32>
      %460 = arith.addf %440, %459 : vector<1x16x16xf32>
      %c0_397 = arith.constant 0 : index
      %c0_398 = arith.constant 0 : index
      %c2_399 = arith.constant 2 : index
      %461 = vector.load %arg8[%c0_397, %c0_398, %c2_399] : memref<1x22x22xf32, #tpu.memory_space<vmem>>, vector<1x22x16xf32>
      %c0_400 = arith.constant 0 : index
      %c0_401 = arith.constant 0 : index
      %c2_402 = arith.constant 2 : index
      %462 = vector.load %arg9[%c0_400, %c0_401, %c2_402] : memref<1x22x22xf32, #tpu.memory_space<vmem>>, vector<1x22x16xf32>
      %c2_403 = arith.constant 2 : index
      %463 = memref.load %arg2[%c2_403] : memref<98xf32, #tpu.memory_space<smem>>
      %c51 = arith.constant 51 : index
      %464 = memref.load %arg2[%c51] : memref<98xf32, #tpu.memory_space<smem>>
      %465 = vector.extract_strided_slice %461 {offsets = [0, 0, 0], sizes = [1, 16, 16], strides = [1, 1, 1]} : vector<1x22x16xf32> to vector<1x16x16xf32>
      %466 = vector.broadcast %463 : f32 to vector<1x16x16xf32>
      %467 = arith.mulf %466, %465 : vector<1x16x16xf32>
      %468 = vector.extract_strided_slice %462 {offsets = [0, 0, 0], sizes = [1, 16, 16], strides = [1, 1, 1]} : vector<1x22x16xf32> to vector<1x16x16xf32>
      %469 = vector.broadcast %464 : f32 to vector<1x16x16xf32>
      %470 = arith.mulf %469, %468 : vector<1x16x16xf32>
      %471 = arith.addf %467, %470 : vector<1x16x16xf32>
      %472 = arith.addf %450, %471 : vector<1x16x16xf32>
      %c9_404 = arith.constant 9 : index
      %473 = memref.load %arg2[%c9_404] : memref<98xf32, #tpu.memory_space<smem>>
      %c58 = arith.constant 58 : index
      %474 = memref.load %arg2[%c58] : memref<98xf32, #tpu.memory_space<smem>>
      %475 = vector.extract_strided_slice %461 {offsets = [0, 1, 0], sizes = [1, 16, 16], strides = [1, 1, 1]} : vector<1x22x16xf32> to vector<1x16x16xf32>
      %476 = vector.broadcast %473 : f32 to vector<1x16x16xf32>
      %477 = arith.mulf %476, %475 : vector<1x16x16xf32>
      %478 = vector.extract_strided_slice %462 {offsets = [0, 1, 0], sizes = [1, 16, 16], strides = [1, 1, 1]} : vector<1x22x16xf32> to vector<1x16x16xf32>
      %479 = vector.broadcast %474 : f32 to vector<1x16x16xf32>
      %480 = arith.mulf %479, %478 : vector<1x16x16xf32>
      %481 = arith.addf %477, %480 : vector<1x16x16xf32>
      %482 = arith.addf %460, %481 : vector<1x16x16xf32>
      %c16_405 = arith.constant 16 : index
      %483 = memref.load %arg2[%c16_405] : memref<98xf32, #tpu.memory_space<smem>>
      %c65 = arith.constant 65 : index
      %484 = memref.load %arg2[%c65] : memref<98xf32, #tpu.memory_space<smem>>
      %485 = vector.extract_strided_slice %461 {offsets = [0, 2, 0], sizes = [1, 16, 16], strides = [1, 1, 1]} : vector<1x22x16xf32> to vector<1x16x16xf32>
      %486 = vector.broadcast %483 : f32 to vector<1x16x16xf32>
      %487 = arith.mulf %486, %485 : vector<1x16x16xf32>
      %488 = vector.extract_strided_slice %462 {offsets = [0, 2, 0], sizes = [1, 16, 16], strides = [1, 1, 1]} : vector<1x22x16xf32> to vector<1x16x16xf32>
      %489 = vector.broadcast %484 : f32 to vector<1x16x16xf32>
      %490 = arith.mulf %489, %488 : vector<1x16x16xf32>
      %491 = arith.addf %487, %490 : vector<1x16x16xf32>
      %492 = arith.addf %472, %491 : vector<1x16x16xf32>
      %c23 = arith.constant 23 : index
      %493 = memref.load %arg2[%c23] : memref<98xf32, #tpu.memory_space<smem>>
      %c72 = arith.constant 72 : index
      %494 = memref.load %arg2[%c72] : memref<98xf32, #tpu.memory_space<smem>>
      %495 = vector.extract_strided_slice %461 {offsets = [0, 3, 0], sizes = [1, 16, 16], strides = [1, 1, 1]} : vector<1x22x16xf32> to vector<1x16x16xf32>
      %496 = vector.broadcast %493 : f32 to vector<1x16x16xf32>
      %497 = arith.mulf %496, %495 : vector<1x16x16xf32>
      %498 = vector.extract_strided_slice %462 {offsets = [0, 3, 0], sizes = [1, 16, 16], strides = [1, 1, 1]} : vector<1x22x16xf32> to vector<1x16x16xf32>
      %499 = vector.broadcast %494 : f32 to vector<1x16x16xf32>
      %500 = arith.mulf %499, %498 : vector<1x16x16xf32>
      %501 = arith.addf %497, %500 : vector<1x16x16xf32>
      %502 = arith.addf %482, %501 : vector<1x16x16xf32>
      %c30 = arith.constant 30 : index
      %503 = memref.load %arg2[%c30] : memref<98xf32, #tpu.memory_space<smem>>
      %c79 = arith.constant 79 : index
      %504 = memref.load %arg2[%c79] : memref<98xf32, #tpu.memory_space<smem>>
      %505 = vector.extract_strided_slice %461 {offsets = [0, 4, 0], sizes = [1, 16, 16], strides = [1, 1, 1]} : vector<1x22x16xf32> to vector<1x16x16xf32>
      %506 = vector.broadcast %503 : f32 to vector<1x16x16xf32>
      %507 = arith.mulf %506, %505 : vector<1x16x16xf32>
      %508 = vector.extract_strided_slice %462 {offsets = [0, 4, 0], sizes = [1, 16, 16], strides = [1, 1, 1]} : vector<1x22x16xf32> to vector<1x16x16xf32>
      %509 = vector.broadcast %504 : f32 to vector<1x16x16xf32>
      %510 = arith.mulf %509, %508 : vector<1x16x16xf32>
      %511 = arith.addf %507, %510 : vector<1x16x16xf32>
      %512 = arith.addf %492, %511 : vector<1x16x16xf32>
      %c37 = arith.constant 37 : index
      %513 = memref.load %arg2[%c37] : memref<98xf32, #tpu.memory_space<smem>>
      %c86 = arith.constant 86 : index
      %514 = memref.load %arg2[%c86] : memref<98xf32, #tpu.memory_space<smem>>
      %515 = vector.extract_strided_slice %461 {offsets = [0, 5, 0], sizes = [1, 16, 16], strides = [1, 1, 1]} : vector<1x22x16xf32> to vector<1x16x16xf32>
      %516 = vector.broadcast %513 : f32 to vector<1x16x16xf32>
      %517 = arith.mulf %516, %515 : vector<1x16x16xf32>
      %518 = vector.extract_strided_slice %462 {offsets = [0, 5, 0], sizes = [1, 16, 16], strides = [1, 1, 1]} : vector<1x22x16xf32> to vector<1x16x16xf32>
      %519 = vector.broadcast %514 : f32 to vector<1x16x16xf32>
      %520 = arith.mulf %519, %518 : vector<1x16x16xf32>
      %521 = arith.addf %517, %520 : vector<1x16x16xf32>
      %522 = arith.addf %502, %521 : vector<1x16x16xf32>
      %c44 = arith.constant 44 : index
      %523 = memref.load %arg2[%c44] : memref<98xf32, #tpu.memory_space<smem>>
      %c93 = arith.constant 93 : index
      %524 = memref.load %arg2[%c93] : memref<98xf32, #tpu.memory_space<smem>>
      %525 = vector.extract_strided_slice %461 {offsets = [0, 6, 0], sizes = [1, 16, 16], strides = [1, 1, 1]} : vector<1x22x16xf32> to vector<1x16x16xf32>
      %526 = vector.broadcast %523 : f32 to vector<1x16x16xf32>
      %527 = arith.mulf %526, %525 : vector<1x16x16xf32>
      %528 = vector.extract_strided_slice %462 {offsets = [0, 6, 0], sizes = [1, 16, 16], strides = [1, 1, 1]} : vector<1x22x16xf32> to vector<1x16x16xf32>
      %529 = vector.broadcast %524 : f32 to vector<1x16x16xf32>
      %530 = arith.mulf %529, %528 : vector<1x16x16xf32>
      %531 = arith.addf %527, %530 : vector<1x16x16xf32>
      %532 = arith.addf %512, %531 : vector<1x16x16xf32>
      %c0_406 = arith.constant 0 : index
      %c0_407 = arith.constant 0 : index
      %c3_408 = arith.constant 3 : index
      %533 = vector.load %arg8[%c0_406, %c0_407, %c3_408] : memref<1x22x22xf32, #tpu.memory_space<vmem>>, vector<1x22x16xf32>
      %c0_409 = arith.constant 0 : index
      %c0_410 = arith.constant 0 : index
      %c3_411 = arith.constant 3 : index
      %534 = vector.load %arg9[%c0_409, %c0_410, %c3_411] : memref<1x22x22xf32, #tpu.memory_space<vmem>>, vector<1x22x16xf32>
      %c3_412 = arith.constant 3 : index
      %535 = memref.load %arg2[%c3_412] : memref<98xf32, #tpu.memory_space<smem>>
      %c52 = arith.constant 52 : index
      %536 = memref.load %arg2[%c52] : memref<98xf32, #tpu.memory_space<smem>>
      %537 = vector.extract_strided_slice %533 {offsets = [0, 0, 0], sizes = [1, 16, 16], strides = [1, 1, 1]} : vector<1x22x16xf32> to vector<1x16x16xf32>
      %538 = vector.broadcast %535 : f32 to vector<1x16x16xf32>
      %539 = arith.mulf %538, %537 : vector<1x16x16xf32>
      %540 = vector.extract_strided_slice %534 {offsets = [0, 0, 0], sizes = [1, 16, 16], strides = [1, 1, 1]} : vector<1x22x16xf32> to vector<1x16x16xf32>
      %541 = vector.broadcast %536 : f32 to vector<1x16x16xf32>
      %542 = arith.mulf %541, %540 : vector<1x16x16xf32>
      %543 = arith.addf %539, %542 : vector<1x16x16xf32>
      %544 = arith.addf %522, %543 : vector<1x16x16xf32>
      %c10_413 = arith.constant 10 : index
      %545 = memref.load %arg2[%c10_413] : memref<98xf32, #tpu.memory_space<smem>>
      %c59 = arith.constant 59 : index
      %546 = memref.load %arg2[%c59] : memref<98xf32, #tpu.memory_space<smem>>
      %547 = vector.extract_strided_slice %533 {offsets = [0, 1, 0], sizes = [1, 16, 16], strides = [1, 1, 1]} : vector<1x22x16xf32> to vector<1x16x16xf32>
      %548 = vector.broadcast %545 : f32 to vector<1x16x16xf32>
      %549 = arith.mulf %548, %547 : vector<1x16x16xf32>
      %550 = vector.extract_strided_slice %534 {offsets = [0, 1, 0], sizes = [1, 16, 16], strides = [1, 1, 1]} : vector<1x22x16xf32> to vector<1x16x16xf32>
      %551 = vector.broadcast %546 : f32 to vector<1x16x16xf32>
      %552 = arith.mulf %551, %550 : vector<1x16x16xf32>
      %553 = arith.addf %549, %552 : vector<1x16x16xf32>
      %554 = arith.addf %532, %553 : vector<1x16x16xf32>
      %c17_414 = arith.constant 17 : index
      %555 = memref.load %arg2[%c17_414] : memref<98xf32, #tpu.memory_space<smem>>
      %c66 = arith.constant 66 : index
      %556 = memref.load %arg2[%c66] : memref<98xf32, #tpu.memory_space<smem>>
      %557 = vector.extract_strided_slice %533 {offsets = [0, 2, 0], sizes = [1, 16, 16], strides = [1, 1, 1]} : vector<1x22x16xf32> to vector<1x16x16xf32>
      %558 = vector.broadcast %555 : f32 to vector<1x16x16xf32>
      %559 = arith.mulf %558, %557 : vector<1x16x16xf32>
      %560 = vector.extract_strided_slice %534 {offsets = [0, 2, 0], sizes = [1, 16, 16], strides = [1, 1, 1]} : vector<1x22x16xf32> to vector<1x16x16xf32>
      %561 = vector.broadcast %556 : f32 to vector<1x16x16xf32>
      %562 = arith.mulf %561, %560 : vector<1x16x16xf32>
      %563 = arith.addf %559, %562 : vector<1x16x16xf32>
      %564 = arith.addf %544, %563 : vector<1x16x16xf32>
      %c24 = arith.constant 24 : index
      %565 = memref.load %arg2[%c24] : memref<98xf32, #tpu.memory_space<smem>>
      %c73 = arith.constant 73 : index
      %566 = memref.load %arg2[%c73] : memref<98xf32, #tpu.memory_space<smem>>
      %567 = vector.extract_strided_slice %533 {offsets = [0, 3, 0], sizes = [1, 16, 16], strides = [1, 1, 1]} : vector<1x22x16xf32> to vector<1x16x16xf32>
      %568 = vector.broadcast %565 : f32 to vector<1x16x16xf32>
      %569 = arith.mulf %568, %567 : vector<1x16x16xf32>
      %570 = vector.extract_strided_slice %534 {offsets = [0, 3, 0], sizes = [1, 16, 16], strides = [1, 1, 1]} : vector<1x22x16xf32> to vector<1x16x16xf32>
      %571 = vector.broadcast %566 : f32 to vector<1x16x16xf32>
      %572 = arith.mulf %571, %570 : vector<1x16x16xf32>
      %573 = arith.addf %569, %572 : vector<1x16x16xf32>
      %574 = arith.addf %554, %573 : vector<1x16x16xf32>
      %c31 = arith.constant 31 : index
      %575 = memref.load %arg2[%c31] : memref<98xf32, #tpu.memory_space<smem>>
      %c80_415 = arith.constant 80 : index
      %576 = memref.load %arg2[%c80_415] : memref<98xf32, #tpu.memory_space<smem>>
      %577 = vector.extract_strided_slice %533 {offsets = [0, 4, 0], sizes = [1, 16, 16], strides = [1, 1, 1]} : vector<1x22x16xf32> to vector<1x16x16xf32>
      %578 = vector.broadcast %575 : f32 to vector<1x16x16xf32>
      %579 = arith.mulf %578, %577 : vector<1x16x16xf32>
      %580 = vector.extract_strided_slice %534 {offsets = [0, 4, 0], sizes = [1, 16, 16], strides = [1, 1, 1]} : vector<1x22x16xf32> to vector<1x16x16xf32>
      %581 = vector.broadcast %576 : f32 to vector<1x16x16xf32>
      %582 = arith.mulf %581, %580 : vector<1x16x16xf32>
      %583 = arith.addf %579, %582 : vector<1x16x16xf32>
      %584 = arith.addf %564, %583 : vector<1x16x16xf32>
      %c38 = arith.constant 38 : index
      %585 = memref.load %arg2[%c38] : memref<98xf32, #tpu.memory_space<smem>>
      %c87 = arith.constant 87 : index
      %586 = memref.load %arg2[%c87] : memref<98xf32, #tpu.memory_space<smem>>
      %587 = vector.extract_strided_slice %533 {offsets = [0, 5, 0], sizes = [1, 16, 16], strides = [1, 1, 1]} : vector<1x22x16xf32> to vector<1x16x16xf32>
      %588 = vector.broadcast %585 : f32 to vector<1x16x16xf32>
      %589 = arith.mulf %588, %587 : vector<1x16x16xf32>
      %590 = vector.extract_strided_slice %534 {offsets = [0, 5, 0], sizes = [1, 16, 16], strides = [1, 1, 1]} : vector<1x22x16xf32> to vector<1x16x16xf32>
      %591 = vector.broadcast %586 : f32 to vector<1x16x16xf32>
      %592 = arith.mulf %591, %590 : vector<1x16x16xf32>
      %593 = arith.addf %589, %592 : vector<1x16x16xf32>
      %594 = arith.addf %574, %593 : vector<1x16x16xf32>
      %c45 = arith.constant 45 : index
      %595 = memref.load %arg2[%c45] : memref<98xf32, #tpu.memory_space<smem>>
      %c94 = arith.constant 94 : index
      %596 = memref.load %arg2[%c94] : memref<98xf32, #tpu.memory_space<smem>>
      %597 = vector.extract_strided_slice %533 {offsets = [0, 6, 0], sizes = [1, 16, 16], strides = [1, 1, 1]} : vector<1x22x16xf32> to vector<1x16x16xf32>
      %598 = vector.broadcast %595 : f32 to vector<1x16x16xf32>
      %599 = arith.mulf %598, %597 : vector<1x16x16xf32>
      %600 = vector.extract_strided_slice %534 {offsets = [0, 6, 0], sizes = [1, 16, 16], strides = [1, 1, 1]} : vector<1x22x16xf32> to vector<1x16x16xf32>
      %601 = vector.broadcast %596 : f32 to vector<1x16x16xf32>
      %602 = arith.mulf %601, %600 : vector<1x16x16xf32>
      %603 = arith.addf %599, %602 : vector<1x16x16xf32>
      %604 = arith.addf %584, %603 : vector<1x16x16xf32>
      %c0_416 = arith.constant 0 : index
      %c0_417 = arith.constant 0 : index
      %c4_418 = arith.constant 4 : index
      %605 = vector.load %arg8[%c0_416, %c0_417, %c4_418] : memref<1x22x22xf32, #tpu.memory_space<vmem>>, vector<1x22x16xf32>
      %c0_419 = arith.constant 0 : index
      %c0_420 = arith.constant 0 : index
      %c4_421 = arith.constant 4 : index
      %606 = vector.load %arg9[%c0_419, %c0_420, %c4_421] : memref<1x22x22xf32, #tpu.memory_space<vmem>>, vector<1x22x16xf32>
      %c4_422 = arith.constant 4 : index
      %607 = memref.load %arg2[%c4_422] : memref<98xf32, #tpu.memory_space<smem>>
      %c53 = arith.constant 53 : index
      %608 = memref.load %arg2[%c53] : memref<98xf32, #tpu.memory_space<smem>>
      %609 = vector.extract_strided_slice %605 {offsets = [0, 0, 0], sizes = [1, 16, 16], strides = [1, 1, 1]} : vector<1x22x16xf32> to vector<1x16x16xf32>
      %610 = vector.broadcast %607 : f32 to vector<1x16x16xf32>
      %611 = arith.mulf %610, %609 : vector<1x16x16xf32>
      %612 = vector.extract_strided_slice %606 {offsets = [0, 0, 0], sizes = [1, 16, 16], strides = [1, 1, 1]} : vector<1x22x16xf32> to vector<1x16x16xf32>
      %613 = vector.broadcast %608 : f32 to vector<1x16x16xf32>
      %614 = arith.mulf %613, %612 : vector<1x16x16xf32>
      %615 = arith.addf %611, %614 : vector<1x16x16xf32>
      %616 = arith.addf %594, %615 : vector<1x16x16xf32>
      %c11_423 = arith.constant 11 : index
      %617 = memref.load %arg2[%c11_423] : memref<98xf32, #tpu.memory_space<smem>>
      %c60 = arith.constant 60 : index
      %618 = memref.load %arg2[%c60] : memref<98xf32, #tpu.memory_space<smem>>
      %619 = vector.extract_strided_slice %605 {offsets = [0, 1, 0], sizes = [1, 16, 16], strides = [1, 1, 1]} : vector<1x22x16xf32> to vector<1x16x16xf32>
      %620 = vector.broadcast %617 : f32 to vector<1x16x16xf32>
      %621 = arith.mulf %620, %619 : vector<1x16x16xf32>
      %622 = vector.extract_strided_slice %606 {offsets = [0, 1, 0], sizes = [1, 16, 16], strides = [1, 1, 1]} : vector<1x22x16xf32> to vector<1x16x16xf32>
      %623 = vector.broadcast %618 : f32 to vector<1x16x16xf32>
      %624 = arith.mulf %623, %622 : vector<1x16x16xf32>
      %625 = arith.addf %621, %624 : vector<1x16x16xf32>
      %626 = arith.addf %604, %625 : vector<1x16x16xf32>
      %c18_424 = arith.constant 18 : index
      %627 = memref.load %arg2[%c18_424] : memref<98xf32, #tpu.memory_space<smem>>
      %c67 = arith.constant 67 : index
      %628 = memref.load %arg2[%c67] : memref<98xf32, #tpu.memory_space<smem>>
      %629 = vector.extract_strided_slice %605 {offsets = [0, 2, 0], sizes = [1, 16, 16], strides = [1, 1, 1]} : vector<1x22x16xf32> to vector<1x16x16xf32>
      %630 = vector.broadcast %627 : f32 to vector<1x16x16xf32>
      %631 = arith.mulf %630, %629 : vector<1x16x16xf32>
      %632 = vector.extract_strided_slice %606 {offsets = [0, 2, 0], sizes = [1, 16, 16], strides = [1, 1, 1]} : vector<1x22x16xf32> to vector<1x16x16xf32>
      %633 = vector.broadcast %628 : f32 to vector<1x16x16xf32>
      %634 = arith.mulf %633, %632 : vector<1x16x16xf32>
      %635 = arith.addf %631, %634 : vector<1x16x16xf32>
      %636 = arith.addf %616, %635 : vector<1x16x16xf32>
      %c25 = arith.constant 25 : index
      %637 = memref.load %arg2[%c25] : memref<98xf32, #tpu.memory_space<smem>>
      %c74 = arith.constant 74 : index
      %638 = memref.load %arg2[%c74] : memref<98xf32, #tpu.memory_space<smem>>
      %639 = vector.extract_strided_slice %605 {offsets = [0, 3, 0], sizes = [1, 16, 16], strides = [1, 1, 1]} : vector<1x22x16xf32> to vector<1x16x16xf32>
      %640 = vector.broadcast %637 : f32 to vector<1x16x16xf32>
      %641 = arith.mulf %640, %639 : vector<1x16x16xf32>
      %642 = vector.extract_strided_slice %606 {offsets = [0, 3, 0], sizes = [1, 16, 16], strides = [1, 1, 1]} : vector<1x22x16xf32> to vector<1x16x16xf32>
      %643 = vector.broadcast %638 : f32 to vector<1x16x16xf32>
      %644 = arith.mulf %643, %642 : vector<1x16x16xf32>
      %645 = arith.addf %641, %644 : vector<1x16x16xf32>
      %646 = arith.addf %626, %645 : vector<1x16x16xf32>
      %c32_425 = arith.constant 32 : index
      %647 = memref.load %arg2[%c32_425] : memref<98xf32, #tpu.memory_space<smem>>
      %c81 = arith.constant 81 : index
      %648 = memref.load %arg2[%c81] : memref<98xf32, #tpu.memory_space<smem>>
      %649 = vector.extract_strided_slice %605 {offsets = [0, 4, 0], sizes = [1, 16, 16], strides = [1, 1, 1]} : vector<1x22x16xf32> to vector<1x16x16xf32>
      %650 = vector.broadcast %647 : f32 to vector<1x16x16xf32>
      %651 = arith.mulf %650, %649 : vector<1x16x16xf32>
      %652 = vector.extract_strided_slice %606 {offsets = [0, 4, 0], sizes = [1, 16, 16], strides = [1, 1, 1]} : vector<1x22x16xf32> to vector<1x16x16xf32>
      %653 = vector.broadcast %648 : f32 to vector<1x16x16xf32>
      %654 = arith.mulf %653, %652 : vector<1x16x16xf32>
      %655 = arith.addf %651, %654 : vector<1x16x16xf32>
      %656 = arith.addf %636, %655 : vector<1x16x16xf32>
      %c39 = arith.constant 39 : index
      %657 = memref.load %arg2[%c39] : memref<98xf32, #tpu.memory_space<smem>>
      %c88 = arith.constant 88 : index
      %658 = memref.load %arg2[%c88] : memref<98xf32, #tpu.memory_space<smem>>
      %659 = vector.extract_strided_slice %605 {offsets = [0, 5, 0], sizes = [1, 16, 16], strides = [1, 1, 1]} : vector<1x22x16xf32> to vector<1x16x16xf32>
      %660 = vector.broadcast %657 : f32 to vector<1x16x16xf32>
      %661 = arith.mulf %660, %659 : vector<1x16x16xf32>
      %662 = vector.extract_strided_slice %606 {offsets = [0, 5, 0], sizes = [1, 16, 16], strides = [1, 1, 1]} : vector<1x22x16xf32> to vector<1x16x16xf32>
      %663 = vector.broadcast %658 : f32 to vector<1x16x16xf32>
      %664 = arith.mulf %663, %662 : vector<1x16x16xf32>
      %665 = arith.addf %661, %664 : vector<1x16x16xf32>
      %666 = arith.addf %646, %665 : vector<1x16x16xf32>
      %c46 = arith.constant 46 : index
      %667 = memref.load %arg2[%c46] : memref<98xf32, #tpu.memory_space<smem>>
      %c95 = arith.constant 95 : index
      %668 = memref.load %arg2[%c95] : memref<98xf32, #tpu.memory_space<smem>>
      %669 = vector.extract_strided_slice %605 {offsets = [0, 6, 0], sizes = [1, 16, 16], strides = [1, 1, 1]} : vector<1x22x16xf32> to vector<1x16x16xf32>
      %670 = vector.broadcast %667 : f32 to vector<1x16x16xf32>
      %671 = arith.mulf %670, %669 : vector<1x16x16xf32>
      %672 = vector.extract_strided_slice %606 {offsets = [0, 6, 0], sizes = [1, 16, 16], strides = [1, 1, 1]} : vector<1x22x16xf32> to vector<1x16x16xf32>
      %673 = vector.broadcast %668 : f32 to vector<1x16x16xf32>
      %674 = arith.mulf %673, %672 : vector<1x16x16xf32>
      %675 = arith.addf %671, %674 : vector<1x16x16xf32>
      %676 = arith.addf %656, %675 : vector<1x16x16xf32>
      %c0_426 = arith.constant 0 : index
      %c0_427 = arith.constant 0 : index
      %c5_428 = arith.constant 5 : index
      %677 = vector.load %arg8[%c0_426, %c0_427, %c5_428] : memref<1x22x22xf32, #tpu.memory_space<vmem>>, vector<1x22x16xf32>
      %c0_429 = arith.constant 0 : index
      %c0_430 = arith.constant 0 : index
      %c5_431 = arith.constant 5 : index
      %678 = vector.load %arg9[%c0_429, %c0_430, %c5_431] : memref<1x22x22xf32, #tpu.memory_space<vmem>>, vector<1x22x16xf32>
      %c5_432 = arith.constant 5 : index
      %679 = memref.load %arg2[%c5_432] : memref<98xf32, #tpu.memory_space<smem>>
      %c54 = arith.constant 54 : index
      %680 = memref.load %arg2[%c54] : memref<98xf32, #tpu.memory_space<smem>>
      %681 = vector.extract_strided_slice %677 {offsets = [0, 0, 0], sizes = [1, 16, 16], strides = [1, 1, 1]} : vector<1x22x16xf32> to vector<1x16x16xf32>
      %682 = vector.broadcast %679 : f32 to vector<1x16x16xf32>
      %683 = arith.mulf %682, %681 : vector<1x16x16xf32>
      %684 = vector.extract_strided_slice %678 {offsets = [0, 0, 0], sizes = [1, 16, 16], strides = [1, 1, 1]} : vector<1x22x16xf32> to vector<1x16x16xf32>
      %685 = vector.broadcast %680 : f32 to vector<1x16x16xf32>
      %686 = arith.mulf %685, %684 : vector<1x16x16xf32>
      %687 = arith.addf %683, %686 : vector<1x16x16xf32>
      %688 = arith.addf %666, %687 : vector<1x16x16xf32>
      %c12_433 = arith.constant 12 : index
      %689 = memref.load %arg2[%c12_433] : memref<98xf32, #tpu.memory_space<smem>>
      %c61 = arith.constant 61 : index
      %690 = memref.load %arg2[%c61] : memref<98xf32, #tpu.memory_space<smem>>
      %691 = vector.extract_strided_slice %677 {offsets = [0, 1, 0], sizes = [1, 16, 16], strides = [1, 1, 1]} : vector<1x22x16xf32> to vector<1x16x16xf32>
      %692 = vector.broadcast %689 : f32 to vector<1x16x16xf32>
      %693 = arith.mulf %692, %691 : vector<1x16x16xf32>
      %694 = vector.extract_strided_slice %678 {offsets = [0, 1, 0], sizes = [1, 16, 16], strides = [1, 1, 1]} : vector<1x22x16xf32> to vector<1x16x16xf32>
      %695 = vector.broadcast %690 : f32 to vector<1x16x16xf32>
      %696 = arith.mulf %695, %694 : vector<1x16x16xf32>
      %697 = arith.addf %693, %696 : vector<1x16x16xf32>
      %698 = arith.addf %676, %697 : vector<1x16x16xf32>
      %c19_434 = arith.constant 19 : index
      %699 = memref.load %arg2[%c19_434] : memref<98xf32, #tpu.memory_space<smem>>
      %c68 = arith.constant 68 : index
      %700 = memref.load %arg2[%c68] : memref<98xf32, #tpu.memory_space<smem>>
      %701 = vector.extract_strided_slice %677 {offsets = [0, 2, 0], sizes = [1, 16, 16], strides = [1, 1, 1]} : vector<1x22x16xf32> to vector<1x16x16xf32>
      %702 = vector.broadcast %699 : f32 to vector<1x16x16xf32>
      %703 = arith.mulf %702, %701 : vector<1x16x16xf32>
      %704 = vector.extract_strided_slice %678 {offsets = [0, 2, 0], sizes = [1, 16, 16], strides = [1, 1, 1]} : vector<1x22x16xf32> to vector<1x16x16xf32>
      %705 = vector.broadcast %700 : f32 to vector<1x16x16xf32>
      %706 = arith.mulf %705, %704 : vector<1x16x16xf32>
      %707 = arith.addf %703, %706 : vector<1x16x16xf32>
      %708 = arith.addf %688, %707 : vector<1x16x16xf32>
      %c26 = arith.constant 26 : index
      %709 = memref.load %arg2[%c26] : memref<98xf32, #tpu.memory_space<smem>>
      %c75 = arith.constant 75 : index
      %710 = memref.load %arg2[%c75] : memref<98xf32, #tpu.memory_space<smem>>
      %711 = vector.extract_strided_slice %677 {offsets = [0, 3, 0], sizes = [1, 16, 16], strides = [1, 1, 1]} : vector<1x22x16xf32> to vector<1x16x16xf32>
      %712 = vector.broadcast %709 : f32 to vector<1x16x16xf32>
      %713 = arith.mulf %712, %711 : vector<1x16x16xf32>
      %714 = vector.extract_strided_slice %678 {offsets = [0, 3, 0], sizes = [1, 16, 16], strides = [1, 1, 1]} : vector<1x22x16xf32> to vector<1x16x16xf32>
      %715 = vector.broadcast %710 : f32 to vector<1x16x16xf32>
      %716 = arith.mulf %715, %714 : vector<1x16x16xf32>
      %717 = arith.addf %713, %716 : vector<1x16x16xf32>
      %718 = arith.addf %698, %717 : vector<1x16x16xf32>
      %c33 = arith.constant 33 : index
      %719 = memref.load %arg2[%c33] : memref<98xf32, #tpu.memory_space<smem>>
      %c82 = arith.constant 82 : index
      %720 = memref.load %arg2[%c82] : memref<98xf32, #tpu.memory_space<smem>>
      %721 = vector.extract_strided_slice %677 {offsets = [0, 4, 0], sizes = [1, 16, 16], strides = [1, 1, 1]} : vector<1x22x16xf32> to vector<1x16x16xf32>
      %722 = vector.broadcast %719 : f32 to vector<1x16x16xf32>
      %723 = arith.mulf %722, %721 : vector<1x16x16xf32>
      %724 = vector.extract_strided_slice %678 {offsets = [0, 4, 0], sizes = [1, 16, 16], strides = [1, 1, 1]} : vector<1x22x16xf32> to vector<1x16x16xf32>
      %725 = vector.broadcast %720 : f32 to vector<1x16x16xf32>
      %726 = arith.mulf %725, %724 : vector<1x16x16xf32>
      %727 = arith.addf %723, %726 : vector<1x16x16xf32>
      %728 = arith.addf %708, %727 : vector<1x16x16xf32>
      %c40 = arith.constant 40 : index
      %729 = memref.load %arg2[%c40] : memref<98xf32, #tpu.memory_space<smem>>
      %c89 = arith.constant 89 : index
      %730 = memref.load %arg2[%c89] : memref<98xf32, #tpu.memory_space<smem>>
      %731 = vector.extract_strided_slice %677 {offsets = [0, 5, 0], sizes = [1, 16, 16], strides = [1, 1, 1]} : vector<1x22x16xf32> to vector<1x16x16xf32>
      %732 = vector.broadcast %729 : f32 to vector<1x16x16xf32>
      %733 = arith.mulf %732, %731 : vector<1x16x16xf32>
      %734 = vector.extract_strided_slice %678 {offsets = [0, 5, 0], sizes = [1, 16, 16], strides = [1, 1, 1]} : vector<1x22x16xf32> to vector<1x16x16xf32>
      %735 = vector.broadcast %730 : f32 to vector<1x16x16xf32>
      %736 = arith.mulf %735, %734 : vector<1x16x16xf32>
      %737 = arith.addf %733, %736 : vector<1x16x16xf32>
      %738 = arith.addf %718, %737 : vector<1x16x16xf32>
      %c47 = arith.constant 47 : index
      %739 = memref.load %arg2[%c47] : memref<98xf32, #tpu.memory_space<smem>>
      %c96_435 = arith.constant 96 : index
      %740 = memref.load %arg2[%c96_435] : memref<98xf32, #tpu.memory_space<smem>>
      %741 = vector.extract_strided_slice %677 {offsets = [0, 6, 0], sizes = [1, 16, 16], strides = [1, 1, 1]} : vector<1x22x16xf32> to vector<1x16x16xf32>
      %742 = vector.broadcast %739 : f32 to vector<1x16x16xf32>
      %743 = arith.mulf %742, %741 : vector<1x16x16xf32>
      %744 = vector.extract_strided_slice %678 {offsets = [0, 6, 0], sizes = [1, 16, 16], strides = [1, 1, 1]} : vector<1x22x16xf32> to vector<1x16x16xf32>
      %745 = vector.broadcast %740 : f32 to vector<1x16x16xf32>
      %746 = arith.mulf %745, %744 : vector<1x16x16xf32>
      %747 = arith.addf %743, %746 : vector<1x16x16xf32>
      %748 = arith.addf %728, %747 : vector<1x16x16xf32>
      %c0_436 = arith.constant 0 : index
      %c0_437 = arith.constant 0 : index
      %c6_438 = arith.constant 6 : index
      %749 = vector.load %arg8[%c0_436, %c0_437, %c6_438] : memref<1x22x22xf32, #tpu.memory_space<vmem>>, vector<1x22x16xf32>
      %c0_439 = arith.constant 0 : index
      %c0_440 = arith.constant 0 : index
      %c6_441 = arith.constant 6 : index
      %750 = vector.load %arg9[%c0_439, %c0_440, %c6_441] : memref<1x22x22xf32, #tpu.memory_space<vmem>>, vector<1x22x16xf32>
      %c6_442 = arith.constant 6 : index
      %751 = memref.load %arg2[%c6_442] : memref<98xf32, #tpu.memory_space<smem>>
      %c55 = arith.constant 55 : index
      %752 = memref.load %arg2[%c55] : memref<98xf32, #tpu.memory_space<smem>>
      %753 = vector.extract_strided_slice %749 {offsets = [0, 0, 0], sizes = [1, 16, 16], strides = [1, 1, 1]} : vector<1x22x16xf32> to vector<1x16x16xf32>
      %754 = vector.broadcast %751 : f32 to vector<1x16x16xf32>
      %755 = arith.mulf %754, %753 : vector<1x16x16xf32>
      %756 = vector.extract_strided_slice %750 {offsets = [0, 0, 0], sizes = [1, 16, 16], strides = [1, 1, 1]} : vector<1x22x16xf32> to vector<1x16x16xf32>
      %757 = vector.broadcast %752 : f32 to vector<1x16x16xf32>
      %758 = arith.mulf %757, %756 : vector<1x16x16xf32>
      %759 = arith.addf %755, %758 : vector<1x16x16xf32>
      %760 = arith.addf %738, %759 : vector<1x16x16xf32>
      %c13_443 = arith.constant 13 : index
      %761 = memref.load %arg2[%c13_443] : memref<98xf32, #tpu.memory_space<smem>>
      %c62 = arith.constant 62 : index
      %762 = memref.load %arg2[%c62] : memref<98xf32, #tpu.memory_space<smem>>
      %763 = vector.extract_strided_slice %749 {offsets = [0, 1, 0], sizes = [1, 16, 16], strides = [1, 1, 1]} : vector<1x22x16xf32> to vector<1x16x16xf32>
      %764 = vector.broadcast %761 : f32 to vector<1x16x16xf32>
      %765 = arith.mulf %764, %763 : vector<1x16x16xf32>
      %766 = vector.extract_strided_slice %750 {offsets = [0, 1, 0], sizes = [1, 16, 16], strides = [1, 1, 1]} : vector<1x22x16xf32> to vector<1x16x16xf32>
      %767 = vector.broadcast %762 : f32 to vector<1x16x16xf32>
      %768 = arith.mulf %767, %766 : vector<1x16x16xf32>
      %769 = arith.addf %765, %768 : vector<1x16x16xf32>
      %770 = arith.addf %748, %769 : vector<1x16x16xf32>
      %c20_444 = arith.constant 20 : index
      %771 = memref.load %arg2[%c20_444] : memref<98xf32, #tpu.memory_space<smem>>
      %c69 = arith.constant 69 : index
      %772 = memref.load %arg2[%c69] : memref<98xf32, #tpu.memory_space<smem>>
      %773 = vector.extract_strided_slice %749 {offsets = [0, 2, 0], sizes = [1, 16, 16], strides = [1, 1, 1]} : vector<1x22x16xf32> to vector<1x16x16xf32>
      %774 = vector.broadcast %771 : f32 to vector<1x16x16xf32>
      %775 = arith.mulf %774, %773 : vector<1x16x16xf32>
      %776 = vector.extract_strided_slice %750 {offsets = [0, 2, 0], sizes = [1, 16, 16], strides = [1, 1, 1]} : vector<1x22x16xf32> to vector<1x16x16xf32>
      %777 = vector.broadcast %772 : f32 to vector<1x16x16xf32>
      %778 = arith.mulf %777, %776 : vector<1x16x16xf32>
      %779 = arith.addf %775, %778 : vector<1x16x16xf32>
      %780 = arith.addf %760, %779 : vector<1x16x16xf32>
      %c27 = arith.constant 27 : index
      %781 = memref.load %arg2[%c27] : memref<98xf32, #tpu.memory_space<smem>>
      %c76 = arith.constant 76 : index
      %782 = memref.load %arg2[%c76] : memref<98xf32, #tpu.memory_space<smem>>
      %783 = vector.extract_strided_slice %749 {offsets = [0, 3, 0], sizes = [1, 16, 16], strides = [1, 1, 1]} : vector<1x22x16xf32> to vector<1x16x16xf32>
      %784 = vector.broadcast %781 : f32 to vector<1x16x16xf32>
      %785 = arith.mulf %784, %783 : vector<1x16x16xf32>
      %786 = vector.extract_strided_slice %750 {offsets = [0, 3, 0], sizes = [1, 16, 16], strides = [1, 1, 1]} : vector<1x22x16xf32> to vector<1x16x16xf32>
      %787 = vector.broadcast %782 : f32 to vector<1x16x16xf32>
      %788 = arith.mulf %787, %786 : vector<1x16x16xf32>
      %789 = arith.addf %785, %788 : vector<1x16x16xf32>
      %790 = arith.addf %770, %789 : vector<1x16x16xf32>
      %c34 = arith.constant 34 : index
      %791 = memref.load %arg2[%c34] : memref<98xf32, #tpu.memory_space<smem>>
      %c83 = arith.constant 83 : index
      %792 = memref.load %arg2[%c83] : memref<98xf32, #tpu.memory_space<smem>>
      %793 = vector.extract_strided_slice %749 {offsets = [0, 4, 0], sizes = [1, 16, 16], strides = [1, 1, 1]} : vector<1x22x16xf32> to vector<1x16x16xf32>
      %794 = vector.broadcast %791 : f32 to vector<1x16x16xf32>
      %795 = arith.mulf %794, %793 : vector<1x16x16xf32>
      %796 = vector.extract_strided_slice %750 {offsets = [0, 4, 0], sizes = [1, 16, 16], strides = [1, 1, 1]} : vector<1x22x16xf32> to vector<1x16x16xf32>
      %797 = vector.broadcast %792 : f32 to vector<1x16x16xf32>
      %798 = arith.mulf %797, %796 : vector<1x16x16xf32>
      %799 = arith.addf %795, %798 : vector<1x16x16xf32>
      %800 = arith.addf %780, %799 : vector<1x16x16xf32>
      %c41 = arith.constant 41 : index
      %801 = memref.load %arg2[%c41] : memref<98xf32, #tpu.memory_space<smem>>
      %c90 = arith.constant 90 : index
      %802 = memref.load %arg2[%c90] : memref<98xf32, #tpu.memory_space<smem>>
      %803 = vector.extract_strided_slice %749 {offsets = [0, 5, 0], sizes = [1, 16, 16], strides = [1, 1, 1]} : vector<1x22x16xf32> to vector<1x16x16xf32>
      %804 = vector.broadcast %801 : f32 to vector<1x16x16xf32>
      %805 = arith.mulf %804, %803 : vector<1x16x16xf32>
      %806 = vector.extract_strided_slice %750 {offsets = [0, 5, 0], sizes = [1, 16, 16], strides = [1, 1, 1]} : vector<1x22x16xf32> to vector<1x16x16xf32>
      %807 = vector.broadcast %802 : f32 to vector<1x16x16xf32>
      %808 = arith.mulf %807, %806 : vector<1x16x16xf32>
      %809 = arith.addf %805, %808 : vector<1x16x16xf32>
      %810 = arith.addf %790, %809 : vector<1x16x16xf32>
      %c48_445 = arith.constant 48 : index
      %811 = memref.load %arg2[%c48_445] : memref<98xf32, #tpu.memory_space<smem>>
      %c97 = arith.constant 97 : index
      %812 = memref.load %arg2[%c97] : memref<98xf32, #tpu.memory_space<smem>>
      %813 = vector.extract_strided_slice %749 {offsets = [0, 6, 0], sizes = [1, 16, 16], strides = [1, 1, 1]} : vector<1x22x16xf32> to vector<1x16x16xf32>
      %814 = vector.broadcast %811 : f32 to vector<1x16x16xf32>
      %815 = arith.mulf %814, %813 : vector<1x16x16xf32>
      %816 = vector.extract_strided_slice %750 {offsets = [0, 6, 0], sizes = [1, 16, 16], strides = [1, 1, 1]} : vector<1x22x16xf32> to vector<1x16x16xf32>
      %817 = vector.broadcast %812 : f32 to vector<1x16x16xf32>
      %818 = arith.mulf %817, %816 : vector<1x16x16xf32>
      %819 = arith.addf %815, %818 : vector<1x16x16xf32>
      %820 = arith.addf %800, %819 : vector<1x16x16xf32>
      %821 = arith.addf %820, %810 : vector<1x16x16xf32>
      %c0_446 = arith.constant 0 : index
      %c0_447 = arith.constant 0 : index
      %c0_448 = arith.constant 0 : index
      %c0_449 = arith.constant 0 : index
      %822 = vector.load %arg5[%c0_446, %c0_447, %c0_448, %c0_449] : memref<1x1x16x16xf32, #tpu.memory_space<vmem>>, vector<1x1x16x16xf32>
      %823 = vector.shape_cast %822 : vector<1x1x16x16xf32> to vector<1x16x16xf32>
      %824 = vector.shape_cast %821 : vector<1x16x16xf32> to vector<1x1x16x16xf32>
      tpu.vector_store %arg5[%c0_446, %c0_447, %c0_448, %c0_449], %824 {strides = array<i32>} : memref<1x1x16x16xf32, #tpu.memory_space<vmem>>, vector<1x1x16x16xf32>,
    } else {
    }
    return
  }
  func.func @transform_0(%arg0: i32, %arg1: i32) -> i32 {
    %c0_i32 = arith.constant 0 : i32
    %c0_i32_0 = arith.constant 0 : i32
    return %c0_i32 : i32
  }
  func.func @transform_1(%arg0: i32, %arg1: i32) -> i32 {
    %c0_i32 = arith.constant 0 : i32
    %c0_i32_0 = arith.constant 0 : i32
    return %c0_i32 : i32
  }
  func.func @transform_2(%arg0: i32, %arg1: i32) -> (i32, i32, i32) {
    %c0_i32 = arith.constant 0 : i32
    %c0_i32_0 = arith.constant 0 : i32
    return %arg0, %arg1, %c0_i32 : i32, i32, i32
  }
  func.func @transform_3(%arg0: i32, %arg1: i32) -> (i32, i32, i32, i32) {
    %c0_i32 = arith.constant 0 : i32
    %c0_i32_0 = arith.constant 0 : i32
    %c0_i32_1 = arith.constant 0 : i32
    %c0_i32_2 = arith.constant 0 : i32
    return %arg0, %c0_i32, %c0_i32_0, %c0_i32_1 : i32, i32, i32, i32
  }
}

</mosaic_0001>

<bundles_post_ra>
// kernel: tpu_custom_call.1
= control target key start
LH: loop header
LB: loop body
LE: loop exit
PB: predicated region body
PF: predicated region fallthrough
CT: control target
= control target key end

     0   :  { %s4671_s0 = inlined_call_operand.vmem [shape: f32[98], index: 0, kind: input, shape index: {}]   ;;  %s4672_s1 = inlined_call_operand.<no memory space> [shape: f32[1], index: 1, kind: input, shape index: {}]   ;;  %s4673_s2 = inlined_call_operand.hbm [shape: f32[2,4,256], index: 2, kind: input, shape index: {}]   ;;  %s4674_s3 = inlined_call_operand.hbm [shape: f32[2,1,16,16], index: 3, kind: output, shape index: {}]  }
   0x1   :  { %4742 = sst [smem:[#allocation62_spill]] %s4671_s0 }
   0x2   :  { %4743 = sst [smem:[#allocation63_spill]] %s4673_s2 }
   0x3   :  { %8 = sst [smem:[#allocation6]] %s4672_s1 }
   0x4   :  { %9 = vsyncpa [#allocation10], 0 }
   0x5   :  { %10 = vsyncpa [#allocation8], 0 }
   0x6   :  { %12 = vsyncpa [#allocation8 + $0x1], 0 }
   0x7   :  { %13 = vsyncpa [#allocation9], 0 }
   0x8   :  { %15 = vsyncpa [#allocation9 + $0x1], 0  ;;  %s2740_s14 = smov 0   ;;  %s2742_s15 = smov 0  }
   0x9   :  { %s2744_s16 = smov 0   ;;  %s2746_s17 = smov 0  }
   0xa   :  { %s2748_s18 = smov 0   ;;  %s2750_s19 = smov 0  }
   0xb LB: > { %s2343_s1 = sadd.s32 4294967295, %s2691_s19   ;;  %s2344_s20 = sadd.s32 4294967294, %s2691_s19   ;;  %s2691_s19 = sphi %s2750_s19, %s21_s19   ;;  %s2687_s18 = sphi %s2748_s18, %s4899_s18   ;;  %s2683_s17 = sphi %s2746_s17, %s4898_s17   ;;  %s2679_s16 = sphi %s2744_s16, %s4897_s16   ;;  %s2675_s15 = sphi %s2742_s15, %s4896_s15   ;;  %s2671_s14 = sphi %s2740_s14, %s4895_s14  }
   0xc   : > { %p97_p0 = scmp.ne.s32.totalorder %s2675_s15, %s2671_s14  ;;  %p2774_p1 = scmp.eq.s32.totalorder %s2343_s1, 0 }
   0xd   : > { %p2778_p2 = scmp.eq.s32.totalorder %s2343_s1, 1  ;;  %p127_p3 = scmp.eq.s32.totalorder %s2344_s20, 1 }
   0xe   : > { %s4744_s21 = scalar_select %p2774_p1, 1, 0 }
   0xf   : > { %p2784_p4 = por %p2774_p1, %p97_p0  ;;  %p2345_p5 = scmp.ge.s32.totalorder %s2691_s19, 1 }
  0x10   : > { %p2789_p6 = por %p127_p3, %p97_p0  ;;  %p134_p7 = scmp.lt.s32.totalorder %s2691_s19, 3 }
  0x11   : > { %s4746_s23 = scalar_select %p2784_p4, 1, 0 }
  0x12   : > { %s4747_s24 = scalar_select %p2789_p6, 1, 0 }
  0x13   : > { %s4748_s0 = sld [smem:[#allocation62_spill]]  ;;  %p2797_p8 = pnand %p2345_p5, %p134_p7 }
  0x14   : > { %s33_s30 = sadd.s32 1, %s2687_s18  ;;  %s84_s4 = sadd.s32 1, %s2679_s16 }
  0x15   : > { %p2467_p10 = pneg %p2797_p8  ;;  %p35_p12 = scmp.ge.s32.totalorder %s33_s30, 2 }
  0x17   : > { %p2806_p11 = pnand %p2467_p10, %p2774_p1 }
  0x19   : > { %s147_s27 = sshll.u32 %s4748_s0, 4  ;;  %p2562_p0 = pneg %p2806_p11  ;;  %s148_s27 = int_to_ptr.vmem [resolvable:$true] %s147_s27 }
  0x1a   : > { %s2560_s5 = scalar_lea.vmem %s148_s27, 16  ;;  %p2568_p7 = scmp.lt.s32.totalorder %s148_s27, %s148_s27 }
  0x1b   : > { %p2561_p13 = scmp.ne.s32.totalorder %s148_s27, %s2560_s5  ;;  %p2569_p6 = scmp.lt.s32.totalorder %s2560_s5, %s2560_s5 }
  0x1d   : > { %p2563_p3 = pnand %p2562_p0, %p2561_p13  ;;  %p2570_p9 = por %p2569_p6, %p2568_p7 }
  0x1f   : > { %p2564_p5 = pneg %p2563_p3 }
  0x21   : > { %p2571_p4 = pnand %p2570_p9, %p2564_p5 }
  0x23   : > { %2574 = shalt.err (!%p2571_p4)
}
  0x24   : > { %s2693_s6 = smov [#allocation7]   ;;  %s4901_s30 = smov (%p35_p12, %s33_s30), 0 }
  0x25   : > { %2470 = dma.vmem_to_smem (!%p2806_p11), %s148_s27, 16, %s2693_s6, [#allocation10]  }
  0x26   : > { %p91_p10 = scmp.ne.s32.totalorder %s2679_s16, %s2675_s15  ;;  %p92_p6 = scmp.eq.s32.totalorder %s2691_s19, 0 }
  0x27   : > { %s79_s7 = ssub.s32 %s2687_s18, %s4901_s30  ;;  %p2480_p4 = scmp.lt.s32.totalorder %s2691_s19, 2 }
  0x28   : > { %p82_p9 = scmp.eq.s32.totalorder %s79_s7, 0  ;;  %p93_p13 = por %p92_p6, %p91_p10 }
  0x29   : > { %p2826_p0 = por %p2778_p2, %p91_p10  ;;  %s161_s9 = sand.u32 1, %s2679_s16  }
  0x2a   : > { %s2832_s10 = scalar_select %p82_p9, %s2679_s16, %s84_s4  }
  0x2b   : > { %s4751_s8 = scalar_select %p2826_p0, 1, 0 }
  0x2c   : > { %s2348_s11 = sshll.u32 %s161_s9, 3  ;;  %s2457_s12 = sshll.u32 %s2687_s18, 7 }
  0x2d   : > { %s4752_s2 = sld [smem:[#allocation63_spill]]  ;;  %s165_s25 = scalar_lea.vmem [#allocation11], %s2348_s11 }
  0x2e   : > { %s175_s22 = sshll.u32 %s165_s25, 4  ;;  %p2842_p2 = pnand %p2480_p4, %p93_p13  ;;  %s2840_s22 = int_to_ptr.vmem [resolvable:$true] %s175_s22 }
  0x2f   : > { %s162_s27 = scalar_lea.sflag [#allocation8], %s161_s9 }
  0x30   : > { %p2577_p12 = pneg %p2842_p2 }
  0x33   : > { %s2838_s20 = scalar_lea.hbm %s4752_s2, %s2457_s12  ;;  %s2580_s6 = scalar_lea.hbm %s4752_s2, 256 }
  0x34   : > { %s2575_s29 = scalar_lea.hbm %s2838_s20, 128  ;;  %p2581_p7 = scmp.lt.u32.totalorder %s2838_s20, %s4752_s2 }
  0x35   : > { %p2576_p11 = scmp.ne.s32.totalorder %s2838_s20, %s2575_s29  ;;  %p2582_p10 = scmp.lt.u32.totalorder %s2580_s6, %s2575_s29 }
  0x36   : > { %p2584_p4 = scmp.lt.u32.totalorder %s2575_s29, %s2838_s20 }
  0x37   : > { %p2578_p3 = pnand %p2577_p12, %p2576_p11  ;;  %p2583_p6 = por %p2582_p10, %p2581_p7 }
  0x39   : > { %p2579_p5 = pneg %p2578_p3  ;;  %p2585_p9 = por %p2584_p4, %p2583_p6 }
  0x3b   : > { %p2586_p13 = pnand %p2585_p9, %p2579_p5 }
  0x3d   : > { %2589 = shalt.err (!%p2586_p13)
}
  0x3e   : > { %s2590_s9 = scalar_lea.vmem %s2840_s22, 128  ;;  %s2694_s12 = smov [#allocation11]  }
  0x3f   : > { %p2591_p11 = scmp.ne.s32.totalorder %s2840_s22, %s2590_s9  ;;  %s2595_s13 = sshll.u32 %s2694_s12, 4  ;;  %s2596_s13 = int_to_ptr.vmem [resolvable:$false] %s2595_s13 }
  0x40   : > { %s2597_s1 = scalar_lea.vmem %s2596_s13, 256  ;;  %p2598_p1 = scmp.lt.s32.totalorder %s2840_s22, %s2596_s13 }
  0x41   : > { %p2593_p3 = pnand %p2591_p11, %p2577_p12  ;;  %p2599_p7 = scmp.lt.s32.totalorder %s2597_s1, %s2590_s9 }
  0x43   : > { %p2594_p0 = pneg %p2593_p3  ;;  %p2600_p10 = por %p2599_p7, %p2598_p1 }
  0x45   : > { %p2601_p6 = pnand %p2600_p10, %p2594_p0 }
  0x47   : > { %2604 = shalt.err (!%p2601_p6)
}
  0x48   : > { %2474 = dma.hbm_to_vmem [thread:$0]  (!%p2842_p2), %s2838_s20, 128, %s2840_s22, %s162_s27  }
  0x49   : > { %184 = sbr.rel (%p2797_p8) target bundleno = 1423 (0x58f), region = 32 }
  0x50   : > { %p4754_p12 = scmp.ne.s32.totalorder %s4744_s21, 0 }
  0x52   : > { %2658 = dma.done.wait (%p4754_p12), [#allocation10], 16  }
  0x53   : > { %2660 = vsyncadd (%p4754_p12), [#allocation10], 4294967280  ;;  %s2878_s25 = sand.u32 1, %s2675_s15   ;;  %p4755_p1 = scmp.ne.s32.totalorder %s4746_s23, 0 }
  0x54   : > { %s2353_s29 = sshll.u32 %s2878_s25, 3  ;;  %s191_s26 = scalar_lea.sflag [#allocation8], %s2878_s25 }
  0x55   : > { %s194_s4 = scalar_lea.vmem [#allocation11], %s2353_s29 }
  0x56   : > { %2662 = dma.done.wait (%p4755_p1), %s191_s26, 128  }
  0x57   : > { %2664 = vsyncadd (%p4755_p1), %s191_s26, 4294967168 }
  0x58   : > { %199 = sfence }
  0x59   : > { %v2695_v0 = vmov 0.0   ;;  %v2696_v1 = vmov -inf   ;;  %v240_v2 = vld [vmem:[%s194_s4] sm:$0xff]  ;;  %v303_v30 = vlaneseq  ;;  %s2697_s21 = smov 115   ;;  %s2698_s23 = smov 3   ;;  %vm316_vm1 = vcmask 147480  }
  0x5a   : > { %222 = vst [vmem:[#allocation2] sm:$0xff] %v2695_v0  ;;  %223 = vst [vmem:[#allocation2 + $0x8] sm:$0xff] %v2695_v0  ;;  %v244_v3 = vcombine.high %v240_v2, %v240_v2  ;;  %s2699_s28 = smov 99   ;;  %s2700_s20 = smov 83   ;;  %vm591_vm2 = vcmask 23568   ;;  %vm594_vm3 = vcmask 21520  }
  0x5b   : > { %224 = vst [vmem:[#allocation3] sm:$0xff] %v2696_v1  ;;  %225 = vst [vmem:[#allocation3 + $0x8] sm:$0xff] %v2696_v1  ;;  %vm305_vm0 = vcmp.lt.s32.totalorder %v303_v30, 256  ;;  %s2701_s22 = smov 67   ;;  %s2702_s27 = smov 51   ;;  %vm629_vm4 = vcmask 162968  }
  0x5c   : > { %s2703_s5 = smov 35   ;;  %s2704_s6 = smov 19   ;;  %vm632_vm5 = vcmask 160920   ;;  %vm667_vm6 = vcmask 15368   ;;  %vm670_vm7 = vcmask 13320   ;;  %vm705_vm8 = vcmask 171168  }
  0x5d   : > { %s4719_s7 = smov 126   ;;  %s2706_s11 = smov 2   ;;  %vm708_vm9 = vcmask 169120   ;;  %vm743_vm10 = vcmask 7168   ;;  %vm746_vm11 = vcmask 5120   ;;  %vm781_vm12 = vcmask 179368  }
  0x5e   : > { %s4714_s9 = smov 124   ;;  %s2708_s12 = smov 4   ;;  %vm784_vm13 = vcmask 177320   ;;  %vm984_vm14 = vcmask 1040384   ;;  %vm909_vm15 = vcmask 1043456  }
  0x5f   : > { %s4710_s13 = smov 122   ;;  %s2710_s1 = smov 6  }
  0x60   : > { %s2986_s29 = sld [smem:[#allocation7 + $0x33]]  ;;  %s2988_s26 = sld [smem:[#allocation7 + $0x2]] }
  0x61   : > { %v241_v4 = vld [vmem:[#allocation2] sm:$0xf]  ;;  %v242_v5 = vld [vmem:[#allocation2 + $0x8] sm:$0xf]  ;;  %s2385_s4 = sld [smem:[#allocation7 + $0x3a]]  ;;  %s3830_s0 = sld [smem:[#allocation7 + $0x4b]] }
  0x62   : > { %v250_v6 = vld [vmem:[#allocation3] sm:$0xf]  ;;  %v246_v7 = vadd.f32 %v241_v4, %v240_v2  ;;  %v247_v8 = vadd.f32 %v244_v3, %v242_v5  ;;  %v251_v10 = vld [vmem:[#allocation3 + $0x8] sm:$0xf]  ;;  %s3832_s2 = sld [smem:[#allocation7 + $0x2a]]  ;;  %p4892_p0 = scmp.ne.s32.totalorder %s4751_s8, 0 }
  0x63   : > { %v252_v9 = vmax.f32 %v250_v6, %v240_v2  ;;  %v253_v11 = vmax.f32 %v251_v10, %v244_v3  ;;  %v280_v20 = vld [vmem:[#allocation2 + $0x4] ss:$8 sm:$0x3]  ;;  %v286_v25 = vld [vmem:[#allocation2 + $0x5] ss:$8 sm:$0x3] }
  0x64   : > { %248 = vst [vmem:[#allocation2] sm:$0xf] %v246_v7  ;;  %249 = vst [vmem:[#allocation2 + $0x8] sm:$0xf] %v247_v8 }
  0x65   : > { %254 = vst [vmem:[#allocation3] sm:$0xf] %v252_v9  ;;  %255 = vst [vmem:[#allocation3 + $0x8] sm:$0xf] %v253_v11 }
  0x66   : > { %v283_v28 = vld [vmem:[#allocation3 + $0x4] ss:$8 sm:$0x3]  ;;  %v292_v29 = vld [vmem:[#allocation2 + $0x6] ss:$8 sm:$0x3] }
  0x67   : > { %v289_v33 = vld [vmem:[#allocation3 + $0x5] ss:$8 sm:$0x3]  ;;  %v298_v34 = vld [vmem:[#allocation2 + $0x7] ss:$8 sm:$0x3] }
  0x68   : > { %v295_v37 = vld [vmem:[#allocation3 + $0x6] ss:$8 sm:$0x3]  ;;  %v301_v40 = vld [vmem:[#allocation3 + $0x7] ss:$8 sm:$0x3] }
  0x6b   : > { %v259_v12 = vld [vmem:[#allocation2] ss:$8 sm:$0x3]  ;;  %v262_v13 = vld [vmem:[#allocation2 + $0x1] ss:$8 sm:$0x3] }
  0x6c   : > { %v263_v14 = vadd.f32 %v262_v13, %v259_v12  ;;  %v268_v15 = vld [vmem:[#allocation2 + $0x2] ss:$8 sm:$0x3]  ;;  %v274_v16 = vld [vmem:[#allocation2 + $0x3] ss:$8 sm:$0x3] }
  0x6d   : > { %v260_v18 = vld [vmem:[#allocation3] ss:$8 sm:$0x3]  ;;  %v265_v19 = vld [vmem:[#allocation3 + $0x1] ss:$8 sm:$0x3] }
  0x6e   : > { %v269_v17 = vadd.f32 %v268_v15, %v263_v14  ;;  %v266_v21 = vmax.f32 %v260_v18, %v265_v19  ;;  %v271_v22 = vld [vmem:[#allocation3 + $0x2] ss:$8 sm:$0x3]  ;;  %v277_v24 = vld [vmem:[#allocation3 + $0x3] ss:$8 sm:$0x3] }
  0x70   : > { %v275_v23 = vadd.f32 %v274_v16, %v269_v17  ;;  %v272_v26 = vmax.f32 %v266_v21, %v271_v22 }
  0x72   : > { %v281_v27 = vadd.f32 %v280_v20, %v275_v23  ;;  %v278_v31 = vmax.f32 %v272_v26, %v277_v24 }
  0x74   : > { %v287_v32 = vadd.f32 %v286_v25, %v281_v27  ;;  %v284_v35 = vmax.f32 %v278_v31, %v283_v28 }
  0x76   : > { %v293_v36 = vadd.f32 %v292_v29, %v287_v32  ;;  %v290_v38 = vmax.f32 %v284_v35, %v289_v33 }
  0x78   : > { %v299_v39 = vadd.f32 %v298_v34, %v293_v36  ;;  %v296_v41 = vmax.f32 %v290_v38, %v295_v37 }
  0x7a   : > { %307 = vst.msk [vmem:[#allocation2] ss:$8 sm:$0x3] %vm305_vm0, %v299_v39  ;;  %v302_v42 = vmax.f32 %v296_v41, %v301_v40 }
  0x7c   : > { %309 = vst.msk [vmem:[#allocation3] ss:$8 sm:$0x3] %vm305_vm0, %v302_v42  ;;  %vm1016_vm0 = vcmask 1046528  }
  0x81   : > { %v324_v43 = vld [vmem:[#allocation2] ss:$0 sm:$0xff]  ;;  %v408_v46 = vld [vmem:[#allocation2 + $0x8] ss:$0 sm:$0xff] }
  0x82   : > { %326 = vrot.lane.b32.xlu1 %v324_v43, %s2697_s21  ;;  %313 = vrot.lane.b32.xlu0 %v324_v43, %s2698_s23 }
  0x83   : > { %v330_v44 = vld [vmem:[#allocation3] ss:$0 sm:$0xff]  ;;  %v414_v45 = vld [vmem:[#allocation3 + $0x8] ss:$0 sm:$0xff] }
  0x86   : > { %332 = vrot.lane.b32.xlu1 %v330_v44, %s2697_s21  ;;  %320 = vrot.lane.b32.xlu0 %v330_v44, %s2698_s23 }
  0x8a   : > { %344 = vrot.lane.b32.xlu1 %v330_v44, %s2699_s28  ;;  %338 = vrot.lane.b32.xlu0 %v324_v43, %s2699_s28 }
  0x8e   : > { %356 = vrot.lane.b32.xlu1 %v330_v44, %s2700_s20  ;;  %350 = vrot.lane.b32.xlu0 %v324_v43, %s2700_s20 }
  0x92   : > { %368 = vrot.lane.b32.xlu1 %v330_v44, %s2701_s22  ;;  %362 = vrot.lane.b32.xlu0 %v324_v43, %s2701_s22 }
  0x96   : > { %380 = vrot.lane.b32.xlu1 %v330_v44, %s2702_s27  ;;  %374 = vrot.lane.b32.xlu0 %v324_v43, %s2702_s27 }
  0x9a   : > { %392 = vrot.lane.b32.xlu1 %v330_v44, %s2703_s5  ;;  %386 = vrot.lane.b32.xlu0 %v324_v43, %s2703_s5 }
  0x9e   : > { %404 = vrot.lane.b32.xlu1 %v330_v44, %s2704_s6  ;;  %398 = vrot.lane.b32.xlu0 %v324_v43, %s2704_s6 }
  0xa2   : > { %416 = vrot.lane.b32.xlu1 %v414_v45, %s2698_s23  ;;  %410 = vrot.lane.b32.xlu0 %v408_v46, %s2698_s23  ;;  %s2393_s23 = sld [smem:[#allocation7 + $0x56]] }
  0xa6   : > { %428 = vrot.lane.b32.xlu1 %v414_v45, %s2697_s21  ;;  %422 = vrot.lane.b32.xlu0 %v408_v46, %s2697_s21 }
  0xaa   : > { %440 = vrot.lane.b32.xlu1 %v414_v45, %s2699_s28  ;;  %434 = vrot.lane.b32.xlu0 %v408_v46, %s2699_s28 }
  0xae   : > { %452 = vrot.lane.b32.xlu1 %v414_v45, %s2700_s20  ;;  %446 = vrot.lane.b32.xlu0 %v408_v46, %s2700_s20 }
  0xb2   : > { %464 = vrot.lane.b32.xlu1 %v414_v45, %s2701_s22  ;;  %458 = vrot.lane.b32.xlu0 %v408_v46, %s2701_s22 }
  0xb6   : > { %512 = vrot.lane.b32.xlu1 %v330_v44, %s2697_s21  ;;  %506 = vrot.lane.b32.xlu0 %v324_v43, %s2697_s21  ;;  %s2384_s21 = sld [smem:[#allocation7 + $0x9]] }
  0xba   : > { %536 = vrot.lane.b32.xlu1 %v330_v44, %s2699_s28  ;;  %530 = vrot.lane.b32.xlu0 %v324_v43, %s2699_s28  ;;  %s2392_s28 = sld [smem:[#allocation7 + $0x25]] }
  0xbe   : > { %560 = vrot.lane.b32.xlu1 %v330_v44, %s2700_s20  ;;  %554 = vrot.lane.b32.xlu0 %v324_v43, %s2700_s20  ;;  %s2401_s20 = sld [smem:[#allocation7 + $0x42]] }
  0xc2   : > { %476 = vrot.lane.b32.xlu1 %v414_v45, %s2702_s27  ;;  %470 = vrot.lane.b32.xlu0 %v408_v46, %s2702_s27 }
  0xc6   : > { %488 = vrot.lane.b32.xlu1 %v414_v45, %s2703_s5  ;;  %482 = vrot.lane.b32.xlu0 %v408_v46, %s2703_s5 }
  0xca   : > { %500 = vrot.lane.b32.xlu1 %v414_v45, %s2704_s6  ;;  %494 = vrot.lane.b32.xlu0 %v408_v46, %s2704_s6  ;;  %s3018_s6 = sld [smem:[#allocation7 + $0x4]] }
  0xce   : > { %524 = vrot.lane.b32.xlu1 %v414_v45, %s2703_s5  ;;  %518 = vrot.lane.b32.xlu0 %v408_v46, %s2703_s5  ;;  %s2404_s5 = sld [smem:[#allocation7 + $0x1f]] }
  0xd2   : > { %548 = vrot.lane.b32.xlu1 %v414_v45, %s2702_s27  ;;  %542 = vrot.lane.b32.xlu0 %v408_v46, %s2702_s27  ;;  %s2405_s27 = sld [smem:[#allocation7 + $0x50]] }
  0xd6   : > { %572 = vrot.lane.b32.xlu1 %v414_v45, %s2701_s22  ;;  %566 = vrot.lane.b32.xlu0 %v408_v46, %s2701_s22  ;;  %s2400_s22 = sld [smem:[#allocation7 + $0x11]] }
  0xf4   : > { %v327_v47 = vpop.permute.xlu1 %326  ;;  %v314_v48 = vpop.permute.xlu0 %313 }
  0xf5   : > { %329 = vst.msk [vmem:[#allocation4 + $0x4] sm:$0x1] %vm316_vm1, %v327_v47  ;;  %317 = vst.msk [vmem:[#allocation4 + $0x3] sm:$0x1] %vm316_vm1, %v314_v48 }
  0xf8   : > { %v333_v49 = vpop.permute.xlu1 %332  ;;  %v321_v50 = vpop.permute.xlu0 %320 }
  0xf9   : > { %335 = vst.msk [vmem:[#allocation5 + $0x4] sm:$0x1] %vm316_vm1, %v333_v49  ;;  %323 = vst.msk [vmem:[#allocation5 + $0x3] sm:$0x1] %vm316_vm1, %v321_v50 }
  0xfc   : > { %v345_v51 = vpop.permute.xlu1 %344  ;;  %v339_v52 = vpop.permute.xlu0 %338 }
  0xfd   : > { %347 = vst.msk [vmem:[#allocation5 + $0x5] sm:$0x1] %vm316_vm1, %v345_v51  ;;  %341 = vst.msk [vmem:[#allocation4 + $0x5] sm:$0x1] %vm316_vm1, %v339_v52 }
 0x100   : > { %v357_v53 = vpop.permute.xlu1 %356  ;;  %v351_v54 = vpop.permute.xlu0 %350 }
 0x101   : > { %359 = vst.msk [vmem:[#allocation5 + $0x6] sm:$0x1] %vm316_vm1, %v357_v53  ;;  %353 = vst.msk [vmem:[#allocation4 + $0x6] sm:$0x1] %vm316_vm1, %v351_v54 }
 0x104   : > { %v369_v55 = vpop.permute.xlu1 %368  ;;  %v363_v56 = vpop.permute.xlu0 %362 }
 0x105   : > { %371 = vst.msk [vmem:[#allocation5 + $0x7] sm:$0x1] %vm316_vm1, %v369_v55  ;;  %365 = vst.msk [vmem:[#allocation4 + $0x7] sm:$0x1] %vm316_vm1, %v363_v56 }
 0x108   : > { %v381_v57 = vpop.permute.xlu1 %380  ;;  %v375_v58 = vpop.permute.xlu0 %374 }
 0x109   : > { %383 = vst.msk [vmem:[#allocation5 + $0x8] sm:$0x1] %vm316_vm1, %v381_v57  ;;  %377 = vst.msk [vmem:[#allocation4 + $0x8] sm:$0x1] %vm316_vm1, %v375_v58 }
 0x10c   : > { %v393_v59 = vpop.permute.xlu1 %392  ;;  %v387_v60 = vpop.permute.xlu0 %386 }
 0x10d   : > { %395 = vst.msk [vmem:[#allocation5 + $0x9] sm:$0x1] %vm316_vm1, %v393_v59  ;;  %389 = vst.msk [vmem:[#allocation4 + $0x9] sm:$0x1] %vm316_vm1, %v387_v60 }
 0x110   : > { %v405_v61 = vpop.permute.xlu1 %404  ;;  %v399_v62 = vpop.permute.xlu0 %398 }
 0x111   : > { %407 = vst.msk [vmem:[#allocation5 + $0xa] sm:$0x1] %vm316_vm1, %v405_v61  ;;  %401 = vst.msk [vmem:[#allocation4 + $0xa] sm:$0x1] %vm316_vm1, %v399_v62 }
 0x114   : > { %v417_v63 = vpop.permute.xlu1 %416  ;;  %v411_v0 = vpop.permute.xlu0 %410 }
 0x115   : > { %419 = vst.msk [vmem:[#allocation5 + $0xb] sm:$0x1] %vm316_vm1, %v417_v63  ;;  %413 = vst.msk [vmem:[#allocation4 + $0xb] sm:$0x1] %vm316_vm1, %v411_v0 }
 0x118   : > { %v429_v1 = vpop.permute.xlu1 %428  ;;  %v423_v2 = vpop.permute.xlu0 %422 }
 0x119   : > { %431 = vst.msk [vmem:[#allocation5 + $0xc] sm:$0x1] %vm316_vm1, %v429_v1  ;;  %425 = vst.msk [vmem:[#allocation4 + $0xc] sm:$0x1] %vm316_vm1, %v423_v2 }
 0x11c   : > { %v441_v3 = vpop.permute.xlu1 %440  ;;  %v435_v4 = vpop.permute.xlu0 %434 }
 0x11d   : > { %443 = vst.msk [vmem:[#allocation5 + $0xd] sm:$0x1] %vm316_vm1, %v441_v3  ;;  %437 = vst.msk [vmem:[#allocation4 + $0xd] sm:$0x1] %vm316_vm1, %v435_v4 }
 0x120   : > { %v453_v5 = vpop.permute.xlu1 %452  ;;  %v447_v6 = vpop.permute.xlu0 %446 }
 0x121   : > { %455 = vst.msk [vmem:[#allocation5 + $0xe] sm:$0x1] %vm316_vm1, %v453_v5  ;;  %449 = vst.msk [vmem:[#allocation4 + $0xe] sm:$0x1] %vm316_vm1, %v447_v6 }
 0x124   : > { %v465_v7 = vpop.permute.xlu1 %464  ;;  %v459_v8 = vpop.permute.xlu0 %458 }
 0x125   : > { %467 = vst.msk [vmem:[#allocation5 + $0xf] sm:$0x1] %vm316_vm1, %v465_v7  ;;  %461 = vst.msk [vmem:[#allocation4 + $0xf] sm:$0x1] %vm316_vm1, %v459_v8 }
 0x128   : > { %v513_v9 = vpop.permute.xlu1 %512  ;;  %v507_v10 = vpop.permute.xlu0 %506 }
 0x129   : > { %515 = vst.msk [vmem:[#allocation5 + $0x2] sm:$0x1] %vm316_vm1, %v513_v9  ;;  %509 = vst.msk [vmem:[#allocation4 + $0x2] sm:$0x1] %vm316_vm1, %v507_v10 }
 0x12c   : > { %v537_v11 = vpop.permute.xlu1 %536  ;;  %v531_v12 = vpop.permute.xlu0 %530  ;;  %v577_v13 = vld [vmem:[#allocation4 + $0x8] sm:$0xff]  ;;  %v597_v16 = vld [vmem:[#allocation5 + $0x8] sm:$0xff] }
 0x12d   : > { %539 = vst.msk [vmem:[#allocation5 + $0x1] sm:$0x1] %vm316_vm1, %v537_v11  ;;  %533 = vst.msk [vmem:[#allocation4 + $0x1] sm:$0x1] %vm316_vm1, %v531_v12  ;;  %584 = vrot.lane.b32.xlu1 %v577_v13, %s4719_s7 }
 0x130   : > { %v561_v14 = vpop.permute.xlu1 %560  ;;  %v555_v15 = vpop.permute.xlu0 %554 }
 0x131   : > { %563 = vst.msk [vmem:[#allocation5] sm:$0x1] %vm316_vm1, %v561_v14  ;;  %557 = vst.msk [vmem:[#allocation4] sm:$0x1] %vm316_vm1, %v555_v15  ;;  %604 = vrot.lane.b32.xlu1 %v597_v16, %s4719_s7 }
 0x134   : > { %v477_v17 = vpop.permute.xlu1 %476  ;;  %v471_v18 = vpop.permute.xlu0 %470 }
 0x135   : > { %479 = vst.msk [vmem:[#allocation5 + $0x10] sm:$0x1] %vm316_vm1, %v477_v17  ;;  %473 = vst.msk [vmem:[#allocation4 + $0x10] sm:$0x1] %vm316_vm1, %v471_v18 }
 0x138   : > { %v489_v19 = vpop.permute.xlu1 %488  ;;  %v483_v20 = vpop.permute.xlu0 %482  ;;  %v576_v21 = vld [vmem:[#allocation4] sm:$0xff]  ;;  %v596_v24 = vld [vmem:[#allocation5] sm:$0xff] }
 0x139   : > { %491 = vst.msk [vmem:[#allocation5 + $0x11] sm:$0x1] %vm316_vm1, %v489_v19  ;;  %485 = vst.msk [vmem:[#allocation4 + $0x11] sm:$0x1] %vm316_vm1, %v483_v20  ;;  %582 = vrot.lane.b32.xlu0 %v576_v21, %s4719_s7 }
 0x13c   : > { %v501_v22 = vpop.permute.xlu1 %500  ;;  %v495_v23 = vpop.permute.xlu0 %494 }
 0x13d   : > { %503 = vst.msk [vmem:[#allocation5 + $0x12] sm:$0x1] %vm316_vm1, %v501_v22  ;;  %497 = vst.msk [vmem:[#allocation4 + $0x12] sm:$0x1] %vm316_vm1, %v495_v23  ;;  %602 = vrot.lane.b32.xlu0 %v596_v24, %s4719_s7 }
 0x140   : > { %v525_v25 = vpop.permute.xlu1 %524  ;;  %v519_v26 = vpop.permute.xlu0 %518 }
 0x141   : > { %527 = vst.msk [vmem:[#allocation5 + $0x13] sm:$0x1] %vm316_vm1, %v525_v25  ;;  %521 = vst.msk [vmem:[#allocation4 + $0x13] sm:$0x1] %vm316_vm1, %v519_v26 }
 0x144   : > { %v549_v27 = vpop.permute.xlu1 %548  ;;  %v543_v28 = vpop.permute.xlu0 %542 }
 0x145   : > { %551 = vst.msk [vmem:[#allocation5 + $0x14] sm:$0x1] %vm316_vm1, %v549_v27  ;;  %545 = vst.msk [vmem:[#allocation4 + $0x14] sm:$0x1] %vm316_vm1, %v543_v28 }
 0x148   : > { %v573_v29 = vpop.permute.xlu1 %572  ;;  %v567_v30 = vpop.permute.xlu0 %566 }
 0x149   : > { %575 = vst.msk [vmem:[#allocation5 + $0x15] sm:$0x1] %vm316_vm1, %v573_v29  ;;  %569 = vst.msk [vmem:[#allocation4 + $0x15] sm:$0x1] %vm316_vm1, %v567_v30  ;;  %vm1079_vm1 = vcmask 1044480  }
 0x150   : > { %v598_v31 = vld [vmem:[#allocation5 + $0x10] sm:$0x3f]  ;;  %v578_v32 = vld [vmem:[#allocation4 + $0x10] sm:$0x3f] }
 0x151   : > { %606 = vrot.lane.b32.xlu1 %v598_v31, %s4719_s7  ;;  %586 = vrot.lane.b32.xlu0 %v578_v32, %s4719_s7 }
 0x19f   : > { %v585_v33 = vpop.permute.xlu1 %584 }
 0x1a0   : > { %593 = vst.msk [vmem:[#allocation4 + $0x8] sm:$0xff] %vm591_vm2, %v585_v33  ;;  %v1194_v33 = vstv %s2986_s29  ;;  %s2441_s29 = sld [smem:[#allocation7 + $0x3e]] }
 0x1a3   : > { %v605_v34 = vpop.permute.xlu1 %604 }
 0x1a4   : > { %612 = vst.msk [vmem:[#allocation5 + $0x8] sm:$0xff] %vm591_vm2, %v605_v34 }
 0x1a7   : > { %v615_v35 = vld [vmem:[#allocation4 + $0x8] sm:$0xff] }
 0x1a8   : > { %622 = vrot.lane.b32.xlu1 %v615_v35, %s2706_s11  ;;  %v1191_v35 = vstv %s2988_s26  ;;  %s2440_s26 = sld [smem:[#allocation7 + $0xd]] }
 0x1ab   : > { %v583_v36 = vpop.permute.xlu0 %582  ;;  %v635_v37 = vld [vmem:[#allocation5 + $0x8] sm:$0xff] }
 0x1ac   : > { %592 = vst.msk [vmem:[#allocation4] sm:$0xff] %vm591_vm2, %v583_v36  ;;  %642 = vrot.lane.b32.xlu1 %v635_v37, %s2706_s11  ;;  %v2997_v36 = vstv %s2385_s4  ;;  %s3059_s4 = sld [smem:[#allocation7 + $0x32]] }
 0x1af   : > { %v603_v38 = vpop.permute.xlu0 %602 }
 0x1b0   : > { %611 = vst.msk [vmem:[#allocation5] sm:$0xff] %vm591_vm2, %v603_v38  ;;  %vm1142_vm2 = vcmask 1042432  }
 0x1b3   : > { %v614_v39 = vld [vmem:[#allocation4] sm:$0xff] }
 0x1b4   : > { %620 = vrot.lane.b32.xlu0 %v614_v39, %s2706_s11 }
 0x1b7   : > { %v634_v40 = vld [vmem:[#allocation5] sm:$0xff] }
 0x1b8   : > { %640 = vrot.lane.b32.xlu0 %v634_v40, %s2706_s11 }
 0x1c3   : > { %v607_v41 = vpop.permute.xlu1 %606  ;;  %v587_v42 = vpop.permute.xlu0 %586 }
 0x1c4   : > { %613 = vst.msk [vmem:[#allocation5 + $0x10] sm:$0x3f] %vm594_vm3, %v607_v41  ;;  %595 = vst.msk [vmem:[#allocation4 + $0x10] sm:$0x3f] %vm594_vm3, %v587_v42  ;;  %v1211_v41 = vstv %s2384_s21  ;;  %s3068_s21 = sld [smem:[#allocation7 + $0x6]]  ;;  %vm856_vm3 = vcmask 1045504  }
 0x1cb   : > { %v636_v43 = vld [vmem:[#allocation5 + $0x10] sm:$0x3f]  ;;  %v616_v44 = vld [vmem:[#allocation4 + $0x10] sm:$0x3f] }
 0x1cc   : > { %644 = vrot.lane.b32.xlu1 %v636_v43, %s2706_s11  ;;  %624 = vrot.lane.b32.xlu0 %v616_v44, %s2706_s11  ;;  %v3005_v44 = vstv %s2393_s23  ;;  %s3028_s11 = sld [smem:[#allocation7 + $0x35]]  ;;  %s3070_s23 = sld [smem:[#allocation7 + $0x37]] }
 0x21a   : > { %v623_v45 = vpop.permute.xlu1 %622 }
 0x21b   : > { %631 = vst.msk [vmem:[#allocation4 + $0x8] sm:$0xff] %vm629_vm4, %v623_v45  ;;  %v3008_v45 = vstv %s2392_s28  ;;  %s3072_s28 = sld [smem:[#allocation7 + $0x1]] }
 0x21e   : > { %v643_v46 = vpop.permute.xlu1 %642 }
 0x21f   : > { %650 = vst.msk [vmem:[#allocation5 + $0x8] sm:$0xff] %vm629_vm4, %v643_v46 }
 0x222   : > { %v653_v47 = vld [vmem:[#allocation4 + $0x8] sm:$0xff] }
 0x223   : > { %660 = vrot.lane.b32.xlu1 %v653_v47, %s4714_s9 }
 0x226   : > { %v621_v48 = vpop.permute.xlu0 %620  ;;  %v673_v49 = vld [vmem:[#allocation5 + $0x8] sm:$0xff] }
 0x227   : > { %630 = vst.msk [vmem:[#allocation4] sm:$0xff] %vm629_vm4, %v621_v48  ;;  %680 = vrot.lane.b32.xlu1 %v673_v49, %s4714_s9 }
 0x22a   : > { %v641_v50 = vpop.permute.xlu0 %640 }
 0x22b   : > { %649 = vst.msk [vmem:[#allocation5] sm:$0xff] %vm629_vm4, %v641_v50  ;;  %v3014_v50 = vstv %s2401_s20  ;;  %s2372_s20 = sld [smem:[#allocation7 + $0xf]]  ;;  %vm962_vm4 = vcmask 1041408  }
 0x22e   : > { %v652_v51 = vld [vmem:[#allocation4] sm:$0xff] }
 0x22f   : > { %658 = vrot.lane.b32.xlu0 %v652_v51, %s4714_s9 }
 0x232   : > { %v672_v52 = vld [vmem:[#allocation5] sm:$0xff] }
 0x233   : > { %678 = vrot.lane.b32.xlu0 %v672_v52, %s4714_s9  ;;  %v3020_v52 = vstv %s2400_s22  ;;  %s3084_s22 = sld [smem:[#allocation7 + $0x1d]] }
 0x23e   : > { %v645_v53 = vpop.permute.xlu1 %644  ;;  %v625_v54 = vpop.permute.xlu0 %624 }
 0x23f   : > { %651 = vst.msk [vmem:[#allocation5 + $0x10] sm:$0x3f] %vm632_vm5, %v645_v53  ;;  %633 = vst.msk [vmem:[#allocation4 + $0x10] sm:$0x3f] %vm632_vm5, %v625_v54  ;;  %v3022_v53 = vstv %s2405_s27  ;;  %s2373_s27 = sld [smem:[#allocation7 + $0x40]]  ;;  %vm2230_vm5 = vcmask 130048  }
 0x246   : > { %v674_v55 = vld [vmem:[#allocation5 + $0x10] sm:$0x3f]  ;;  %v654_v56 = vld [vmem:[#allocation4 + $0x10] sm:$0x3f] }
 0x247   : > { %682 = vrot.lane.b32.xlu1 %v674_v55, %s4714_s9  ;;  %662 = vrot.lane.b32.xlu0 %v654_v56, %s4714_s9 }
 0x295   : > { %v661_v57 = vpop.permute.xlu1 %660 }
 0x296   : > { %669 = vst.msk [vmem:[#allocation4 + $0x8] sm:$0xff] %vm667_vm6, %v661_v57  ;;  %v3031_v57 = vstv %s2404_s5  ;;  %s3087_s5 = sld [smem:[#allocation7 + $0x3]] }
 0x299   : > { %v681_v58 = vpop.permute.xlu1 %680 }
 0x29a   : > { %688 = vst.msk [vmem:[#allocation5 + $0x8] sm:$0xff] %vm667_vm6, %v681_v58 }
 0x29d   : > { %v691_v59 = vld [vmem:[#allocation4 + $0x8] sm:$0xff] }
 0x29e   : > { %698 = vrot.lane.b32.xlu1 %v691_v59, %s2708_s12 }
 0x2a1   : > { %v659_v60 = vpop.permute.xlu0 %658  ;;  %v711_v61 = vld [vmem:[#allocation5 + $0x8] sm:$0xff] }
 0x2a2   : > { %668 = vst.msk [vmem:[#allocation4] sm:$0xff] %vm667_vm6, %v659_v60  ;;  %718 = vrot.lane.b32.xlu1 %v711_v61, %s2708_s12 }
 0x2a5   : > { %v679_v62 = vpop.permute.xlu0 %678 }
 0x2a6   : > { %687 = vst.msk [vmem:[#allocation5] sm:$0xff] %vm667_vm6, %v679_v62 }
 0x2a9   : > { %v690_v63 = vld [vmem:[#allocation4] sm:$0xff] }
 0x2aa   : > { %696 = vrot.lane.b32.xlu0 %v690_v63, %s2708_s12 }
 0x2ad   : > { %v710_v0 = vld [vmem:[#allocation5] sm:$0xff] }
 0x2ae   : > { %716 = vrot.lane.b32.xlu0 %v710_v0, %s2708_s12 }
 0x2b9   : > { %v683_v1 = vpop.permute.xlu1 %682  ;;  %v663_v2 = vpop.permute.xlu0 %662 }
 0x2ba   : > { %689 = vst.msk [vmem:[#allocation5 + $0x10] sm:$0x3f] %vm670_vm7, %v683_v1  ;;  %671 = vst.msk [vmem:[#allocation4 + $0x10] sm:$0x3f] %vm670_vm7, %v663_v2 }
 0x2c1   : > { %v712_v3 = vld [vmem:[#allocation5 + $0x10] sm:$0x3f]  ;;  %v692_v4 = vld [vmem:[#allocation4 + $0x10] sm:$0x3f] }
 0x2c2   : > { %720 = vrot.lane.b32.xlu1 %v712_v3, %s2708_s12  ;;  %700 = vrot.lane.b32.xlu0 %v692_v4, %s2708_s12  ;;  %s2412_s12 = sld [smem:[#allocation7 + $0xb]]  ;;  %v1605_v3 = vstv %s3018_s6  ;;  %s2377_s6 = sld [smem:[#allocation7 + $0x4e]] }
 0x310   : > { %v699_v5 = vpop.permute.xlu1 %698 }
 0x311   : > { %707 = vst.msk [vmem:[#allocation4 + $0x8] sm:$0xff] %vm705_vm8, %v699_v5 }
 0x314   : > { %v719_v6 = vpop.permute.xlu1 %718 }
 0x315   : > { %726 = vst.msk [vmem:[#allocation5 + $0x8] sm:$0xff] %vm705_vm8, %v719_v6  ;;  %v1608_v6 = vstv %s3028_s11  ;;  %s3092_s11 = sld [smem:[#allocation7 + $0x34]] }
 0x318   : > { %v729_v7 = vld [vmem:[#allocation4 + $0x8] sm:$0xff] }
 0x319   : > { %736 = vrot.lane.b32.xlu1 %v729_v7, %s4710_s13 }
 0x31c   : > { %v697_v8 = vpop.permute.xlu0 %696  ;;  %v749_v9 = vld [vmem:[#allocation5 + $0x8] sm:$0xff] }
 0x31d   : > { %706 = vst.msk [vmem:[#allocation4] sm:$0xff] %vm705_vm8, %v697_v8  ;;  %756 = vrot.lane.b32.xlu1 %v749_v9, %s4710_s13 }
 0x320   : > { %v717_v10 = vpop.permute.xlu0 %716 }
 0x321   : > { %725 = vst.msk [vmem:[#allocation5] sm:$0xff] %vm705_vm8, %v717_v10 }
 0x324   : > { %v728_v11 = vld [vmem:[#allocation4] sm:$0xff] }
 0x325   : > { %734 = vrot.lane.b32.xlu0 %v728_v11, %s4710_s13  ;;  %v1625_v11 = vstv %s2412_s12  ;;  %s3101_s12 = sld [smem:[#allocation7 + $0x2b]] }
 0x328   : > { %v748_v12 = vld [vmem:[#allocation5] sm:$0xff] }
 0x329   : > { %754 = vrot.lane.b32.xlu0 %v748_v12, %s4710_s13 }
 0x334   : > { %v721_v13 = vpop.permute.xlu1 %720  ;;  %v701_v14 = vpop.permute.xlu0 %700 }
 0x335   : > { %727 = vst.msk [vmem:[#allocation5 + $0x10] sm:$0x3f] %vm708_vm9, %v721_v13  ;;  %709 = vst.msk [vmem:[#allocation4 + $0x10] sm:$0x3f] %vm708_vm9, %v701_v14 }
 0x33c   : > { %v750_v15 = vld [vmem:[#allocation5 + $0x10] sm:$0x3f]  ;;  %v730_v16 = vld [vmem:[#allocation4 + $0x10] sm:$0x3f] }
 0x33d   : > { %758 = vrot.lane.b32.xlu1 %v750_v15, %s4710_s13  ;;  %738 = vrot.lane.b32.xlu0 %v730_v16, %s4710_s13 }
 0x38b   : > { %v737_v17 = vpop.permute.xlu1 %736 }
 0x38c   : > { %745 = vst.msk [vmem:[#allocation4 + $0x8] sm:$0xff] %vm743_vm10, %v737_v17  ;;  %v2043_v17 = vstv %s2441_s29  ;;  %s3119_s29 = sld [smem:[#allocation7 + $0x17]] }
 0x38f   : > { %v757_v18 = vpop.permute.xlu1 %756 }
 0x390   : > { %764 = vst.msk [vmem:[#allocation5 + $0x8] sm:$0xff] %vm743_vm10, %v757_v18 }
 0x393   : > { %v767_v19 = vld [vmem:[#allocation4 + $0x8] sm:$0xff] }
 0x394   : > { %774 = vrot.lane.b32.xlu1 %v767_v19, %s2710_s1 }
 0x397   : > { %v735_v20 = vpop.permute.xlu0 %734  ;;  %v787_v28 = vld [vmem:[#allocation5 + $0x8] sm:$0xff] }
 0x398   : > { %744 = vst.msk [vmem:[#allocation4] sm:$0xff] %vm743_vm10, %v735_v20 }
 0x39b   : > { %v755_v21 = vpop.permute.xlu0 %754 }
 0x39c   : > { %763 = vst.msk [vmem:[#allocation5] sm:$0xff] %vm743_vm10, %v755_v21 }
 0x39f   : > { %v766_v22 = vld [vmem:[#allocation4] sm:$0xff] }
 0x3a0   : > { %772 = vrot.lane.b32.xlu0 %v766_v22, %s2710_s1 }
 0x3a3   : > { %v786_v23 = vld [vmem:[#allocation5] sm:$0xff] }
 0x3a4   : > { %792 = vrot.lane.b32.xlu1 %v786_v23, %s2710_s1 }
 0x3af   : > { %v759_v24 = vpop.permute.xlu1 %758  ;;  %v739_v25 = vpop.permute.xlu0 %738 }
 0x3b0   : > { %765 = vst.msk [vmem:[#allocation5 + $0x10] sm:$0x3f] %vm746_vm11, %v759_v24  ;;  %747 = vst.msk [vmem:[#allocation4 + $0x10] sm:$0x3f] %vm746_vm11, %v739_v25  ;;  %v2039_v24 = vstv %s2440_s26  ;;  %s3128_s26 = sld [smem:[#allocation7 + $0x48]] }
 0x3b7   : > { %v788_v26 = vld [vmem:[#allocation5 + $0x10] sm:$0x3f]  ;;  %v768_v27 = vld [vmem:[#allocation4 + $0x10] sm:$0x3f] }
 0x3b8   : > { %796 = vrot.lane.b32.xlu1 %v788_v26, %s2710_s1  ;;  %776 = vrot.lane.b32.xlu0 %v768_v27, %s2710_s1 }
 0x3bc   : > { %794 = vrot.lane.b32.xlu0 %v787_v28, %s2710_s1  ;;  %s2413_s1 = sld [smem:[#allocation7 + $0x3c]]  ;;  %v977_v28 = vstv %s3059_s4  ;;  %s3131_s4 = sld [smem:[#allocation7 + $0x2d]] }
 0x3c2   : > { %v1629_v12 = vstv %s2413_s1  ;;  %s3106_s1 = sld [smem:[#allocation7 + $0x5c]] }
 0x406   : > { %v775_v29 = vpop.permute.xlu1 %774 }
 0x407   : > { %783 = vst.msk [vmem:[#allocation4 + $0x8] sm:$0xff] %vm781_vm12, %v775_v29 }
 0x40e   : > { %v3048_v2 = vld [vmem:[#allocation4 + $0x8] sm:$0xff] }
 0x40f   : > { %v1607_v7 = vmul.f32 %v1605_v3, %v3048_v2  ;;  %v1193_v9 = vmul.f32 %v1191_v35, %v3048_v2  ;;  %v1627_v18 = vmul.f32 %v1625_v11, %v3048_v2  ;;  %v1213_v19 = vmul.f32 %v1211_v41, %v3048_v2 }
 0x412   : > { %v773_v30 = vpop.permute.xlu0 %772 }
 0x413   : > { %782 = vst.msk [vmem:[#allocation4] sm:$0xff] %vm781_vm12, %v773_v30 }
 0x416   : > { %v793_v31 = vpop.permute.xlu1 %792 }
 0x417   : > { %801 = vst.msk [vmem:[#allocation5] sm:$0xff] %vm781_vm12, %v793_v31 }
 0x41a   : > { %v2991_v32 = vld [vmem:[#allocation4] sm:$0xff] }
 0x41b   : > { %v1192_v37 = vmul.f32 %v1191_v35, %v2991_v32  ;;  %v1212_v42 = vmul.f32 %v1211_v41, %v2991_v32  ;;  %v1331_v46 = vmul.f32 %v3008_v45, %v2991_v32  ;;  %v1449_v54 = vmul.f32 %v3020_v52, %v2991_v32 }
 0x41c   : > { %v1511_v59 = vmul.f32 %v3031_v57, %v2991_v32  ;;  %v2040_v25 = vmul.f32 %v2039_v24, %v2991_v32  ;;  %v1606_v26 = vmul.f32 %v1605_v3, %v2991_v32  ;;  %v1626_v35 = vmul.f32 %v1625_v11, %v2991_v32 }
 0x41d   : > { %v1392_v3 = vstv %s3087_s5  ;;  %s3212_s5 = sld [smem:[#allocation7 + $0x27]] }
 0x41e   : > { %v2994_v34 = vld [vmem:[#allocation5] sm:$0xff] }
 0x41f   : > { %v1195_v38 = vmul.f32 %v1194_v33, %v2994_v34  ;;  %v1216_v40 = vmul.f32 %v2997_v36, %v2994_v34  ;;  %v1335_v47 = vmul.f32 %v3005_v44, %v2994_v34  ;;  %v1453_v55 = vmul.f32 %v3014_v50, %v2994_v34 }
 0x420   : > { %v1515_v60 = vmul.f32 %v3022_v53, %v2994_v34  ;;  %v2044_v22 = vmul.f32 %v2043_v17, %v2994_v34  ;;  %v1609_v23 = vmul.f32 %v1608_v6, %v2994_v34  ;;  %v1630_v27 = vmul.f32 %v1629_v12, %v2994_v34 }
 0x421   : > { %v1197_v39 = vadd.f32 %v1195_v38, %v1192_v37  ;;  %v1219_v43 = vadd.f32 %v1216_v40, %v1212_v42  ;;  %v3016_v51 = vadd.f32 %v1335_v47, %v1331_v46  ;;  %v3033_v58 = vadd.f32 %v1453_v55, %v1449_v54 }
 0x422   : > { %v3043_v63 = vadd.f32 %v1515_v60, %v1511_v59  ;;  %v2047_v29 = vadd.f32 %v2044_v22, %v2040_v25  ;;  %v1611_v30 = vadd.f32 %v1609_v23, %v1606_v26  ;;  %v1633_v37 = vadd.f32 %v1630_v27, %v1626_v35 }
 0x423   : > { %1201 = vrot.lane.b32.xlu0 %v1197_v39, %s4719_s7  ;;  %v2022_v38 = vstv %s3070_s23  ;;  %v974_v39 = vstv %s3072_s28  ;;  %v978_v40 = vmul.f32 %v977_v28, %v2994_v34  ;;  %v3112_v60 = vstv %s2372_s20  ;;  %s3152_s23 = sld [smem:[#allocation7 + $0x5]]  ;;  %s4718_s28 = smov 127  }
 0x424   : > { %v975_v47 = vmul.f32 %v974_v39, %v2991_v32  ;;  %s3163_s20 = sld [smem:[#allocation7 + $0x5e]]  ;;  %v3189_v35 = vstv %s3128_s26  ;;  %s3300_s26 = sld [smem:[#allocation7 + $0x52]] }
 0x427   : > { %1225 = vrot.lane.b32.xlu0 %v1219_v43, %s4719_s7 }
 0x42a   : > { %v797_v48 = vpop.permute.xlu1 %796  ;;  %v777_v49 = vpop.permute.xlu0 %776 }
 0x42b   : > { %803 = vst.msk [vmem:[#allocation5 + $0x10] sm:$0x3f] %vm784_vm13, %v797_v48  ;;  %785 = vst.msk [vmem:[#allocation4 + $0x10] sm:$0x3f] %vm784_vm13, %v777_v49  ;;  %v3108_v49 = vadd.f32 %v978_v40, %v975_v47 }
 0x42e   : > { %v795_v56 = vpop.permute.xlu0 %794 }
 0x42f   : > { %802 = vst.msk [vmem:[#allocation5 + $0x8] sm:$0xff] %vm781_vm12, %v795_v56 }
 0x432   : > { %v3039_v61 = vld [vmem:[#allocation5 + $0x10] sm:$0x3f]  ;;  %v3041_v62 = vld [vmem:[#allocation4 + $0x10] sm:$0x3f] }
 0x433   : > { %v1214_v0 = vmul.f32 %v1211_v41, %v3041_v62  ;;  %v1218_v1 = vmul.f32 %v2997_v36, %v3039_v61  ;;  %v2042_v31 = vmul.f32 %v2039_v24, %v3041_v62  ;;  %v1628_v43 = vmul.f32 %v1625_v11, %v3041_v62 }
 0x434   : > { %v1632_v46 = vmul.f32 %v1629_v12, %v3039_v61  ;;  %v1035_v11 = vmul.f32 %v3112_v60, %v3041_v62  ;;  %v1451_v47 = vmul.f32 %v3020_v52, %v3041_v62 }
 0x435   : > { %v1221_v4 = vadd.f32 %v1218_v1, %v1214_v0  ;;  %v3114_v0 = vstv %s2373_s27  ;;  %v3117_v1 = vstv %s3084_s22  ;;  %s3182_s22 = sld [smem:[#allocation7 + $0x4a]]  ;;  %s3198_s27 = sld [smem:[#allocation7 + $0x36]] }
 0x436   : > { %v3051_v5 = vld [vmem:[#allocation5 + $0x8] sm:$0xff]  ;;  %v1635_v55 = vadd.f32 %v1632_v46, %v1628_v43 }
 0x437   : > { %1229 = vrot.lane.b32.xlu0 %v1221_v4, %s4719_s7  ;;  %v1610_v8 = vmul.f32 %v1608_v6, %v3051_v5  ;;  %v1196_v10 = vmul.f32 %v1194_v33, %v3051_v5  ;;  %v1631_v15 = vmul.f32 %v1629_v12, %v3051_v5  ;;  %v1217_v16 = vmul.f32 %v2997_v36, %v3051_v5 }
 0x438   : > { %v2046_v33 = vmul.f32 %v2043_v17, %v3039_v61  ;;  %v2019_v36 = vstv %s3068_s21  ;;  %v2024_v42 = vmul.f32 %v2022_v38, %v3051_v5  ;;  %v979_v56 = vmul.f32 %v977_v28, %v3051_v5  ;;  %s3150_s21 = sld [smem:[#allocation7 + $0x19]] }
 0x439   : > { %v1612_v13 = vadd.f32 %v1610_v8, %v1607_v7  ;;  %v1198_v14 = vadd.f32 %v1196_v10, %v1193_v9  ;;  %v1634_v20 = vadd.f32 %v1631_v15, %v1627_v18  ;;  %v1220_v21 = vadd.f32 %v1217_v16, %v1213_v19 }
 0x43a   : > { %v2049_v41 = vadd.f32 %v2046_v33, %v2042_v31  ;;  %v2021_v48 = vmul.f32 %v2019_v36, %v3048_v2  ;;  %v2045_v59 = vmul.f32 %v2043_v17, %v3051_v5  ;;  %v976_v4 = vmul.f32 %v974_v39, %v3048_v2 }
 0x43b   : > { %1617 = vrot.lane.b32.xlu0 %v1612_v13, %s4714_s9  ;;  %1203 = vrot.lane.b32.xlu1 %v1198_v14, %s4719_s7  ;;  %v2041_v6 = vmul.f32 %v2039_v24, %v3048_v2  ;;  %v3126_v7 = vstv %s2377_s6  ;;  %v1395_v8 = vstv %s3092_s11  ;;  %v4682_v9 = vrot.slane %v3108_v49, 7  ;;  %s3218_s6 = sld [smem:[#allocation7 + $0x13]]  ;;  %s3220_s11 = sld [smem:[#allocation7 + $0x21]] }
 0x43c   : > { %v2026_v54 = vadd.f32 %v2024_v42, %v2021_v48  ;;  %v2023_v10 = vmul.f32 %v2022_v38, %v2994_v34  ;;  %v1039_v12 = vmul.f32 %v3114_v0, %v3039_v61  ;;  %v3139_v14 = vadd.f32 %v979_v56, %v976_v4 }
 0x43d   : > { %v2048_v13 = vadd.f32 %v2045_v59, %v2041_v6  ;;  %v1098_v15 = vmul.f32 %v3117_v1, %v3041_v62  ;;  %v1102_v16 = vmul.f32 %v3126_v7, %v3039_v61  ;;  %v2020_v17 = vmul.f32 %v2019_v36, %v2991_v32 }
 0x43e   : > { %v3147_v18 = vstv %s3101_s12  ;;  %v1394_v19 = vmul.f32 %v1392_v3, %v3048_v2  ;;  %v1396_v22 = vmul.f32 %v1395_v8, %v2994_v34  ;;  %v1397_v23 = vmul.f32 %v1395_v8, %v3051_v5  ;;  %s3236_s12 = sld [smem:[#allocation7 + $0x58]] }
 0x43f   : > { %1641 = vrot.lane.b32.xlu0 %v1634_v20, %s4714_s9  ;;  %1227 = vrot.lane.b32.xlu1 %v1220_v21, %s4719_s7  ;;  %v3159_v20 = vstv %s3106_s1  ;;  %v1393_v21 = vmul.f32 %v1392_v3, %v2991_v32  ;;  %v2025_v24 = vadd.f32 %v2023_v10, %v2020_v17  ;;  %v3166_v25 = vadd.f32 %v1039_v12, %v1035_v11  ;;  %s3285_s1 = sld [smem:[#allocation7 + $0x44]] }
 0x440   : > { %v1161_v26 = vmul.f32 %v3147_v18, %v3041_v62  ;;  %v1165_v27 = vmul.f32 %v3159_v20, %v3039_v61  ;;  %v4683_v28 = vrot.slane %v3139_v14, 7  ;;  %v1337_v31 = vmul.f32 %v3005_v44, %v3039_v61 }
 0x441   : > { %v3180_v33 = vstv %s3119_s29  ;;  %v3191_v36 = vadd.f32 %v1396_v22, %v1393_v21  ;;  %v3196_v38 = vadd.f32 %v1397_v23, %v1394_v19  ;;  %v4684_v39 = vrot.slane %v3166_v25, 1  ;;  %s4716_s29 = smov 125  }
 0x442   : > { %v3201_v40 = vadd.f32 %v1165_v27, %v1161_v26  ;;  %v1275_v42 = vmul.f32 %v3189_v35, %v3039_v61  ;;  %v1455_v48 = vmul.f32 %v3014_v50, %v3039_v61  ;;  %v1332_v56 = vmul.f32 %v3008_v45, %v3048_v2 }
 0x443   : > { %2053 = vrot.lane.b32.xlu0 %v2047_v29, %s4710_s13  ;;  %1615 = vrot.lane.b32.xlu1 %v1611_v30, %s4714_s9  ;;  %v3173_v29 = vadd.f32 %v1102_v16, %v1098_v15  ;;  %v1333_v30 = vmul.f32 %v3008_v45, %v3041_v62  ;;  %v1336_v59 = vmul.f32 %v3005_v44, %v3051_v5  ;;  %v3233_v3 = vstv %s3163_s20  ;;  %s3323_s20 = sld [smem:[#allocation7 + $0x60]] }
 0x444   : > { %v1403_v4 = vrot.slane %v3196_v38, 7  ;;  %v4680_v45 = vrot.slane %v3201_v40, 5  ;;  %v1402_v6 = vrot.slane %v3191_v36, 7  ;;  %v1458_v11 = vadd.f32 %v1455_v48, %v1451_v47 }
 0x445   : > { %v4681_v43 = vrot.slane %v3173_v29, 3  ;;  %v1340_v46 = vadd.f32 %v1337_v31, %v1333_v30  ;;  %v1339_v8 = vadd.f32 %v1336_v59, %v1332_v56  ;;  %v3247_v15 = vstv %s3182_s22  ;;  %s3325_s22 = sld [smem:[#allocation7 + $0x8]] }
 0x446   : > { %v1344_v16 = vrot.slane %v3016_v51, 4  ;;  %v1450_v19 = vmul.f32 %v3020_v52, %v3048_v2  ;;  %v1689_v22 = vmul.f32 %v3247_v15, %v3039_v61  ;;  %v1809_v51 = vstv %s3198_s27  ;;  %s3335_s27 = sld [smem:[#allocation7 + $0x5a]] }
 0x447   : > { %2057 = vrot.lane.b32.xlu0 %v2049_v41, %s4710_s13  ;;  %1639 = vrot.lane.b32.xlu1 %v1633_v37, %s4714_s9  ;;  %v3194_v37 = vstv %s3131_s4  ;;  %v1271_v41 = vmul.f32 %v3180_v33, %v3041_v62  ;;  %v1347_v10 = vrot.slane %v1340_v46, 4  ;;  %v1345_v17 = vrot.slane %v1339_v8, 4  ;;  %s3313_s4 = sld [smem:[#allocation7 + $0x2f]] }
 0x448   : > { %v1575_v12 = vmul.f32 %v3194_v37, %v3041_v62  ;;  %v3264_v52 = vsel %vm984_vm14, %v1402_v6, %v1403_v4  ;;  %v1513_v23 = vmul.f32 %v3031_v57, %v3041_v62  ;;  %v1465_v31 = vrot.slane %v1458_v11, 1 }
 0x449   : > { %v3239_v44 = vadd.f32 %v1275_v42, %v1271_v41  ;;  %v3271_v26 = vsel %vm909_vm15, %v1344_v16, %v1345_v17  ;;  %v3274_v27 = vsel %vm909_vm15, %v1345_v17, %v1347_v10  ;;  %v1454_v41 = vmul.f32 %v3014_v50, %v3051_v5 }
 0x44a   : > { %v1810_v42 = vmul.f32 %v1809_v51, %v2994_v34  ;;  %v3283_v46 = vstv %s3212_s5  ;;  %v3288_v47 = vstv %s3218_s6  ;;  %v3291_v48 = vstv %s3220_s11  ;;  %s3337_s5 = sld [smem:[#allocation7 + $0x39]]  ;;  %s3358_s6 = sld [smem:[#allocation7 + $0x1b]] }
 0x44b   : > { %2031 = vrot.lane.b32.xlu0 %v2026_v54, %s4710_s13  ;;  %1643 = vrot.lane.b32.xlu1 %v1635_v55, %s4714_s9  ;;  %v3215_v54 = vstv %s3150_s21  ;;  %v1806_v55 = vstv %s3152_s23  ;;  %v4679_v30 = vrot.slane %v3239_v44, 2  ;;  %4757 = vst [vmem:[#allocation17_spill] sm:$0xff] %v3283_v46  ;;  %v1457_v50 = vadd.f32 %v1454_v41, %v1450_v19  ;;  %s3315_s21 = sld [smem:[#allocation7 + $0x29]]  ;;  %s3379_s23 = sld [smem:[#allocation7 + $0x4c]] }
 0x44c   : > { %4756 = vst [vmem:[#allocation16_spill] sm:$0xff] %v3215_v54  ;;  %v1685_v21 = vmul.f32 %v3215_v54, %v3041_v62  ;;  %v3298_v56 = vstv %s3236_s12  ;;  %v1512_v59 = vmul.f32 %v3031_v57, %v3048_v2  ;;  %v1462_v11 = vrot.slane %v3033_v58, 1  ;;  %s3381_s11 = sld [smem:[#allocation7 + $0x16]]  ;;  %s4712_s12 = smov 123  }
 0x44d   : > { %4758 = vst [vmem:[#allocation18_spill] sm:$0xff] %v3298_v56  ;;  %v1463_v17 = vrot.slane %v1457_v50, 1  ;;  %v1577_v57 = vmul.f32 %v3233_v3, %v2994_v34  ;;  %v1747_v58 = vmul.f32 %v3283_v46, %v3041_v62  ;;  %v1811_v41 = vmul.f32 %v1809_v51, %v3051_v5 }
 0x44e   : > { %v3311_v16 = vadd.f32 %v1689_v22, %v1685_v21  ;;  %v1573_v21 = vmul.f32 %v3194_v37, %v2991_v32  ;;  %v1751_v22 = vmul.f32 %v3298_v56, %v3039_v61  ;;  %v1524_v50 = vrot.slane %v3043_v63, 3 }
 0x44f   : > { %988 = vrot.lane.b32.xlu0 %v4682_v9, %s4718_s28  ;;  %2055 = vrot.lane.b32.xlu1 %v2048_v13, %s4710_s13  ;;  %v1579_v13 = vmul.f32 %v3233_v3, %v3039_v61 }
 0x451   : > { %v3277_v36 = vadd.f32 %v1579_v13, %v1575_v12  ;;  %v1516_v12 = vmul.f32 %v3022_v53, %v3051_v5 }
 0x453   : > { %2029 = vrot.lane.b32.xlu1 %v2025_v24, %s4710_s13  ;;  %992 = vrot.lane.b32.xlu0 %v4683_v28, %s4718_s28  ;;  %v1517_v24 = vmul.f32 %v3022_v53, %v3039_v61  ;;  %v1589_v13 = vrot.slane %v3277_v36, 5  ;;  %v1519_v53 = vadd.f32 %v1516_v12, %v1512_v59  ;;  %v4688_v59 = vrot.slane %v3311_v16, 2 }
 0x454   : > { %v1578_v12 = vmul.f32 %v3233_v3, %v3051_v5  ;;  %v3377_v3 = vstv %s3300_s26  ;;  %s3416_s26 = sld [smem:[#allocation7 + $0x24]]  ;;  %v3439_v28 = vstv %s3358_s6  ;;  %s3633_s6 = sld [smem:[#allocation7 + $0xa]] }
 0x455   : > { %v1520_v8 = vadd.f32 %v1517_v24, %v1513_v23  ;;  %v3340_v23 = vsel %vm1016_vm0, %v1462_v11, %v1463_v17  ;;  %v3343_v24 = vsel %vm1016_vm0, %v1463_v17, %v1465_v31  ;;  %v1580_v11 = vadd.f32 %v1577_v57, %v1573_v21  ;;  %4767 = vst [vmem:[#allocation27_spill] sm:$0xff] %v3439_v28 }
 0x456   : > { %v3356_v17 = vstv %s3285_s1  ;;  %v1931_v21 = vmul.f32 %v3377_v3, %v3039_v61  ;;  %s3414_s1 = sld [smem:[#allocation7 + $0x47]] }
 0x457   : > { %1055 = vrot.lane.b32.xlu1 %v4684_v39, %s4718_s28  ;;  %1118 = vrot.lane.b32.xlu0 %v4681_v43, %s4718_s28  ;;  %4759 = vst [vmem:[#allocation19_spill] sm:$0xff] %v3356_v17 }
 0x45b   : > { %1181 = vrot.lane.b32.xlu1 %v4680_v45, %s4718_s28  ;;  %1353 = vrot.lane.b32.xlu0 %v1347_v10, %s4719_s7  ;;  %v1807_v10 = vmul.f32 %v1806_v55, %v2991_v32 }
 0x45d   : > { %v3319_v19 = vadd.f32 %v1810_v42, %v1807_v10  ;;  %v1525_v42 = vrot.slane %v1519_v53, 3  ;;  %v1574_v10 = vmul.f32 %v3194_v37, %v3048_v2  ;;  %v1865_v37 = vmul.f32 %v3288_v47, %v3041_v62 }
 0x45e   : > { %v1927_v53 = vmul.f32 %v3291_v48, %v3041_v62 }
 0x45f   : > { %1291 = vrot.lane.b32.xlu1 %v4679_v30, %s4719_s7  ;;  %1471 = vrot.lane.b32.xlu0 %v1465_v31, %s4716_s29  ;;  %v1808_v31 = vmul.f32 %v1806_v55, %v3048_v2  ;;  %v3364_v63 = vsel %vm1079_vm1, %v1524_v50, %v1525_v42  ;;  %v1869_v55 = vmul.f32 %v3356_v17, %v3039_v61  ;;  %v3393_v30 = vstv %s3313_s4  ;;  %s3456_s4 = sld [smem:[#allocation7 + $0x55]] }
 0x460   : > { %v1581_v38 = vadd.f32 %v1578_v12, %v1574_v10  ;;  %4760 = vst [vmem:[#allocation20_spill] sm:$0xff] %v3393_v30  ;;  %v3396_v10 = vstv %s3323_s20  ;;  %v3399_v12 = vstv %s3315_s21  ;;  %v3427_v45 = vadd.f32 %v1931_v21, %v1927_v53  ;;  %s3551_s21 = sld [smem:[#allocation7 + $0x10]]  ;;  %s3560_s20 = sld [smem:[#allocation7 + $0x41]] }
 0x461   : > { %v3386_v57 = vadd.f32 %v1811_v41, %v1808_v31  ;;  %4761 = vst [vmem:[#allocation21_spill] sm:$0xff] %v3396_v10  ;;  %4762 = vst [vmem:[#allocation22_spill] sm:$0xff] %v3399_v12  ;;  %v3411_v41 = vstv %s3335_s27  ;;  %v2161_v43 = vmul.f32 %v3399_v12, %v3041_v62  ;;  %v3449_v53 = vstv %s3379_s23  ;;  %s3618_s27 = sld [smem:[#allocation7 + $0x1e]]  ;;  %s3648_s23 = sld [smem:[#allocation7 + $0x18]] }
 0x462   : > { %v1587_v50 = vrot.slane %v1581_v38, 5  ;;  %4764 = vst [vmem:[#allocation24_spill] sm:$0xff] %v3411_v41  ;;  %v2165_v9 = vmul.f32 %v3411_v41, %v3039_v61  ;;  %4768 = vst [vmem:[#allocation28_spill] sm:$0xff] %v3449_v53  ;;  %v3454_v21 = vstv %s3381_s11  ;;  %v2099_v12 = vmul.f32 %v3439_v28, %v3041_v62  ;;  %s3650_s11 = sld [smem:[#allocation7 + $0x26]] }
 0x463   : > { %1405 = vrot.lane.b32.xlu1 %v1402_v6, %s4716_s29  ;;  %1595 = vrot.lane.b32.xlu0 %v1589_v13, %s4716_s29  ;;  %v1527_v6 = vrot.slane %v1520_v8, 3  ;;  %v3384_v8 = vadd.f32 %v1751_v22, %v1747_v58  ;;  %v3402_v58 = vstv %s3325_s22  ;;  %v3408_v22 = vadd.f32 %v1869_v55, %v1865_v37  ;;  %s3608_s22 = sld [smem:[#allocation7 + $0x4f]] }
 0x464   : > { %v4686_v38 = vrot.slane %v3386_v57, 7  ;;  %v1989_v37 = vmul.f32 %v3393_v30, %v3041_v62  ;;  %v1993_v55 = vmul.f32 %v3396_v10, %v3039_v61  ;;  %v1004_v36 = vmul.f32 %v3402_v58, %v3048_v2 }
 0x465   : > { %v3361_v51 = vsel %vm1079_vm1, %v1525_v42, %v1527_v6  ;;  %v1586_v42 = vrot.slane %v1580_v11, 5  ;;  %4763 = vst [vmem:[#allocation23_spill] sm:$0xff] %v3408_v22  ;;  %v1006_v11 = vstv %s3337_s5  ;;  %v2103_v41 = vmul.f32 %v3449_v53, %v3039_v61  ;;  %s3631_s5 = sld [smem:[#allocation7 + $0x2c]] }
 0x466   : > { %v1008_v39 = vmul.f32 %v1006_v11, %v3051_v5  ;;  %v1034_v53 = vmul.f32 %v3112_v60, %v3048_v2 }
 0x467   : > { %1409 = vrot.lane.b32.xlu1 %v1403_v4, %s4716_s29  ;;  %1705 = vrot.lane.b32.xlu0 %v4688_v59, %s4714_s9  ;;  %v4685_v4 = vrot.slane %v3319_v19, 7  ;;  %v3419_v31 = vsel %vm1142_vm2, %v1586_v42, %v1587_v50  ;;  %v3436_v42 = vsel %vm1142_vm2, %v1587_v50, %v1589_v13  ;;  %v3459_v50 = vadd.f32 %v1993_v55, %v1989_v37 }
 0x468   : > { %4765 = vst [vmem:[#allocation25_spill] sm:$0xff] %v3419_v31  ;;  %4766 = vst [vmem:[#allocation26_spill] sm:$0xff] %v3436_v42  ;;  %v3465_v59 = vadd.f32 %v2165_v9, %v2161_v43  ;;  %v3471_v10 = vadd.f32 %v1008_v39, %v1004_v36  ;;  %v1038_v37 = vmul.f32 %v3114_v0, %v3051_v5  ;;  %v4771_v9 = vrot.slane %v3408_v22, 1 }
 0x469   : > { %4769 = vst [vmem:[#allocation29_spill] sm:$0xff] %v3459_v50  ;;  %v1684_v55 = vmul.f32 %v3215_v54, %v3048_v2  ;;  %v1688_v13 = vmul.f32 %v3247_v15, %v3051_v5  ;;  %v1069_v43 = vstv %s3414_s1  ;;  %v3487_v39 = vstv %s3416_s26  ;;  %s3656_s1 = sld [smem:[#allocation7 + $0x5d]]  ;;  %s3670_s26 = sld [smem:[#allocation7 + $0x3b]] }
 0x46a   : > { %4770 = vst [vmem:[#allocation30_spill] sm:$0xff] %v3465_v59  ;;  %v4702_v17 = vrot.slane %v3459_v50, 5  ;;  %v4703_v22 = vrot.slane %v3465_v59, 4  ;;  %v1018_v31 = vrot.slane %v3471_v10, 1  ;;  %v3500_v54 = vadd.f32 %v1038_v37, %v1034_v53 }
 0x46b   : > { %1533 = vrot.lane.b32.xlu1 %v1527_v6, %s4716_s29  ;;  %1819 = vrot.lane.b32.xlu0 %v4685_v4, %s4712_s12  ;;  %v4687_v6 = vrot.slane %v3384_v8, 4  ;;  %v1005_v4 = vmul.f32 %v3402_v58, %v3041_v62  ;;  %v3491_v42 = vadd.f32 %v1688_v13, %v1684_v55  ;;  %v1746_v10 = vmul.f32 %v3283_v46, %v3048_v2  ;;  %s3757_s29 = sld [smem:[#allocation7 + $0xc]] }
 0x46c   : > { %v1750_v53 = vmul.f32 %v3298_v56, %v3051_v5  ;;  %v1070_v37 = vmul.f32 %v1069_v43, %v2994_v34  ;;  %v1007_v55 = vmul.f32 %v1006_v11, %v2994_v34  ;;  %v1003_v50 = vmul.f32 %v3402_v58, %v2991_v32 }
 0x46d   : > { %v1100_v46 = vmul.f32 %v3126_v7, %v2994_v34  ;;  %v1096_v58 = vmul.f32 %v3117_v1, %v2991_v32 }
 0x46f   : > { %1767 = vrot.lane.b32.xlu1 %v4687_v6, %s4714_s9  ;;  %1823 = vrot.lane.b32.xlu0 %v4686_v38, %s4712_s12  ;;  %v1009_v38 = vmul.f32 %v1006_v11, %v3039_v61  ;;  %v4700_v6 = vrot.slane %v3427_v45, 3  ;;  %v1047_v11 = vrot.slane %v3500_v54, 1  ;;  %v1037_v54 = vmul.f32 %v3114_v0, %v2994_v34  ;;  %s3755_s9 = sld [smem:[#allocation7 + $0x2e]] }
 0x470   : > { %v4776_v0 = vrot.slane %v3384_v8, 4  ;;  %v4783_v8 = vrot.slane %v3108_v49, 7 }
 0x471   : > { %v1012_v36 = vadd.f32 %v1009_v38, %v1005_v4  ;;  %v1071_v4 = vmul.f32 %v1069_v43, %v3051_v5  ;;  %v4722_v38 = vrot.slane %v3491_v42, 2 }
 0x473   : > { %1885 = vrot.lane.b32.xlu1 %v4771_v9, %s4712_s12  ;;  %1947 = vrot.lane.b32.xlu0 %v4700_v6, %s4712_s12  ;;  %v3495_v9 = vadd.f32 %v2103_v41, %v2099_v12  ;;  %v1067_v6 = vmul.f32 %v3454_v21, %v3048_v2  ;;  %v1066_v12 = vmul.f32 %v3454_v21, %v2991_v32  ;;  %v3513_v41 = vstv %s3456_s4  ;;  %s3672_s4 = sld [smem:[#allocation7 + $0x49]] }
 0x474   : > { %v1020_v13 = vrot.slane %v1012_v36, 1  ;;  %v3533_v36 = vadd.f32 %v1750_v53, %v1746_v10  ;;  %v1097_v10 = vmul.f32 %v3117_v1, %v3048_v2  ;;  %v1033_v53 = vmul.f32 %v3112_v60, %v2991_v32 }
 0x475   : > { %4772 = vst [vmem:[#allocation31_spill] sm:$0xff] %v3495_v9  ;;  %v4708_v59 = vrot.slane %v3495_v9, 2  ;;  %v4779_v60 = vrot.slane %v3319_v19, 7 }
 0x476   : > { %4775 = vst [vmem:[#allocation33_spill] sm:$0xff] %v3533_v36  ;;  %v1021_v56 = vsel %vm1016_vm0, %v1018_v31, %v1020_v13  ;;  %v1103_v13 = vadd.f32 %v1100_v46, %v1096_v58  ;;  %v4781_v46 = vrot.slane %v3166_v25, 1  ;;  %v1040_v19 = vadd.f32 %v1037_v54, %v1033_v53 }
 0x477   : > { %2009 = vrot.lane.b32.xlu1 %v4702_v17, %s4712_s12  ;;  %2181 = vrot.lane.b32.xlu0 %v4703_v22, %s4710_s13  ;;  %v4773_v17 = vrot.slane %v3311_v16, 2  ;;  %v3537_v16 = vadd.f32 %v1071_v4, %v1067_v6  ;;  %v4709_v6 = vrot.slane %v3533_v36, 4  ;;  %v1010_v4 = vadd.f32 %v1007_v55, %v1003_v50  ;;  %s3719_s12 = sld [smem:[#allocation7 + $0x12]] }
 0x478   : > { %v4778_v50 = vrot.slane %v3386_v57, 7  ;;  %v4782_v55 = vrot.slane %v3139_v14, 7  ;;  %v1131_v25 = vmul.f32 %v3487_v39, %v3041_v62  ;;  %v1135_v14 = vmul.f32 %v3513_v41, %v3039_v61 }
 0x479   : > { %v3526_v22 = vsel %vm856_vm3, %v4722_v38, %v4773_v17  ;;  %v1101_v17 = vmul.f32 %v3126_v7, %v3051_v5  ;;  %v1073_v7 = vadd.f32 %v1070_v37, %v1066_v12  ;;  %v3567_v1 = vsel %vm909_vm15, %v4709_v6, %v4776_v0 }
 0x47a   : > { %4774 = vst [vmem:[#allocation32_spill] sm:$0xff] %v3526_v22  ;;  %4777 = vst [vmem:[#allocation34_spill] sm:$0xff] %v3567_v1  ;;  %v3574_v12 = vsel %vm984_vm14, %v4779_v60, %v4778_v50  ;;  %v1050_v37 = vsel %vm1016_vm0, %v1047_v11, %v4781_v46  ;;  %v987_v58 = vsel %vm984_vm14, %v4783_v8, %v4782_v55  ;;  %v1081_v0 = vrot.slane %v3537_v16, 3 }
 0x47b   : > { %2119 = vrot.lane.b32.xlu1 %v4708_v59, %s4710_s13  ;;  %1024 = vrot.lane.b32.xlu0 %v1021_v56, %s4718_s28  ;;  %v1130_v56 = vmul.f32 %v3487_v39, %v3048_v2  ;;  %v1134_v59 = vmul.f32 %v3513_v41, %v3051_v5  ;;  %4780 = vst [vmem:[#allocation35_spill] sm:$0xff] %v3574_v12  ;;  %v1080_v57 = vrot.slane %v1073_v7, 3  ;;  %v1017_v49 = vrot.slane %v1010_v4, 1  ;;  %s3692_s13 = sld [smem:[#allocation7 + $0x23]] }
 0x47c   : > { %v3585_v6 = vadd.f32 %v1101_v17, %v1097_v10  ;;  %v1068_v50 = vmul.f32 %v3454_v21, %v3041_v62  ;;  %v1072_v16 = vmul.f32 %v1069_v43, %v3039_v61  ;;  %v1164_v60 = vmul.f32 %v3159_v20, %v3051_v5 }
 0x47d   : > { %v3596_v17 = vadd.f32 %v1134_v59, %v1130_v56  ;;  %v1082_v10 = vsel %vm1079_vm1, %v1080_v57, %v1081_v0  ;;  %v1019_v54 = vsel %vm1016_vm0, %v1017_v49, %v1018_v31  ;;  %v1138_v7 = vadd.f32 %v1135_v14, %v1131_v25 }
 0x47e   : > { %v1110_v53 = vrot.slane %v3585_v6, 3  ;;  %v3606_v21 = vstv %s3551_s21  ;;  %v1926_v59 = vmul.f32 %v3291_v48, %v3048_v2  ;;  %v1930_v31 = vmul.f32 %v3377_v3, %v3051_v5  ;;  %s3678_s21 = sld [smem:[#allocation7 + $0x57]] }
 0x47f   : > { %1053 = vrot.lane.b32.xlu0 %v1050_v37, %s4718_s28  ;;  %990 = vrot.lane.b32.xlu1 %v987_v58, %s4718_s28  ;;  %v1109_v43 = vrot.slane %v1103_v13, 3  ;;  %v1046_v6 = vrot.slane %v1040_v19, 1  ;;  %v1075_v4 = vadd.f32 %v1072_v16, %v1068_v50  ;;  %v1160_v56 = vmul.f32 %v3147_v18, %v3048_v2 }
 0x480   : > { %v1144_v46 = vrot.slane %v3596_v17, 5  ;;  %v1243_v37 = vstv %s3560_s20  ;;  %v3620_v55 = vadd.f32 %v1930_v31, %v1926_v59  ;;  %v1146_v19 = vrot.slane %v1138_v7, 5  ;;  %s3680_s20 = sld [smem:[#allocation7 + $0x7]] }
 0x481   : > { %v1111_v8 = vsel %vm1079_vm1, %v1109_v43, %v1110_v53  ;;  %v1048_v58 = vsel %vm1016_vm0, %v1046_v6, %v1047_v11  ;;  %v3624_v25 = vadd.f32 %v1164_v60, %v1160_v56  ;;  %v1245_v13 = vmul.f32 %v1243_v37, %v3051_v5 }
 0x482   : > { %4784 = vst [vmem:[#allocation36_spill] sm:$0xff] %v3620_v55  ;;  %v1241_v14 = vmul.f32 %v3606_v21, %v3048_v2  ;;  %v4721_v57 = vrot.slane %v3620_v55, 3  ;;  %v1083_v49 = vrot.slane %v1075_v4, 3  ;;  %v1242_v11 = vmul.f32 %v3606_v21, %v3041_v62 }
 0x483   : > { %1085 = vrot.lane.b32.xlu0 %v1082_v10, %s4718_s28  ;;  %1022 = vrot.lane.b32.xlu1 %v1019_v54, %s4718_s28  ;;  %v1246_v50 = vmul.f32 %v1243_v37, %v3039_v61  ;;  %v1133_v16 = vmul.f32 %v3513_v41, %v2994_v34  ;;  %v1147_v10 = vsel %vm1142_vm2, %v1144_v46, %v1146_v19  ;;  %v1173_v59 = vrot.slane %v3624_v25, 5 }
 0x484   : > { %v1129_v54 = vmul.f32 %v3487_v39, %v2991_v32  ;;  %v1274_v60 = vmul.f32 %v3189_v35, %v3051_v5  ;;  %v1084_v7 = vsel %vm1079_vm1, %v1081_v0, %v1083_v49  ;;  %v3654_v31 = vadd.f32 %v1245_v13, %v1241_v14 }
 0x485   : > { %v4785_v41 = vrot.slane %v3427_v45, 3  ;;  %v3668_v43 = vstv %s3608_s22  ;;  %v1249_v0 = vadd.f32 %v1246_v50, %v1242_v11  ;;  %v1270_v45 = vmul.f32 %v3180_v33, %v3048_v2  ;;  %s3690_s22 = sld [smem:[#allocation7 + $0x15]] }
 0x486   : > { %v1136_v6 = vadd.f32 %v1133_v16, %v1129_v54  ;;  %v1163_v4 = vmul.f32 %v3159_v20, %v2994_v34  ;;  %v4787_v56 = vrot.slane %v3173_v29, 3  ;;  %v3688_v13 = vstv %s3618_s27  ;;  %s3717_s27 = sld [smem:[#allocation7 + $0x38]] }
 0x487   : > { %1114 = vrot.lane.b32.xlu0 %v1111_v8, %s4718_s28  ;;  %1051 = vrot.lane.b32.xlu1 %v1048_v58, %s4718_s28  ;;  %v3663_v39 = vsel %vm1079_vm1, %v4721_v57, %v4785_v41  ;;  %v1159_v58 = vmul.f32 %v3147_v18, %v2991_v32  ;;  %v4788_v20 = vrot.slane %v3201_v40, 5  ;;  %v1254_v14 = vrot.slane %v3654_v31, 2 }
 0x488   : > { %4786 = vst [vmem:[#allocation37_spill] sm:$0xff] %v3663_v39  ;;  %v1113_v8 = vsel %vm1079_vm1, %v1110_v53, %v4787_v56  ;;  %v3700_v29 = vadd.f32 %v1274_v60, %v1270_v45  ;;  %v1307_v18 = vmul.f32 %v3668_v43, %v3051_v5  ;;  %v1306_v40 = vmul.f32 %v3668_v43, %v2994_v34 }
 0x489   : > { %v1176_v19 = vsel %vm1142_vm2, %v1173_v59, %v4788_v20  ;;  %v1244_v53 = vmul.f32 %v1243_v37, %v2994_v34  ;;  %v3710_v49 = vstv %s3631_s5  ;;  %v3713_v11 = vstv %s3633_s6  ;;  %s3731_s5 = sld [smem:[#allocation7 + $0x46]]  ;;  %s3733_s6 = sld [smem:[#allocation7 + $0x20]] }
 0x48a   : > { %v1256_v50 = vrot.slane %v1249_v0, 2  ;;  %v1143_v16 = vrot.slane %v1136_v6, 5  ;;  %v1303_v54 = vmul.f32 %v3688_v13, %v3048_v2  ;;  %v1302_v60 = vmul.f32 %v3688_v13, %v2991_v32 }
 0x48b   : > { %1150 = vrot.lane.b32.xlu0 %v1147_v10, %s4718_s28  ;;  %1087 = vrot.lane.b32.xlu1 %v1084_v7, %s4718_s28  ;;  %v1166_v10 = vadd.f32 %v1163_v4, %v1159_v58  ;;  %v1240_v37 = vmul.f32 %v3606_v21, %v2991_v32  ;;  %v3726_v7 = vstv %s3648_s23  ;;  %v3729_v41 = vstv %s3650_s11  ;;  %s3744_s23 = sld [smem:[#allocation7 + $0x54]]  ;;  %s3746_s11 = sld [smem:[#allocation7 + $0x43]] }
 0x48c   : > { %v1257_v0 = vsel %vm856_vm3, %v1254_v14, %v1256_v50  ;;  %v1145_v6 = vsel %vm1142_vm2, %v1143_v16, %v1144_v46  ;;  %v1283_v21 = vrot.slane %v3700_v29, 2  ;;  %v3742_v45 = vadd.f32 %v1307_v18, %v1303_v54  ;;  %v3888_v29 = vld [vmem:[#allocation5] sm:$0xff] }
 0x48d   : > { %v1309_v17 = vadd.f32 %v1306_v40, %v1302_v60  ;;  %v1247_v4 = vadd.f32 %v1244_v53, %v1240_v37  ;;  %v1273_v46 = vmul.f32 %v3189_v35, %v2994_v34  ;;  %v3753_v56 = vstv %s3656_s1  ;;  %s3783_s1 = sld [smem:[#allocation7 + $0x5f]] }
 0x48e   : > { %v3760_v58 = vstv %s3670_s26  ;;  %v3763_v20 = vstv %s3672_s4  ;;  %v1269_v34 = vmul.f32 %v3180_v33, %v2991_v32  ;;  %v3775_v35 = vstv %s3680_s20  ;;  %s3785_s26 = sld [smem:[#allocation7 + $0x28]]  ;;  %s4790_s4 = smov 126  }
 0x48f   : > { %1179 = vrot.lane.b32.xlu0 %v1176_v19, %s4718_s28  ;;  %1116 = vrot.lane.b32.xlu1 %v1113_v8, %s4718_s28  ;;  %v1172_v8 = vrot.slane %v1166_v10, 5  ;;  %v3766_v19 = vstv %s3678_s21  ;;  %v3778_v18 = vstv %s3690_s22  ;;  %v4789_v53 = vrot.slane %v3239_v44, 2  ;;  %s4791_s21 = smov 127   ;;  %s3804_s20 = sld [smem:[#allocation7 + $0xe]] }
 0x490   : > { %v3781_v40 = vstv %s3692_s13  ;;  %v4723_v33 = vrot.slane %v3742_v45, 4  ;;  %v1369_v16 = vmul.f32 %v3753_v56, %v3051_v5  ;;  %s3798_s13 = sld [smem:[#allocation7]]  ;;  %v1315_v44 = vrot.slane %v1309_v17, 4  ;;  %s3806_s22 = sld [smem:[#allocation7 + $0x1c]] }
 0x491   : > { %v1286_v50 = vsel %vm856_vm3, %v1283_v21, %v4789_v53  ;;  %v1174_v32 = vsel %vm1142_vm2, %v1172_v8, %v1173_v59  ;;  %v1253_v10 = vrot.slane %v1247_v4, 2  ;;  %v1276_v25 = vadd.f32 %v1273_v46, %v1269_v34 }
 0x492   : > { %v1365_v59 = vmul.f32 %v3710_v49, %v3048_v2  ;;  %v1366_v54 = vmul.f32 %v3710_v49, %v3041_v62  ;;  %v1370_v60 = vmul.f32 %v3753_v56, %v3039_v61  ;;  %v1304_v37 = vmul.f32 %v3688_v13, %v3041_v62 }
 0x493   : > { %1260 = vrot.lane.b32.xlu0 %v1257_v0, %s4719_s7  ;;  %1148 = vrot.lane.b32.xlu1 %v1145_v6, %s4718_s28  ;;  %s3768_s28 = sld [smem:[#allocation7 + $0x51]]  ;;  %s3770_s7 = sld [smem:[#allocation7 + $0x1a]]  ;;  %v1308_v0 = vmul.f32 %v3668_v43, %v3039_v61  ;;  %v3819_v6 = vstv %s3717_s27  ;;  %v3822_v17 = vstv %s3731_s5  ;;  %v1317_v61 = vsel %vm909_vm15, %v1315_v44, %v4723_v33 }
 0x494   : > { %v3825_v4 = vstv %s3719_s12  ;;  %v3828_v46 = vstv %s3733_s6  ;;  %v1255_v62 = vsel %vm856_vm3, %v1253_v10, %v1254_v14  ;;  %v3840_v43 = vadd.f32 %v1369_v16, %v1365_v59  ;;  %s3853_s12 = sld [smem:[#allocation7 + $0x59]]  ;;  %s3855_s27 = sld [smem:[#allocation7 + $0x14]] }
 0x495   : > { %v3843_v13 = vstv %s3744_s23  ;;  %v3848_v8 = vstv %s3746_s11  ;;  %v3851_v34 = vstv %s3755_s9  ;;  %v1282_v31 = vrot.slane %v1276_v25, 2  ;;  %s3860_s5 = sld [smem:[#allocation7 + $0x31]]  ;;  %s3874_s9 = sld [smem:[#allocation7 + $0x3f]] }
 0x496   : > { %v1373_v14 = vadd.f32 %v1370_v60, %v1366_v54  ;;  %v1311_v53 = vadd.f32 %v1308_v0, %v1304_v37  ;;  %v3866_v16 = vstv %s3783_s1  ;;  %v3872_v10 = vstv %s3785_s26  ;;  %v3883_v37 = vpop.permute.xlu0 %1201  ;;  %s4120_s6 = sld [smem:[#allocation7 + $0x22]]  ;;  %s4160_s23 = sld [smem:[#allocation7 + $0x53]] }
 0x497   : > { %1289 = vrot.lane.b32.xlu0 %v1286_v50, %s4790_s4  ;;  %1177 = vrot.lane.b32.xlu1 %v1174_v32, %s4791_s21  ;;  %s3816_s21 = sld [smem:[#allocation7 + $0x3d]]  ;;  %v3858_v50 = vstv %s3757_s29  ;;  %v1284_v25 = vsel %vm856_vm3, %v1282_v31, %v1283_v21  ;;  %v4725_v59 = vrot.slane %v3840_v43, 6  ;;  %v1425_v54 = vmul.f32 %v3760_v58, %v3051_v5  ;;  %4792 = vst [vmem:[#allocation38_spill] sm:$0xff] %v3883_v37  ;;  %s4827_s11 = smov 124  }
 0x498   : > { %v1424_v21 = vmul.f32 %v3888_v29, %v3760_v58  ;;  %v3893_v0 = vstv %s3804_s20  ;;  %v3896_v5 = vstv %s3806_s22  ;;  %v1421_v31 = vmul.f32 %v3713_v11, %v3048_v2  ;;  %s4071_s29 = sld [smem:[#allocation7 + $0x45]]  ;;  %s4305_s1 = sld [smem:[#allocation7 + $0x30]] }
 0x499   : > { %v3863_v32 = vstv %s3768_s28  ;;  %v3869_v44 = vstv %s3770_s7  ;;  %v3910_v60 = vstv %s3830_s0  ;;  %v3913_v33 = vstv %s3832_s2  ;;  %s3930_s0 = sld [smem:[#allocation6]]  ;;  %s4800_s2 = smov 125  }
 0x49a   : > { %4793 = vst [vmem:[#allocation39_spill] sm:$0xff] %v3910_v60  ;;  %v3928_v9 = vstv %s3853_s12  ;;  %s3988_s7 = sld [smem:[#allocation7 + $0x4d]]  ;;  %v1486_v1 = vmul.f32 %v3888_v29, %v3763_v20  ;;  %v4804_v60 = vrot.slane %v3840_v43, 6  ;;  %s4030_s28 = sld [smem:[#allocation7 + $0x5b]] }
 0x49b   : > { %1320 = vrot.lane.b32.xlu0 %v1317_v61, %s4790_s4  ;;  %1258 = vrot.lane.b32.xlu1 %v1255_v62, %s4790_s4  ;;  %v1380_v61 = vrot.slane %v1373_v14, 6  ;;  %v1318_v62 = vrot.slane %v1311_v53, 4  ;;  %v4794_v14 = vrot.slane %v3742_v45, 4  ;;  %v3921_v53 = vadd.f32 %v1425_v54, %v1421_v31  ;;  %4795 = vst [vmem:[#allocation40_spill] sm:$0xff] %v3928_v9  ;;  %s4848_s26 = smov 123   ;;  %s2354_s20 = sshll.u32 %s2878_s25, 4 }
 0x49c   : > { %s217_s22 = scalar_lea.vmem [#allocation12], %s2354_s20  ;;  %s2458_s12 = sshll.u32 %s2683_s17, 8 }
 0x49d   : > { %v3907_v38 = vstv %s3816_s21  ;;  %v1381_v2 = vsel %vm962_vm4, %v4725_v59, %v1380_v61  ;;  %v3933_v61 = vstv %s3855_s27  ;;  %v3935_v59 = vld [vmem:[#allocation4 + $0x10] sm:$0x3f]  ;;  %s2247_s21 = sshll.u32 %s217_s22, 4  ;;  %s2714_s17 = smov [#allocation12]   ;;  %s4622_s21 = int_to_ptr.vmem [resolvable:$true] %s2247_s21 }
 0x49e   : > { %4796 = vst [vmem:[#allocation41_spill] sm:$0xff] %v3933_v61  ;;  %v1422_v54 = vmul.f32 %v3935_v59, %v3713_v11 }
 0x49f   : > { %1349 = vrot.lane.b32.xlu0 %v3271_v26, %s4790_s4  ;;  %1287 = vrot.lane.b32.xlu1 %v1284_v25, %s4790_s4  ;;  %v1368_v26 = vmul.f32 %v3888_v29, %v3753_v56  ;;  %v3902_v25 = vld [vmem:[#allocation4] sm:$0xff]  ;;  %v1319_v56 = vsel %vm909_vm15, %v4794_v14, %v1318_v62  ;;  %v3939_v62 = vld [vmem:[#allocation5 + $0x10] sm:$0x3f]  ;;  %v1434_v14 = vrot.slane %v3921_v53, 1 }
 0x4a0   : > { %v1420_v57 = vmul.f32 %v3902_v25, %v3713_v11  ;;  %v1364_v37 = vmul.f32 %v3902_v25, %v3710_v49  ;;  %v1426_v49 = vmul.f32 %v3939_v62, %v3760_v58  ;;  %v3957_v11 = vstv %s3874_s9  ;;  %v3960_v58 = vld [vmem:[#allocation5 + $0x8] sm:$0xff]  ;;  %s4620_s9 = scalar_lea.hbm %s4674_s3, %s2458_s12 }
 0x4a1   : > { %4799 = vst [vmem:[#allocation44_spill] sm:$0xff] %v3957_v11 }
 0x4a2   : > { %v1427_v39 = vadd.f32 %v1424_v21, %v1420_v57  ;;  %v1371_v45 = vadd.f32 %v1368_v26, %v1364_v37  ;;  %v3946_v57 = vld [vmem:[#allocation4 + $0x8] sm:$0xff] }
 0x4a3   : > { %1384 = vrot.lane.b32.xlu0 %v1381_v2, %s4790_s4  ;;  %1322 = vrot.lane.b32.xlu1 %v1319_v56, %s4790_s4  ;;  %v3944_v2 = vpop.permute.xlu0 %1225  ;;  %4798 = vst [vmem:[#allocation43_spill] sm:$0xff] %v3946_v57  ;;  %v1483_v21 = vmul.f32 %v3946_v57, %v3726_v7  ;;  %v1545_v37 = vmul.f32 %v3946_v57, %v3729_v41 }
 0x4a4   : > { %4797 = vst [vmem:[#allocation42_spill] sm:$0xff] %v3944_v2  ;;  %v3954_v26 = vmul.f32 %v3946_v57, %v3778_v18  ;;  %v1487_v56 = vmul.f32 %v3960_v58, %v3763_v20  ;;  %v3966_v31 = vmul.f32 %v3946_v57, %v3781_v40  ;;  %v3970_v2 = vmul.f32 %v3946_v57, %v3825_v4 }
 0x4a5   : > { %v1433_v53 = vrot.slane %v1427_v39, 1  ;;  %v3978_v61 = vmul.f32 %v3946_v57, %v3828_v46  ;;  %v3982_v12 = vmul.f32 %v3946_v57, %v3851_v34  ;;  %v3986_v55 = vmul.f32 %v3946_v57, %v3288_v47 }
 0x4a6   : > { %v1377_v9 = vrot.slane %v1371_v45, 6  ;;  %v1488_v39 = vmul.f32 %v3939_v62, %v3763_v20  ;;  %v4000_v36 = vmul.f32 %v3946_v57, %v3858_v50  ;;  %v4004_v45 = vmul.f32 %v3946_v57, %v3869_v44 }
 0x4a7   : > { %1407 = vrot.lane.b32.xlu0 %v3264_v52, %s4800_s2  ;;  %1351 = vrot.lane.b32.xlu1 %v3274_v27, %s4790_s4  ;;  %v1429_v52 = vadd.f32 %v1426_v49, %v1422_v54  ;;  %v1484_v27 = vmul.f32 %v3935_v59, %v3726_v7  ;;  %v4008_v54 = vmul.f32 %v3946_v57, %v3393_v30 }
 0x4a8   : > { %4802 = vst [vmem:[#allocation46_spill] sm:$0xff] %v4004_v45  ;;  %v1435_v49 = vsel %vm1016_vm0, %v1433_v53, %v1434_v14  ;;  %v1490_v22 = vadd.f32 %v1487_v56, %v1483_v21  ;;  %v4016_v20 = vmul.f32 %v3946_v57, %v3872_v10  ;;  %v1482_v45 = vmul.f32 %v3902_v25, %v3726_v7 }
 0x4a9   : > { %v3994_v11 = vpop.permute.xlu0 %1229  ;;  %4803 = vst [vmem:[#allocation47_spill] sm:$0xff] %v4008_v54  ;;  %v1548_v30 = vmul.f32 %v3888_v29, %v3766_v19  ;;  %v4805_v54 = vstv %s3798_s13  ;;  %v1549_v21 = vmul.f32 %v3960_v58, %v3766_v19 }
 0x4aa   : > { %4801 = vst [vmem:[#allocation45_spill] sm:$0xff] %v3994_v11  ;;  %v1379_v11 = vsel %vm962_vm4, %v1377_v9, %v4804_v60  ;;  %v4028_v43 = vmul.f32 %v3946_v57, %v4805_v54  ;;  %v1436_v9 = vrot.slane %v1429_v52, 1  ;;  %v1491_v60 = vadd.f32 %v1488_v39, %v1484_v27 }
 0x4ab   : > { %1438 = vrot.lane.b32.xlu0 %v1435_v49, %s4800_s2  ;;  %1382 = vrot.lane.b32.xlu1 %v1379_v11, %s4790_s4  ;;  %v4036_v11 = vmul.f32 %v3946_v57, %v3893_v0  ;;  %v1489_v49 = vadd.f32 %v1486_v1, %v1482_v45  ;;  %v1544_v54 = vmul.f32 %v3902_v25, %v3729_v41  ;;  %v1496_v53 = vrot.slane %v1490_v22, 3  ;;  %s4359_s4 = sld [smem:[#allocation7 + $0x61]] }
 0x4ac   : > { %4806 = vst [vmem:[#allocation48_spill] sm:$0xff] %v4028_v43  ;;  %v874_v52 = vmul.f32 %v3960_v58, %v3822_v17  ;;  %v4048_v27 = vmul.f32 %v3946_v57, %v3896_v5  ;;  %v1437_v39 = vsel %vm1016_vm0, %v1434_v14, %v1436_v9  ;;  %v4053_v43 = vmul.f32 %v3946_v57, %v3913_v33 }
 0x4ad   : > { %v4038_v7 = vpop.permute.xlu1 %1203  ;;  %v4040_v56 = vpop.permute.xlu0 %1617  ;;  %v4057_v1 = vmul.f32 %v3946_v57, %v3439_v28  ;;  %v1551_v45 = vadd.f32 %v1548_v30, %v1544_v54  ;;  %v4069_v22 = vmul.f32 %v3946_v57, %v3775_v35  ;;  %v1498_v14 = vrot.slane %v1491_v60, 3 }
 0x4ae   : > { %4807 = vst [vmem:[#allocation49_spill] sm:$0xff] %v4038_v7  ;;  %4808 = vst [vmem:[#allocation50_spill] sm:$0xff] %v4040_v56  ;;  %v873_v56 = vmul.f32 %v3888_v29, %v3822_v17  ;;  %v4065_v7 = vstv %s3988_s7  ;;  %v4073_v9 = vadd.f32 %v1549_v21, %v1545_v37  ;;  %v1550_v30 = vmul.f32 %v3939_v62, %v3766_v19  ;;  %s2609_s7 = sshll.u32 %s2714_s17, 4  ;;  %s2610_s7 = int_to_ptr.vmem [resolvable:$false] %s2609_s7 }
 0x4af   : > { %4809 = vst [vmem:[#allocation51_spill] sm:$0xff] %v4053_v43  ;;  %1467 = vrot.lane.b32.xlu0 %v3340_v23, %s4800_s2  ;;  %1440 = vrot.lane.b32.xlu1 %v1437_v39, %s4800_s2  ;;  %4810 = vst [vmem:[#allocation52_spill] sm:$0xff] %v4069_v22  ;;  %v1546_v23 = vmul.f32 %v3935_v59, %v3729_v41  ;;  %v1495_v28 = vrot.slane %v1489_v49, 3  ;;  %v827_v57 = vmul.f32 %v3902_v25, %v3775_v35  ;;  %p2612_p4 = scmp.lt.s32.totalorder %s4622_s21, %s2610_s7 }
 0x4b0   : > { %v869_v60 = vmul.f32 %v3902_v25, %v3778_v18  ;;  %v4088_v37 = vadd.f32 %v874_v52, %v3954_v26  ;;  %v1499_v41 = vsel %vm1079_vm1, %v1496_v53, %v1498_v14  ;;  %v927_v19 = vmul.f32 %v3960_v58, %v3843_v13 }
 0x4b1   : > { %v4079_v54 = vpop.permute.xlu1 %1227  ;;  %v4081_v39 = vpop.permute.xlu0 %1641  ;;  %v871_v21 = vmul.f32 %v3935_v59, %v3778_v18  ;;  %v875_v49 = vmul.f32 %v3939_v62, %v3822_v17  ;;  %v831_v26 = vmul.f32 %v3888_v29, %v3819_v6  ;;  %v926_v14 = vmul.f32 %v3888_v29, %v3843_v13 }
 0x4b2   : > { %4811 = vst [vmem:[#allocation53_spill] sm:$0xff] %v4079_v54  ;;  %4812 = vst [vmem:[#allocation54_spill] sm:$0xff] %v4081_v39  ;;  %v876_v52 = vadd.f32 %v873_v56, %v869_v60  ;;  %v4105_v39 = vstv %s4030_s28  ;;  %v1497_v54 = vsel %vm1079_vm1, %v1495_v28, %v1496_v53  ;;  %v1557_v18 = vrot.slane %v1551_v45, 5  ;;  %s2611_s28 = scalar_lea.vmem %s2610_s7, 512 }
 0x4b3   : > { %1502 = vrot.lane.b32.xlu0 %v1499_v41, %s4800_s2  ;;  %1469 = vrot.lane.b32.xlu1 %v3343_v24, %s4800_s2  ;;  %v1558_v22 = vrot.slane %v4073_v9, 5  ;;  %v1553_v17 = vadd.f32 %v1550_v30, %v1546_v23  ;;  %v922_v56 = vmul.f32 %v3902_v25, %v3781_v40  ;;  %v1658_v60 = vmul.f32 %v3888_v29, %v3848_v8 }
 0x4b4   : > { %v1659_v28 = vmul.f32 %v3960_v58, %v3848_v8  ;;  %v4123_v53 = vadd.f32 %v927_v19, %v3966_v31  ;;  %v4125_v45 = vadd.f32 %v875_v49, %v871_v21  ;;  %v924_v9 = vmul.f32 %v3935_v59, %v3781_v40 }
 0x4b5   : > { %v4109_v43 = vpop.permute.xlu1 %1615  ;;  %v4111_v41 = vpop.permute.xlu0 %2053  ;;  %v928_v23 = vmul.f32 %v3939_v62, %v3843_v13  ;;  %v882_v30 = vrot.slane %v876_v52, 2  ;;  %v929_v24 = vadd.f32 %v926_v14, %v922_v56  ;;  %v4137_v31 = vstv %s4071_s29 }
 0x4b6   : > { %4813 = vst [vmem:[#allocation55_spill] sm:$0xff] %v4109_v43  ;;  %4814 = vst [vmem:[#allocation56_spill] sm:$0xff] %v4111_v41  ;;  %v1654_v41 = vmul.f32 %v3902_v25, %v3825_v4  ;;  %v1559_v19 = vsel %vm1142_vm2, %v1557_v18, %v1558_v22  ;;  %v834_v21 = vadd.f32 %v831_v26, %v827_v57  ;;  %v4816_v52 = vrot.slane %v4088_v37, 2 }
 0x4b7   : > { %1531 = vrot.lane.b32.xlu0 %v3361_v51, %s4800_s2  ;;  %1500 = vrot.lane.b32.xlu1 %v1497_v54, %s4800_s2  ;;  %v829_v40 = vmul.f32 %v3935_v59, %v3775_v35  ;;  %v833_v13 = vmul.f32 %v3939_v62, %v3819_v6  ;;  %v1560_v54 = vrot.slane %v1553_v17, 5  ;;  %v4152_v43 = vadd.f32 %v1659_v28, %v3970_v2 }
 0x4b8   : > { %v884_v14 = vsel %vm856_vm3, %v882_v30, %v4816_v52  ;;  %v1661_v56 = vadd.f32 %v1658_v60, %v1654_v41  ;;  %v4736_v57 = vrot.slane %v4123_v53, 4  ;;  %v4737_v35 = vrot.slane %v4125_v45, 2 }
 0x4b9   : > { %v4144_v49 = vpop.permute.xlu1 %1639  ;;  %v4146_v51 = vpop.permute.xlu0 %2057  ;;  %v4156_v26 = vadd.f32 %v928_v23, %v924_v9  ;;  %v1687_v18 = vmul.f32 %v3888_v29, %v3247_v15  ;;  %v935_v17 = vrot.slane %v929_v24, 4  ;;  %v1656_v2 = vmul.f32 %v3935_v59, %v3825_v4  ;;  %v4817_v15 = vld [vmem:[#allocation16_spill] sm:$0xff] }
 0x4ba   : > { %4815 = vst [vmem:[#allocation57_spill] sm:$0xff] %v4144_v49  ;;  %v1660_v41 = vmul.f32 %v3939_v62, %v3848_v8  ;;  %v1721_v60 = vmul.f32 %v3960_v58, %v3863_v32  ;;  %v836_v28 = vadd.f32 %v833_v13, %v829_v40  ;;  %v1683_v9 = vmul.f32 %v3902_v25, %v4817_v15 }
 0x4bb   : > { %1562 = vrot.lane.b32.xlu0 %v1559_v19, %s4800_s2  ;;  %1529 = vrot.lane.b32.xlu1 %v3364_v63, %s4800_s2  ;;  %v1718_v23 = vmul.f32 %v3935_v59, %v3828_v46  ;;  %v1722_v63 = vmul.f32 %v3939_v62, %v3863_v32  ;;  %v1561_v4 = vsel %vm1142_vm2, %v1558_v22, %v1560_v54  ;;  %v1668_v19 = vrot.slane %v4152_v43, 2 }
 0x4bc   : > { %v4182_v8 = vadd.f32 %v884_v14, %v834_v21  ;;  %v4186_v40 = vstv %s4120_s6  ;;  %v4191_v13 = vsel %vm909_vm15, %v935_v17, %v4736_v57  ;;  %v1667_v52 = vrot.slane %v1661_v56, 2 }
 0x4bd   : > { %v4177_v24 = vpop.permute.xlu1 %1643  ;;  %v4179_v30 = vpop.permute.xlu0 %2031  ;;  %4820 = vst [vmem:[#allocation59_spill] sm:$0xff] %v4186_v40  ;;  %4821 = vst [vmem:[#allocation60_spill] sm:$0xff] %v4191_v13  ;;  %v892_v15 = vadd.f32 %v4737_v35, %v836_v28  ;;  %v1690_v49 = vadd.f32 %v1687_v18, %v1683_v9  ;;  %v4738_v22 = vrot.slane %v4156_v26, 4  ;;  %v1663_v43 = vadd.f32 %v1660_v41, %v1656_v2  ;;  %v4826_v9 = vld [vmem:[#allocation19_spill] sm:$0xff]  ;;  %v4829_v35 = vld [vmem:[#allocation17_spill] sm:$0xff] }
 0x4be   : > { %4818 = vst [vmem:[#allocation16_spill] sm:$0xff] %v4179_v30  ;;  %4819 = vst [vmem:[#allocation58_spill] sm:$0xff] %v4182_v8  ;;  %v4822_v30 = vld [vmem:[#allocation25_spill] sm:$0xff]  ;;  %v4200_v21 = vadd.f32 %v1721_v60, %v3978_v61  ;;  %v1720_v54 = vmul.f32 %v3888_v29, %v3863_v32  ;;  %v1725_v14 = vadd.f32 %v1722_v63, %v1718_v23  ;;  %v4825_v32 = vld [vmem:[#allocation18_spill] sm:$0xff]  ;;  %v4226_v57 = vstv %s4160_s23 }
 0x4bf   : > { %1591 = vrot.lane.b32.xlu0 %v4822_v30, %s4800_s2  ;;  %1564 = vrot.lane.b32.xlu1 %v1561_v4, %s4800_s2  ;;  %v1780_v56 = vmul.f32 %v3935_v59, %v3851_v34  ;;  %v1783_v18 = vmul.f32 %v3960_v58, %v3866_v16  ;;  %v1784_v17 = vmul.f32 %v3939_v62, %v3866_v16  ;;  %v1696_v30 = vrot.slane %v1690_v49, 2 }
 0x4c0   : > { %v1669_v61 = vsel %vm856_vm3, %v1667_v52, %v1668_v19  ;;  %v1716_v41 = vmul.f32 %v3902_v25, %v3828_v46  ;;  %v1749_v60 = vmul.f32 %v3888_v29, %v4825_v32  ;;  %v1868_v23 = vmul.f32 %v3960_v58, %v4826_v9  ;;  %v4828_v52 = vld [vmem:[#allocation26_spill] sm:$0xff] }
 0x4c1   : > { %v4210_v28 = vpop.permute.xlu1 %2055  ;;  %v4212_v2 = vpop.permute.xlu0 %988  ;;  %v945_v63 = vadd.f32 %v4738_v22, %v892_v15  ;;  %v1839_v4 = vmul.f32 %v3960_v58, %v3907_v38  ;;  %v1730_v46 = vrot.slane %v4200_v21, 4  ;;  %v1838_v15 = vmul.f32 %v3888_v29, %v3907_v38 }
 0x4c2   : > { %4823 = vst [vmem:[#allocation25_spill] sm:$0xff] %v4210_v28  ;;  %4824 = vst [vmem:[#allocation61_spill] sm:$0xff] %v4212_v2  ;;  %v1723_v32 = vadd.f32 %v1720_v54, %v1716_v41  ;;  %v1745_v28 = vmul.f32 %v3902_v25, %v4829_v35  ;;  %v1670_v49 = vrot.slane %v1663_v43, 2  ;;  %v1732_v22 = vrot.slane %v1725_v14, 4 }
 0x4c3   : > { %1672 = vrot.lane.b32.xlu0 %v1669_v61, %s4827_s11  ;;  %1593 = vrot.lane.b32.xlu1 %v4828_v52, %s4800_s2  ;;  %v1786_v2 = vadd.f32 %v1783_v18, %v3982_v12  ;;  %v1787_v13 = vadd.f32 %v1784_v17, %v1780_v56  ;;  %v4240_v52 = vadd.f32 %v1868_v23, %v3986_v55  ;;  %v4830_v54 = vrot.slane %v3491_v42, 2  ;;  %s2605_s2 = scalar_lea.vmem %s4622_s21, 256 }
 0x4c4   : > { %v1752_v40 = vadd.f32 %v1749_v60, %v1745_v28  ;;  %v1834_v21 = vmul.f32 %v3902_v25, %v3858_v50  ;;  %v1782_v35 = vmul.f32 %v3888_v29, %v3866_v16  ;;  %v1671_v12 = vsel %vm856_vm3, %v1668_v19, %v1670_v49  ;;  %p2606_p8 = scmp.ne.s32.totalorder %s4622_s21, %s2605_s2  ;;  %p2613_p9 = scmp.lt.s32.totalorder %s2611_s28, %s2605_s2 }
 0x4c5   : > { %v4237_v8 = vpop.permute.xlu1 %2029  ;;  %v993_v61 = vpop.permute.xlu0 %992  ;;  %v1698_v43 = vsel %vm856_vm3, %v1696_v30, %v4830_v54  ;;  %v4251_v14 = vadd.f32 %v1839_v4, %v4000_v36  ;;  %v1929_v56 = vmul.f32 %v3888_v29, %v3377_v3  ;;  %v1733_v55 = vsel %vm909_vm15, %v1730_v46, %v1732_v22 }
 0x4c6   : > { %v1729_v18 = vrot.slane %v1723_v32, 4  ;;  %v1841_v16 = vadd.f32 %v1838_v15, %v1834_v21  ;;  %v1778_v42 = vmul.f32 %v3902_v25, %v3851_v34  ;;  %v999_v17 = vadd.f32 %v993_v61, %v945_v63  ;;  %p2607_p2 = pnand %p2606_p8, %p4892_p0  ;;  %p2614_p13 = por %p2613_p9, %p2612_p4 }
 0x4c7   : > { %1701 = vrot.lane.b32.xlu0 %v1698_v43, %s4827_s11  ;;  %1674 = vrot.lane.b32.xlu1 %v1671_v12, %s4827_s11  ;;  %v1792_v28 = vrot.slane %v1786_v2, 6  ;;  %v1925_v36 = vmul.f32 %v3902_v25, %v3291_v48  ;;  %v1867_v19 = vmul.f32 %v3888_v29, %v4826_v9  ;;  %v1794_v60 = vrot.slane %v1787_v13, 6  ;;  %v4831_v48 = vld [vmem:[#allocation32_spill] sm:$0xff] }
 0x4c8   : > { %v1758_v23 = vrot.slane %v1752_v40, 4  ;;  %v1877_v30 = vrot.slane %v4240_v52, 1  ;;  %v1785_v22 = vadd.f32 %v1782_v35, %v1778_v42  ;;  %v4740_v32 = vrot.slane %v4251_v14, 1  ;;  %v4832_v40 = vld [vmem:[#allocation39_spill] sm:$0xff]  ;;  %v4851_v52 = vld [vmem:[#allocation28_spill] sm:$0xff]  ;;  %p2608_p5 = pneg %p2607_p2 }
 0x4c9   : > { %v1056_v3 = vpop.permute.xlu1 %1055  ;;  %v1119_v41 = vpop.permute.xlu0 %1118  ;;  %v1932_v15 = vadd.f32 %v1929_v56, %v1925_v36  ;;  %v1863_v34 = vmul.f32 %v3902_v25, %v3288_v47  ;;  %v1847_v2 = vrot.slane %v1841_v16, 1  ;;  %v1898_v13 = vmul.f32 %v3935_v59, %v3869_v44 }
 0x4ca   : > { %v1062_v4 = vadd.f32 %v1056_v3, %v999_v17  ;;  %v1901_v9 = vmul.f32 %v3960_v58, %v4832_v40  ;;  %v1902_v63 = vmul.f32 %v3939_v62, %v4832_v40  ;;  %v1836_v47 = vmul.f32 %v3935_v59, %v3858_v50  ;;  %v4834_v17 = vld [vmem:[#allocation33_spill] sm:$0xff]  ;;  %v4836_v3 = vld [vmem:[#allocation23_spill] sm:$0xff]  ;;  %p2615_p11 = pnand %p2614_p13, %p2608_p5 }
 0x4cb   : > { %1736 = vrot.lane.b32.xlu0 %v1733_v55, %s4827_s11  ;;  %1703 = vrot.lane.b32.xlu1 %v4831_v48, %s4827_s11  ;;  %v1870_v61 = vadd.f32 %v1867_v19, %v1863_v34  ;;  %v1840_v21 = vmul.f32 %v3939_v62, %v3907_v38  ;;  %v1731_v43 = vsel %vm909_vm15, %v1729_v18, %v1730_v46  ;;  %v1791_v56 = vrot.slane %v1785_v22, 6  ;;  %v4833_v55 = vld [vmem:[#allocation21_spill] sm:$0xff]  ;;  %v4838_v18 = vld [vmem:[#allocation34_spill] sm:$0xff] }
 0x4cc   : > { %v1125_v49 = vadd.f32 %v1119_v41, %v1062_v4  ;;  %v1795_v12 = vsel %vm962_vm4, %v1792_v28, %v1794_v60  ;;  %v1992_v16 = vmul.f32 %v3960_v58, %v4833_v55  ;;  %v4835_v36 = vrot.slane %v4834_v17, 4  ;;  %v4840_v34 = vld [vmem:[#allocation45_spill] sm:$0xff] }
 0x4cd   : > { %v1182_v35 = vpop.permute.xlu1 %1181  ;;  %v1354_v54 = vpop.permute.xlu0 %1353  ;;  %v4837_v50 = vrot.slane %v4836_v3, 1  ;;  %v4296_v46 = vsel %vm1016_vm0, %v1847_v2, %v4740_v32  ;;  %v1793_v41 = vsel %vm962_vm4, %v1791_v56, %v1792_v28  ;;  %v1938_v60 = vrot.slane %v1932_v15, 3  ;;  %v4843_v15 = vld [vmem:[#allocation40_spill] sm:$0xff] }
 0x4ce   : > { %v1188_v42 = vadd.f32 %v1182_v35, %v1125_v49  ;;  %v1760_v19 = vsel %vm909_vm15, %v1758_v23, %v4835_v36  ;;  %v4839_v23 = vld [vmem:[#allocation46_spill] sm:$0xff]  ;;  %v1905_v4 = vadd.f32 %v1902_v63, %v1898_v13  ;;  %v1876_v49 = vrot.slane %v1870_v61, 1  ;;  %v4841_v35 = vld [vmem:[#allocation44_spill] sm:$0xff] }
 0x4cf   : > { %v1880_v38 = vsel %vm1016_vm0, %v1877_v30, %v4837_v50  ;;  %1765 = vrot.lane.b32.xlu0 %v4838_v18, %s4827_s11  ;;  %1734 = vrot.lane.b32.xlu1 %v1731_v43, %s4827_s11  ;;  %v4303_v22 = vadd.f32 %v1901_v9, %v4839_v23  ;;  %v1843_v2 = vadd.f32 %v1840_v21, %v1836_v47  ;;  %v4842_v43 = vld [vmem:[#allocation47_spill] sm:$0xff]  ;;  %v4844_v61 = vstv %s3860_s5 }
 0x4d0   : > { %v1236_v48 = vadd.f32 %v4840_v34, %v1188_v42  ;;  %v848_v17 = vmul.f32 %v3960_v58, %v4841_v35  ;;  %v4311_v50 = vadd.f32 %v1992_v16, %v4842_v43  ;;  %v1958_v28 = vmul.f32 %v3902_v25, %v3872_v10  ;;  %v4845_v16 = vld [vmem:[#allocation36_spill] sm:$0xff] }
 0x4d1   : > { %v1292_v36 = vpop.permute.xlu1 %1291  ;;  %v1472_v3 = vpop.permute.xlu0 %1471  ;;  %v1962_v13 = vmul.f32 %v3888_v29, %v4843_v15  ;;  %v1963_v9 = vmul.f32 %v3960_v58, %v4843_v15  ;;  %v819_v47 = vmul.f32 %v3960_v58, %v4844_v61  ;;  %v845_v21 = vmul.f32 %v3935_v59, %v3893_v0 }
 0x4d2   : > { %v1298_v63 = vadd.f32 %v1292_v36, %v1236_v48  ;;  %v849_v56 = vmul.f32 %v3939_v62, %v4841_v35  ;;  %v4846_v42 = vrot.slane %v4845_v16, 3  ;;  %v1910_v23 = vrot.slane %v4303_v22, 3 }
 0x4d3   : > { %1798 = vrot.lane.b32.xlu0 %v1795_v12, %s4827_s11  ;;  %1763 = vrot.lane.b32.xlu1 %v1760_v19, %s4827_s11  ;;  %v1912_v34 = vrot.slane %v1905_v4, 3  ;;  %v1900_v48 = vmul.f32 %v3888_v29, %v4832_v40  ;;  %v1850_v43 = vrot.slane %v1843_v2, 1  ;;  %v4335_v61 = vadd.f32 %v848_v17, %v4036_v11 }
 0x4d4   : > { %v1940_v18 = vsel %vm1079_vm1, %v1938_v60, %v4846_v42  ;;  %v1360_v36 = vadd.f32 %v1354_v54, %v1298_v63  ;;  %v901_v12 = vmul.f32 %v3960_v58, %v4065_v7  ;;  %v4741_v60 = vrot.slane %v4311_v50, 5  ;;  %v4847_v54 = vld [vmem:[#allocation48_spill] sm:$0xff]  ;;  %v4849_v63 = vld [vmem:[#allocation35_spill] sm:$0xff]  ;;  %v4852_v42 = vld [vmem:[#allocation29_spill] sm:$0xff] }
 0x4d5   : > { %v4339_v32 = vpop.permute.xlu1 %1405  ;;  %v1596_v19 = vpop.permute.xlu0 %1595  ;;  %v1965_v16 = vadd.f32 %v1962_v13, %v1958_v28  ;;  %v4343_v22 = vadd.f32 %v1963_v9, %v4016_v20  ;;  %v1896_v40 = vmul.f32 %v3902_v25, %v3869_v44  ;;  %v821_v4 = vadd.f32 %v819_v47, %v4847_v54 }
 0x4d6   : > { %v852_v11 = vadd.f32 %v849_v56, %v845_v21  ;;  %v898_v2 = vmul.f32 %v3935_v59, %v3896_v5  ;;  %v902_v17 = vmul.f32 %v3939_v62, %v4065_v7  ;;  %v1878_v20 = vsel %vm1016_vm0, %v1876_v49, %v1877_v30 }
 0x4d7   : > { %1883 = vrot.lane.b32.xlu0 %v1880_v38, %s4848_s26  ;;  %1821 = vrot.lane.b32.xlu1 %v4849_v63, %s4848_s26  ;;  %v1913_v44 = vsel %vm1079_vm1, %v1910_v23, %v1912_v34  ;;  %v1903_v28 = vadd.f32 %v1900_v48, %v1896_v40  ;;  %v4362_v13 = vstv %s4305_s1  ;;  %v4850_v9 = vrot.slane %v4251_v14, 1 }
 0x4d8   : > { %v858_v38 = vrot.slane %v4335_v61, 2  ;;  %v4369_v21 = vadd.f32 %v901_v12, %v4048_v27  ;;  %v2102_v30 = vmul.f32 %v3960_v58, %v4851_v52  ;;  %v4853_v34 = vrot.slane %v4852_v42, 5 }
 0x4d9   : > { %v1851_v47 = vsel %vm1016_vm0, %v4850_v9, %v1850_v43  ;;  %v1410_v49 = vpop.permute.xlu1 %1409  ;;  %v1706_v56 = vpop.permute.xlu0 %1705  ;;  %v1971_v14 = vrot.slane %v1965_v16, 5  ;;  %v1972_v43 = vrot.slane %v4343_v22, 5  ;;  %v954_v40 = vmul.f32 %v3960_v58, %v4105_v39 }
 0x4da   : > { %v4378_v48 = vsel %vm1142_vm2, %v4741_v60, %v4853_v34  ;;  %v1416_v27 = vadd.f32 %v1410_v49, %v1360_v36  ;;  %v4854_v12 = vstv %s3930_s0  ;;  %v860_v63 = vrot.slane %v852_v11, 2  ;;  %v4856_v49 = vld [vmem:[#allocation20_spill] sm:$0xff] }
 0x4db   : > { %v823_v54 = vadd.f32 %v821_v4, %v4854_v12  ;;  %v905_v9 = vadd.f32 %v902_v17, %v898_v2  ;;  %1852 = vrot.lane.b32.xlu0 %v4296_v46, %s4848_s26  ;;  %1796 = vrot.lane.b32.xlu1 %v1793_v41, %s4827_s11  ;;  %v1909_v42 = vrot.slane %v1903_v28, 3  ;;  %v951_v34 = vmul.f32 %v3935_v59, %v3913_v33 }
 0x4dc   : > { %v955_v16 = vmul.f32 %v3939_v62, %v4105_v39  ;;  %v1991_v60 = vmul.f32 %v3888_v29, %v4833_v55  ;;  %v1478_v36 = vadd.f32 %v1472_v3, %v1416_v27  ;;  %v861_v4 = vsel %vm856_vm3, %v858_v38, %v860_v63  ;;  %v4855_v3 = vld [vmem:[#allocation51_spill] sm:$0xff] }
 0x4dd   : > { %v911_v11 = vrot.slane %v4369_v21, 4  ;;  %v4399_v46 = vadd.f32 %v2102_v30, %v4057_v1  ;;  %v1534_v41 = vpop.permute.xlu1 %1533  ;;  %v4401_v2 = vpop.permute.xlu0 %1819  ;;  %v4406_v17 = vsel %vm1142_vm2, %v1971_v14, %v1972_v43  ;;  %v4409_v55 = vsel %vm1079_vm1, %v1909_v42, %v1910_v23 }
 0x4de   : > { %v4412_v28 = vadd.f32 %v954_v40, %v4855_v3  ;;  %v1987_v27 = vmul.f32 %v3902_v25, %v4856_v49  ;;  %v1540_v1 = vadd.f32 %v1534_v41, %v1478_v36  ;;  %v913_v30 = vrot.slane %v905_v9, 4  ;;  %v4860_v3 = vld [vmem:[#allocation52_spill] sm:$0xff] }
 0x4df   : > { %v832_v12 = vmul.f32 %v3960_v58, %v3819_v6  ;;  %v847_v63 = vmul.f32 %v3888_v29, %v4841_v35  ;;  %1943 = vrot.lane.b32.xlu0 %v1940_v18, %s4848_s26  ;;  %1881 = vrot.lane.b32.xlu1 %v1878_v20, %s4848_s26  ;;  %v4422_v23 = vadd.f32 %v861_v4, %v823_v54  ;;  %v4427_v42 = vstv %s4359_s4 }
 0x4e0   : > { %v4424_v14 = vadd.f32 %v955_v16, %v951_v34  ;;  %v1994_v40 = vadd.f32 %v1991_v60, %v1987_v27  ;;  %v1602_v36 = vadd.f32 %v1596_v19, %v1540_v1  ;;  %v4432_v6 = vsel %vm909_vm15, %v911_v11, %v913_v30 }
 0x4e1   : > { %v2111_v35 = vrot.slane %v4399_v46, 2  ;;  %v843_v18 = vmul.f32 %v3902_v25, %v3893_v0  ;;  %v1768_v20 = vpop.permute.xlu1 %1767  ;;  %v1824_v54 = vpop.permute.xlu0 %1823  ;;  %v4857_v9 = vrot.slane %v4125_v45, 2  ;;  %v4858_v60 = vrot.slane %v4088_v37, 2  ;;  %v4878_v46 = vld [vmem:[#allocation61_spill] sm:$0xff] }
 0x4e2   : > { %v1960_v19 = vmul.f32 %v3935_v59, %v3872_v10  ;;  %v1964_v16 = vmul.f32 %v3939_v62, %v4843_v15  ;;  %v4859_v4 = vstv %s3860_s5  ;;  %v1650_v0 = vadd.f32 %v4177_v24, %v1602_v36  ;;  %v4864_v36 = vld [vmem:[#allocation31_spill] sm:$0xff] }
 0x4e3   : > { %v886_v34 = vsel %vm856_vm3, %v4858_v60, %v4857_v9  ;;  %v818_v41 = vmul.f32 %v3888_v29, %v4859_v4  ;;  %v835_v49 = vadd.f32 %v832_v12, %v4860_v3  ;;  %v4861_v27 = vrot.slane %v4156_v26, 4  ;;  %1916 = vrot.lane.b32.xlu0 %v1913_v44, %s4848_s26  ;;  %1854 = vrot.lane.b32.xlu1 %v1851_v47, %s4848_s26  ;;  %v4866_v60 = vld [vmem:[#allocation41_spill] sm:$0xff]  ;;  %v4867_v3 = vld [vmem:[#allocation43_spill] sm:$0xff] }
 0x4e4   : > { %v4862_v45 = vrot.slane %v4123_v53, 4  ;;  %v850_v1 = vadd.f32 %v847_v63, %v843_v18  ;;  %v2000_v10 = vrot.slane %v1994_v40, 5  ;;  %v2072_v15 = vmul.f32 %v3888_v29, %v4137_v31 }
 0x4e5   : > { %v2073_v24 = vmul.f32 %v3960_v58, %v4137_v31  ;;  %v4863_v30 = vstv %s3798_s13  ;;  %v1712_v26 = vadd.f32 %v1706_v56, %v1650_v0  ;;  %v4865_v53 = vrot.slane %v4864_v36, 2  ;;  %v1886_v40 = vpop.permute.xlu1 %1885  ;;  %v1948_v18 = vpop.permute.xlu0 %1947  ;;  %s4874_s13 = smov 122  }
 0x4e6   : > { %v939_v37 = vsel %vm909_vm15, %v4862_v45, %v4861_v27  ;;  %v815_v12 = vmul.f32 %v3902_v25, %v4863_v30  ;;  %v891_v44 = vadd.f32 %v886_v34, %v835_v49  ;;  %v900_v47 = vmul.f32 %v3888_v29, %v4065_v7  ;;  %v4868_v7 = vld [vmem:[#allocation37_spill] sm:$0xff] }
 0x4e7   : > { %v2114_v63 = vsel %vm856_vm3, %v2111_v35, %v4865_v53  ;;  %v1967_v9 = vadd.f32 %v1964_v16, %v1960_v19  ;;  %v2068_v4 = vmul.f32 %v3902_v25, %v4866_v60  ;;  %v2069_v27 = vmul.f32 %v4867_v3, %v4866_v60  ;;  %2007 = vrot.lane.b32.xlu0 %v4378_v48, %s4848_s26 }
 0x4e8   : > { %v820_v56 = vadd.f32 %v818_v41, %v815_v12  ;;  %v1774_v0 = vadd.f32 %v1768_v20, %v1712_v26  ;;  %v857_v45 = vrot.slane %v850_v1, 2  ;;  %v896_v30 = vmul.f32 %v3902_v25, %v3896_v5  ;;  %1945 = vrot.lane.b32.xlu1 %v4868_v7, %s4848_s26 }
 0x4e9   : > { %v953_v34 = vmul.f32 %v3888_v29, %v4105_v39  ;;  %v964_v19 = vrot.slane %v4412_v28, 6  ;;  %v4869_v16 = vrot.slane %v4311_v50, 5  ;;  %v2075_v41 = vadd.f32 %v2072_v15, %v2068_v4  ;;  %v2010_v12 = vpop.permute.xlu1 %2009  ;;  %v2182_v26 = vpop.permute.xlu0 %2181  ;;  %v4872_v4 = vld [vmem:[#allocation27_spill] sm:$0xff] }
 0x4ea   : > { %v4488_v49 = vadd.f32 %v2073_v24, %v2069_v27  ;;  %v1830_v1 = vadd.f32 %v1824_v54, %v1774_v0  ;;  %v903_v5 = vadd.f32 %v900_v47, %v896_v30  ;;  %v949_v39 = vmul.f32 %v3902_v25, %v3913_v33 }
 0x4eb   : > { %v2002_v20 = vsel %vm1142_vm2, %v2000_v10, %v4869_v16  ;;  %v859_v48 = vsel %vm856_vm3, %v857_v45, %v858_v38  ;;  %v944_v36 = vadd.f32 %v939_v37, %v891_v44  ;;  %v4870_v53 = vstv %s3930_s0  ;;  %v4871_v10 = vld [vmem:[#allocation24_spill] sm:$0xff]  ;;  %1976 = vrot.lane.b32.xlu0 %v4406_v17, %s4848_s26  ;;  %v4873_v37 = vld [vmem:[#allocation22_spill] sm:$0xff]  ;;  %s2234_s0 = scalar_lea.sflag [#allocation9], %s2878_s25 }
 0x4ec   : > { %v822_v7 = vadd.f32 %v820_v56, %v4870_v53  ;;  %v2101_v50 = vmul.f32 %v3888_v29, %v4851_v52  ;;  %v2164_v15 = vmul.f32 %v3960_v58, %v4871_v10  ;;  %v1892_v54 = vadd.f32 %v1886_v40, %v1830_v1  ;;  %1914 = vrot.lane.b32.xlu1 %v4409_v55, %s4848_s26 }
 0x4ed   : > { %v1974_v24 = vrot.slane %v1967_v9, 5  ;;  %v956_v47 = vadd.f32 %v953_v34, %v949_v39  ;;  %v2097_v33 = vmul.f32 %v3902_v25, %v4872_v4  ;;  %v2082_v61 = vrot.slane %v4488_v49, 2  ;;  %v2120_v0 = vpop.permute.xlu1 %2119  ;;  %v4514_v17 = vpop.permute.xlu0 %1024  ;;  %v4875_v39 = vld [vmem:[#allocation59_spill] sm:$0xff] }
 0x4ee   : > { %v864_v38 = vadd.f32 %v859_v48, %v822_v7  ;;  %v2160_v52 = vmul.f32 %v4867_v3, %v4873_v37  ;;  %v2163_v44 = vmul.f32 %v3888_v29, %v4871_v10  ;;  %v1954_v40 = vadd.f32 %v1948_v18, %v1892_v54 }
 0x4ef   : > { %v2081_v9 = vrot.slane %v2075_v41, 2  ;;  %v910_v27 = vrot.slane %v903_v5, 4  ;;  %v2159_v56 = vmul.f32 %v3902_v25, %v4873_v37  ;;  %v2104_v45 = vadd.f32 %v2101_v50, %v2097_v33  ;;  %2117 = vrot.lane.b32.xlu0 %v2114_v63, %s4874_s13 }
 0x4f0   : > { %v4516_v55 = vadd.f32 %v2164_v15, %v2160_v52  ;;  %v2070_v30 = vmul.f32 %v3935_v59, %v4866_v60  ;;  %v2074_v34 = vmul.f32 %v3939_v62, %v4137_v31  ;;  %v2016_v16 = vadd.f32 %v2010_v12, %v1954_v40  ;;  %2005 = vrot.lane.b32.xlu1 %v2002_v20, %s4848_s26 }
 0x4f1   : > { %v1975_v18 = vsel %vm1142_vm2, %v1972_v43, %v1974_v24  ;;  %v912_v41 = vsel %vm909_vm15, %v910_v27, %v911_v11  ;;  %v2135_v1 = vmul.f32 %v3960_v58, %v4226_v57  ;;  %v2083_v31 = vsel %vm856_vm3, %v2081_v9, %v2082_v61  ;;  %v991_v48 = vpop.permute.xlu1 %990  ;;  %v1054_v20 = vpop.permute.xlu0 %1053 }
 0x4f2   : > { %v963_v60 = vrot.slane %v956_v47, 6  ;;  %v917_v5 = vadd.f32 %v912_v41, %v864_v38  ;;  %v2166_v22 = vadd.f32 %v2163_v44, %v2159_v56  ;;  %v2064_v43 = vadd.f32 %v4146_v51, %v2016_v16  ;;  %v4877_v44 = vld [vmem:[#allocation60_spill] sm:$0xff] }
 0x4f3   : > { %v2131_v21 = vmul.f32 %v4867_v3, %v4875_v39  ;;  %v2132_v11 = vmul.f32 %v3935_v59, %v4875_v39  ;;  %v2136_v63 = vmul.f32 %v3939_v62, %v4226_v57  ;;  %v2110_v53 = vrot.slane %v2104_v45, 2  ;;  %2086 = vrot.lane.b32.xlu0 %v2083_v31, %s4874_s13 }
 0x4f4   : > { %v965_v12 = vsel %vm962_vm4, %v963_v60, %v964_v19  ;;  %v2173_v7 = vrot.slane %v4516_v55, 4  ;;  %v2077_v50 = vadd.f32 %v2074_v34, %v2070_v30  ;;  %v2126_v51 = vadd.f32 %v2120_v0, %v2064_v43  ;;  %1978 = vrot.lane.b32.xlu1 %v1975_v18, %s4848_s26 }
 0x4f5   : > { %v998_v10 = vadd.f32 %v991_v48, %v944_v36  ;;  %v2138_v15 = vadd.f32 %v2135_v1, %v2131_v21  ;;  %v2197_v54 = vmul.f32 %v3960_v58, %v4427_v42  ;;  %v970_v24 = vadd.f32 %v965_v12, %v917_v5  ;;  %v4876_v58 = vld [vmem:[#allocation58_spill] sm:$0xff]  ;;  %v1023_v56 = vpop.permute.xlu1 %1022 }
 0x4f6   : > { %v2172_v47 = vrot.slane %v2166_v22, 4  ;;  %v2193_v4 = vmul.f32 %v4867_v3, %v4362_v13  ;;  %v2194_v33 = vmul.f32 %v3935_v59, %v4362_v13  ;;  %v4554_v38 = vadd.f32 %v2182_v26, %v2126_v51  ;;  %v1086_v3 = vpop.permute.xlu0 %1085 }
 0x4f7   : > { %v1061_v37 = vadd.f32 %v1054_v20, %v998_v10  ;;  %v2139_v36 = vadd.f32 %v2136_v63, %v2132_v11  ;;  %v2198_v52 = vmul.f32 %v3939_v62, %v4427_v42  ;;  %v943_v40 = vadd.f32 %v4877_v44, %v4876_v58  ;;  %v4879_v63 = vld [vmem:[#allocation30_spill] sm:$0xff] }
 0x4f8   : > { %v918_v9 = vadd.f32 %v4432_v6, %v4422_v23  ;;  %v966_v27 = vrot.slane %v4424_v14, 6  ;;  %v2112_v59 = vsel %vm856_vm3, %v2110_v53, %v2111_v35  ;;  %v1028_v26 = vadd.f32 %v1023_v56, %v970_v24 }
 0x4f9   : > { %v2174_v0 = vsel %vm909_vm15, %v2172_v47, %v2173_v7  ;;  %v2144_v45 = vrot.slane %v2138_v15, 4  ;;  %v2200_v55 = vadd.f32 %v2197_v54, %v2193_v4  ;;  %2115 = vrot.lane.b32.xlu1 %v2112_v59, %s4874_s13  ;;  %v2084_v23 = vrot.slane %v2077_v50, 2  ;;  %v1052_v18 = vpop.permute.xlu1 %1051  ;;  %v4881_v15 = vld [vmem:[#allocation49_spill] sm:$0xff] }
 0x4fa   : > { %v967_v62 = vsel %vm962_vm4, %v964_v19, %v966_v27  ;;  %2177 = vrot.lane.b32.xlu0 %v2174_v0, %s4874_s13  ;;  %v2134_v14 = vmul.f32 %v3888_v29, %v4226_v57  ;;  %v997_v6 = vadd.f32 %v4878_v46, %v943_v40  ;;  %v1091_v35 = vadd.f32 %v1086_v3, %v1028_v26  ;;  %v1115_v41 = vpop.permute.xlu0 %1114  ;;  %v4884_v0 = vld [vmem:[#allocation42_spill] sm:$0xff] }
 0x4fb   : > { %v2146_v30 = vrot.slane %v2139_v36, 4  ;;  %v2201_v34 = vadd.f32 %v2198_v52, %v2194_v33  ;;  %v971_v16 = vadd.f32 %v967_v62, %v918_v9  ;;  %v2130_v28 = vmul.f32 %v3902_v25, %v4875_v39  ;;  %v4882_v36 = vld [vmem:[#allocation53_spill] sm:$0xff]  ;;  %v4883_v9 = vld [vmem:[#allocation38_spill] sm:$0xff] }
 0x4fc   : > { %v1060_v19 = vadd.f32 %v1052_v18, %v997_v6  ;;  %v2085_v1 = vsel %vm856_vm3, %v2082_v61, %v2084_v23  ;;  %v2206_v60 = vrot.slane %v2200_v55, 6  ;;  %v2196_v57 = vmul.f32 %v3888_v29, %v4427_v42 }
 0x4fd   : > { %v2147_v31 = vsel %vm909_vm15, %v2144_v45, %v2146_v30  ;;  %2088 = vrot.lane.b32.xlu1 %v2085_v1, %s4874_s13  ;;  %v1029_v5 = vadd.f32 %v4514_v17, %v971_v16  ;;  %v2208_v43 = vrot.slane %v2201_v34, 6  ;;  %v2137_v39 = vadd.f32 %v2134_v14, %v2130_v28  ;;  %v1088_v21 = vpop.permute.xlu1 %1087 }
 0x4fe   : > { %2150 = vrot.lane.b32.xlu0 %v2147_v31, %s4874_s13  ;;  %v1123_v22 = vadd.f32 %v1115_v41, %v1060_v19  ;;  %v1151_v11 = vpop.permute.xlu0 %1150  ;;  %v4880_v61 = vrot.slane %v4879_v63, 4  ;;  %v2192_v12 = vmul.f32 %v3902_v25, %v4362_v13 }
 0x4ff   : > { %v1092_v49 = vadd.f32 %v1088_v21, %v1029_v5  ;;  %v2209_v20 = vsel %vm962_vm4, %v2206_v60, %v2208_v43  ;;  %v2143_v42 = vrot.slane %v2137_v39, 4 }
 0x500   : > { %v2176_v48 = vsel %vm909_vm15, %v2173_v7, %v4880_v61  ;;  %v2199_v17 = vadd.f32 %v2196_v57, %v2192_v12 }
 0x501   : > { %2179 = vrot.lane.b32.xlu1 %v2176_v48, %s4874_s13  ;;  %v1155_v29 = vadd.f32 %v1151_v11, %v1092_v49  ;;  %v1117_v53 = vpop.permute.xlu1 %1116  ;;  %v2145_v10 = vsel %vm909_vm15, %v2143_v42, %v2144_v45 }
 0x502   : > { %2212 = vrot.lane.b32.xlu0 %v2209_v20, %s4874_s13  ;;  %v1180_v50 = vpop.permute.xlu0 %1179  ;;  %v1124_v51 = vadd.f32 %v1117_v53, %v1061_v37  ;;  %v2205_v24 = vrot.slane %v2199_v17, 6 }
 0x503   : > { %v1208_v54 = vadd.f32 %v4881_v15, %v1155_v29 }
 0x504   : > { %v1187_v7 = vadd.f32 %v1180_v50, %v1124_v51  ;;  %v2207_v33 = vsel %vm962_vm4, %v2205_v24, %v2206_v60 }
 0x505   : > { %2148 = vrot.lane.b32.xlu1 %v2145_v10, %s4874_s13  ;;  %v1149_v47 = vpop.permute.xlu1 %1148 }
 0x506   : > { %v1261_v25 = vpop.permute.xlu0 %1260  ;;  %v1154_v13 = vadd.f32 %v1149_v47, %v1091_v35  ;;  %v1235_v52 = vadd.f32 %v4882_v36, %v1187_v7 }
 0x507   : > { %v1265_v4 = vadd.f32 %v1261_v25, %v1208_v54 }
 0x508   : > { %v1207_v27 = vadd.f32 %v4883_v9, %v1154_v13 }
 0x509   : > { %2210 = vrot.lane.b32.xlu1 %v2207_v33, %s4874_s13  ;;  %v1178_v58 = vpop.permute.xlu1 %1177 }
 0x50a   : > { %v1290_v37 = vpop.permute.xlu0 %1289  ;;  %v1186_v44 = vadd.f32 %v1178_v58, %v1123_v22 }
 0x50b   : > { %v1297_v40 = vadd.f32 %v1290_v37, %v1235_v52 }
 0x50c   : > { %v1234_v45 = vadd.f32 %v4884_v0, %v1186_v44 }
 0x50d   : > { %v1259_v56 = vpop.permute.xlu1 %1258 }
 0x50e   : > { %v1321_v3 = vpop.permute.xlu0 %1320  ;;  %v1264_v59 = vadd.f32 %v1259_v56, %v1207_v27  ;;  %v4885_v27 = vld [vmem:[#allocation57_spill] sm:$0xff] }
 0x510   : > { %v1326_v26 = vadd.f32 %v1321_v3, %v1264_v59 }
 0x511   : > { %v1288_v55 = vpop.permute.xlu1 %1287 }
 0x512   : > { %v1350_v62 = vpop.permute.xlu0 %1349  ;;  %v1296_v23 = vadd.f32 %v1288_v55, %v1234_v45  ;;  %v4886_v45 = vld [vmem:[#allocation50_spill] sm:$0xff] }
 0x514   : > { %v1358_v14 = vadd.f32 %v1350_v62, %v1296_v23  ;;  %v4887_v62 = vld [vmem:[#allocation54_spill] sm:$0xff] }
 0x515   : > { %v1323_v46 = vpop.permute.xlu1 %1322 }
 0x516   : > { %v1385_v6 = vpop.permute.xlu0 %1384  ;;  %v1327_v35 = vadd.f32 %v1323_v46, %v1265_v4  ;;  %v1414_v30 = vadd.f32 %v4339_v32, %v1358_v14 }
 0x518   : > { %v1389_v34 = vadd.f32 %v1385_v6, %v1327_v35 }
 0x519   : > { %v1352_v16 = vpop.permute.xlu1 %1351 }
 0x51a   : > { %v1408_v18 = vpop.permute.xlu0 %1407  ;;  %v1359_v51 = vadd.f32 %v1352_v16, %v1297_v40 }
 0x51c   : > { %v1415_v54 = vadd.f32 %v1408_v18, %v1359_v51 }
 0x51d   : > { %v1383_v41 = vpop.permute.xlu1 %1382 }
 0x51e   : > { %v1439_v28 = vpop.permute.xlu0 %1438  ;;  %v1388_v19 = vadd.f32 %v1383_v41, %v1326_v26 }
 0x520   : > { %v1444_v3 = vadd.f32 %v1439_v28, %v1388_v19 }
 0x521   : > { %v1441_v1 = vpop.permute.xlu1 %1440 }
 0x522   : > { %v1468_v31 = vpop.permute.xlu0 %1467  ;;  %v1445_v13 = vadd.f32 %v1441_v1, %v1389_v34  ;;  %v4888_v1 = vld [vmem:[#allocation55_spill] sm:$0xff] }
 0x523   : > { %v1476_v15 = vadd.f32 %v1468_v31, %v1414_v30 }
 0x525   : > { %v1470_v60 = vpop.permute.xlu1 %1469 }
 0x526   : > { %v1503_v57 = vpop.permute.xlu0 %1502  ;;  %v1477_v4 = vadd.f32 %v1470_v60, %v1415_v54 }
 0x527   : > { %v1507_v36 = vadd.f32 %v1503_v57, %v1445_v13  ;;  %v4891_v13 = vld [vmem:[#allocation25_spill] sm:$0xff] }
 0x529   : > { %v1501_v5 = vpop.permute.xlu1 %1500 }
 0x52a   : > { %v1532_v22 = vpop.permute.xlu0 %1531  ;;  %v1506_v0 = vadd.f32 %v1501_v5, %v1444_v3 }
 0x52b   : > { %v1539_v52 = vadd.f32 %v1532_v22, %v1477_v4 }
 0x52d   : > { %v1530_v43 = vpop.permute.xlu1 %1529 }
 0x52e   : > { %v1563_v39 = vpop.permute.xlu0 %1562  ;;  %v1538_v24 = vadd.f32 %v1530_v43, %v1476_v15 }
 0x52f   : > { %v1568_v46 = vadd.f32 %v1563_v39, %v1506_v0 }
 0x531   : > { %v1565_v21 = vpop.permute.xlu1 %1564  ;;  %v1621_v28 = vadd.f32 %v4888_v1, %v1568_v46 }
 0x532   : > { %v1592_v11 = vpop.permute.xlu0 %1591  ;;  %v1569_v44 = vadd.f32 %v1565_v21, %v1507_v36 }
 0x533   : > { %v1600_v33 = vadd.f32 %v1592_v11, %v1538_v24 }
 0x534   : > { %v1622_v55 = vadd.f32 %v4886_v45, %v1569_v44 }
 0x535   : > { %v1594_v49 = vpop.permute.xlu1 %1593  ;;  %v1648_v56 = vadd.f32 %v4885_v27, %v1600_v33 }
 0x536   : > { %v1673_v63 = vpop.permute.xlu0 %1672  ;;  %v1601_v9 = vadd.f32 %v1594_v49, %v1539_v52 }
 0x537   : > { %v1678_v22 = vadd.f32 %v1673_v63, %v1621_v28 }
 0x538   : > { %v1649_v23 = vadd.f32 %v4887_v62, %v1601_v9  ;;  %v2224_v9 = vrot.slane %v4554_v38, 1 }
 0x539   : > { %v1675_v61 = vpop.permute.xlu1 %1674 }
 0x53a   : > { %v1702_v32 = vpop.permute.xlu0 %1701  ;;  %v1679_v6 = vadd.f32 %v1675_v61, %v1622_v55 }
 0x53b   : > { %v1710_v40 = vadd.f32 %v1702_v32, %v1648_v56 }
 0x53d   : > { %v1704_v48 = vpop.permute.xlu1 %1703 }
 0x53e   : > { %v1737_v20 = vpop.permute.xlu0 %1736  ;;  %v1711_v35 = vadd.f32 %v1704_v48, %v1649_v23 }
 0x53f   : > { %v1741_v16 = vadd.f32 %v1737_v20, %v1679_v6 }
 0x541   : > { %v1735_v12 = vpop.permute.xlu1 %1734 }
 0x542   : > { %v1766_v29 = vpop.permute.xlu0 %1765  ;;  %v1740_v21 = vadd.f32 %v1735_v12, %v1678_v22 }
 0x543   : > { %v1773_v18 = vadd.f32 %v1766_v29, %v1711_v35 }
 0x545   : > { %v1764_v42 = vpop.permute.xlu1 %1763 }
 0x546   : > { %v1799_v17 = vpop.permute.xlu0 %1798  ;;  %v1772_v14 = vadd.f32 %v1764_v42, %v1710_v40 }
 0x547   : > { %v1803_v19 = vadd.f32 %v1799_v17, %v1741_v16 }
 0x548   : > { %v1828_v41 = vadd.f32 %v4401_v2, %v1772_v14 }
 0x549   : > { %v1822_v53 = vpop.permute.xlu1 %1821 }
 0x54a   : > { %v1884_v50 = vpop.permute.xlu0 %1883  ;;  %v1829_v31 = vadd.f32 %v1822_v53, %v1773_v18  ;;  %v4889_v53 = vld [vmem:[#allocation56_spill] sm:$0xff] }
 0x54c   : > { %v1891_v11 = vadd.f32 %v1884_v50, %v1829_v31 }
 0x54d   : > { %v1797_v10 = vpop.permute.xlu1 %1796 }
 0x54e   : > { %v1853_v7 = vpop.permute.xlu0 %1852  ;;  %v1802_v32 = vadd.f32 %v1797_v10, %v1740_v21 }
 0x550   : > { %v1858_v15 = vadd.f32 %v1853_v7, %v1802_v32 }
 0x551   : > { %v1882_v47 = vpop.permute.xlu1 %1881 }
 0x552   : > { %v1944_v25 = vpop.permute.xlu0 %1943  ;;  %v1890_v60 = vadd.f32 %v1882_v47, %v1828_v41  ;;  %v4890_v47 = vld [vmem:[#allocation16_spill] sm:$0xff] }
 0x554   : > { %v1952_v39 = vadd.f32 %v1944_v25, %v1890_v60 }
 0x555   : > { %v1855_v58 = vpop.permute.xlu1 %1854 }
 0x556   : > { %v1917_v37 = vpop.permute.xlu0 %1916  ;;  %v1859_v43 = vadd.f32 %v1855_v58, %v1803_v19 }
 0x558   : > { %v1921_v48 = vadd.f32 %v1917_v37, %v1859_v43 }
 0x55a   : > { %v1946_v59 = vpop.permute.xlu1 %1945  ;;  %v2008_v26 = vpop.permute.xlu0 %2007 }
 0x55b   : > { %v1953_v20 = vadd.f32 %v1946_v59, %v1891_v11 }
 0x55d   : > { %v2015_v17 = vadd.f32 %v2008_v26, %v1953_v20 }
 0x55e   : > { %v1915_v30 = vpop.permute.xlu1 %1914  ;;  %v1977_v34 = vpop.permute.xlu0 %1976 }
 0x55f   : > { %v1920_v24 = vadd.f32 %v1915_v30, %v1858_v15  ;;  %v2063_v4 = vadd.f32 %v4891_v13, %v2015_v17 }
 0x561   : > { %v1982_v33 = vadd.f32 %v1977_v34, %v1920_v24 }
 0x562   : > { %v2006_v57 = vpop.permute.xlu1 %2005  ;;  %v2118_v5 = vpop.permute.xlu0 %2117 }
 0x563   : > { %v2014_v29 = vadd.f32 %v2006_v57, %v1952_v39  ;;  %v2125_v36 = vadd.f32 %v2118_v5, %v2063_v4  ;;  %v2035_v27 = vadd.f32 %v4237_v8, %v1982_v33 }
 0x565   : > { %v2062_v54 = vadd.f32 %v4889_v53, %v2014_v29 }
 0x566   : > { %v1979_v49 = vpop.permute.xlu1 %1978  ;;  %v2087_v61 = vpop.permute.xlu0 %2086 }
 0x567   : > { %v1983_v42 = vadd.f32 %v1979_v49, %v1921_v48  ;;  %v2092_v26 = vadd.f32 %v2087_v61, %v2035_v27 }
 0x569   : > { %v2036_v12 = vadd.f32 %v4890_v47, %v1983_v42 }
 0x56b   : > { %v2116_v2 = vpop.permute.xlu1 %2115 }
 0x56c   : > { %v2178_v51 = vpop.permute.xlu0 %2177  ;;  %v2124_v63 = vadd.f32 %v2116_v2, %v2062_v54 }
 0x56e   : > { %v2186_v52 = vadd.f32 %v2178_v51, %v2124_v63 }
 0x56f   : > { %v2089_v50 = vpop.permute.xlu1 %2088 }
 0x570   : > { %v2151_v25 = vpop.permute.xlu0 %2150  ;;  %v2093_v10 = vadd.f32 %v2089_v50, %v2036_v12  ;;  %v2221_v56 = vrot.slane %v2186_v52, 1 }
 0x572   : > { %v2155_v58 = vadd.f32 %v2151_v25, %v2093_v10 }
 0x573   : > { %v2180_v37 = vpop.permute.xlu1 %2179 }
 0x574   : > { %v2187_v44 = vadd.f32 %v2180_v37, %v2125_v36  ;;  %v2213_v7 = vpop.permute.xlu0 %2212 }
 0x575   : > { %v2217_v40 = vadd.f32 %v2213_v7, %v2155_v58 }
 0x576   : > { %v2222_v3 = vrot.slane %v2187_v44, 1 }
 0x577   : > { %v2149_v59 = vpop.permute.xlu1 %2148 }
 0x578   : > { %v2225_v0 = vsel %vm1016_vm0, %v2222_v3, %v2224_v9  ;;  %v2223_v45 = vsel %vm1016_vm0, %v2221_v56, %v2222_v3  ;;  %v2154_v62 = vadd.f32 %v2149_v59, %v2092_v26 }
 0x579   : > { %v2229_v55 = vadd.f32 %v2225_v0, %v2217_v40 }
 0x57b   : > { %2232 = vst.msk [vmem:[%s217_s22 + $0x8] sm:$0xff] %vm2230_vm5, %v2229_v55  ;;  %v2211_v38 = vpop.permute.xlu1 %2210 }
 0x57c   : > { %v2216_v8 = vadd.f32 %v2211_v38, %v2154_v62 }
 0x57e   : > { %v2228_v23 = vadd.f32 %v2223_v45, %v2216_v8 }
 0x580   : > { %2231 = vst.msk [vmem:[%s217_s22] sm:$0xff] %vm2230_vm5, %v2228_v23 }
 0x581   : > { %2618 = shalt.err (!%p2615_p11)
}
 0x582   : > { %s2619_s29 = scalar_lea.hbm %s4620_s9, 256  ;;  %s2623_s11 = scalar_lea.hbm %s4674_s3, 512 }
 0x583   : > { %p2620_p3 = scmp.ne.s32.totalorder %s4620_s9, %s2619_s29  ;;  %p2624_p6 = scmp.lt.u32.totalorder %s4620_s9, %s4674_s3 }
 0x584   : > { %p2625_p12 = scmp.lt.u32.totalorder %s2623_s11, %s2619_s29  ;;  %p2627_p8 = scmp.lt.u32.totalorder %s2619_s29, %s4620_s9 }
 0x585   : > { %p2621_p7 = pnand %p2620_p3, %p4892_p0 }
 0x586   : > { %p2626_p1 = por %p2625_p12, %p2624_p6 }
 0x587   : > { %p2622_p10 = pneg %p2621_p7 }
 0x588   : > { %p2628_p2 = por %p2627_p8, %p2626_p1 }
 0x58a   : > { %p2629_p5 = pnand %p2628_p2, %p2622_p10 }
 0x58c   : > { %2632 = shalt.err (!%p2629_p5)
}
 0x58d   : > { %s2715_s4 = smov 128   ;;  %s2716_s13 = smov 8  }
 0x58e   : > { %2465 = dma.vmem_to_hbm [thread:$0]  (%p4892_p0), %s4622_s21, 256, %s4620_s9, %s2234_s0, %s2715_s4, %s2715_s4, %s2716_s13  }
 0x58f PF: > { %s2262_s20 = sand.u32 1, %s2671_s14   ;;  %p4893_p4 = scmp.ne.s32.totalorder %s4747_s24, 0 }
 0x590   : > { %p4894_p9 = scmp.ge.s32.totalorder %s2691_s19, 2  ;;  %s2263_s22 = scalar_lea.sflag [#allocation9], %s2262_s20 }
 0x592   : > { %p2476_p13 = pnand %p4894_p9, %p4893_p4 }
 0x594   : > { %2666 = dma.done.wait (!%p2476_p13), %s2263_s22, 256  }
 0x595   : > { %2668 = vsyncadd (!%p2476_p13), %s2263_s22, 4294967040  ;;  %s21_s19 = sadd.s32 1, %s2691_s19   ;;  %s4895_s14 = smov %s2675_s15 }
 0x596   : > { %p18_p11 = scmp.ge.s32.totalorder %s21_s19, 4   ;;  %s4896_s15 = smov %s2679_s16 }
 0x597   : > { %s4897_s16 = smov %s2832_s10  ;;  %s4898_s17 = smov %s2687_s18 }
 0x598   : > { %s4899_s18 = smov %s4901_s30  ;;  %20 = sbr.rel (!%p18_p11) target bundleno = 11 (0xb), region = 108 }
 0x59f   :  { %2268 = vsyncpa [#allocation8], 1 }
 0x5a0   :  { %2270 = vsyncpa [#allocation8 + $0x1], 1 }
 0x5a1   :  { %2271 = vsyncpa [#allocation9], 1 }
 0x5a2   :  { %2273 = vsyncpa [#allocation9 + $0x1], 1 }
 0x5a3   :  { %2274 = vsyncpa [#allocation10], 1 }
 0x5a4   :  { %2276 = vsyncpa [#allocation10 + $0x1], 1 }

</bundles_post_ra>
